<compile_context>
chip_gen: v7x
topology: tpu7x:2x2x1
jax: 0.10.0
libtpu: 0.0.40
codegen_flags: <defaults>
</compile_context>

<pallas_src>
import functools
import numpy as np
import jax
import jax.numpy as jnp
from jax import lax
from jax.experimental import pallas as pl
from jax.experimental.pallas import tpu as pltpu

LEAKY_SLOPE = 0.2
BN_EPS = 1e-5
VMEM_LIMIT = 48 * 1024 * 1024   # explicit scoped-VMEM limit (safe on v5e/v6e/v7x)


# ---------------------------------------------------------------------------
# tile helpers
# ---------------------------------------------------------------------------

def _pick_tile(n, max_tile):
    """Largest multiple of 8 that divides n and is <= max_tile (else n)."""
    t = (max_tile // 8) * 8
    while t >= 8:
        if n % t == 0:
            return t
        t -= 8
    return n


def _pairwise_tm(n):
    """Row-tile for the pairwise kernel: keep the [TM, N] f32 output tile <= ~8 MiB."""
    cap = min(512, max(8, (8 * 1024 * 1024) // (n * 4)))
    return _pick_tile(n, cap)


# ---------------------------------------------------------------------------
# Pallas kernels
# ---------------------------------------------------------------------------

def _pairwise_kernel(xi_ref, xj_ref, sqi_ref, sqj_ref, o_ref):
    # xi: [1, TM, C]  xj: [1, N, C] (resident per batch)
    # sqi: [1, TM, 1]  sqj: [1, 1, N]  o: [1, TM, N]
    inner = lax.dot_general(xi_ref[0], xj_ref[0], (((1,), (1,)), ((), ())),
                            preferred_element_type=jnp.float32)   # [TM, N]
    # pairwise_distance = -||xi||^2 + 2 xi.xj - ||xj||^2  (matches torch knn)
    o_ref[0] = 2.0 * inner - sqi_ref[0] - sqj_ref[0]


def pairwise_neg_sqdist(xT):
    """xT: [B, N, C] f32 (channels-last) -> negative squared distances [B, N, N].

    Kept in f32 so k-NN ordering matches the reference."""
    B, N, C = xT.shape
    TM = _pairwise_tm(N)
    sq = jnp.sum(xT * xT, axis=-1)                                # [B, N]
    return pl.pallas_call(
        _pairwise_kernel,
        out_shape=jax.ShapeDtypeStruct((B, N, N), jnp.float32),
        grid=(B, N // TM),
        in_specs=[
            pl.BlockSpec((1, TM, C), lambda b, i: (b, i, 0)),
            pl.BlockSpec((1, N, C), lambda b, i: (b, 0, 0)),      # full-N resident
            pl.BlockSpec((1, TM, 1), lambda b, i: (b, i, 0)),
            pl.BlockSpec((1, 1, N), lambda b, i: (b, 0, 0)),
        ],
        out_specs=pl.BlockSpec((1, TM, N), lambda b, i: (b, i, 0)),
        compiler_params=pltpu.CompilerParams(
            dimension_semantics=("parallel", "parallel"),
            vmem_limit_bytes=VMEM_LIMIT),
    )(xT, xT, sq[:, :, None], sq[:, None, :])


def _edge_conv_kernel(nbr_ref, x_ref, wt_ref, wd_ref, b_ref, o_ref):
    # nbr: [1, TN, C] bf16 (neighbor kk rows)   x: [1, TN, C] bf16 (resident)
    # wt/wd: [C, Cout] bf16 (BN scale folded)   b: [1, Cout] f32
    # o: [1, TN, Cout] f32  (VMEM-resident over the K axis -> running max lives here)
    kk = pl.program_id(2)
    y = jnp.dot(nbr_ref[0], wt_ref[...], preferred_element_type=jnp.float32)

    @pl.when(kk == 0)
    def _():
        o_ref[0] = y

    @pl.when(kk > 0)
    def _():
        o_ref[0] = jnp.maximum(o_ref[0], y)

    @pl.when(kk == pl.num_programs(2) - 1)
    def _():
        # center term + bias + LeakyReLU hoisted out of the K loop (exact).
        z = (o_ref[0]
             + jnp.dot(x_ref[0], wd_ref[...], preferred_element_type=jnp.float32)
             + b_ref[...])
        o_ref[0] = jnp.where(z >= 0, z, LEAKY_SLOPE * z)


def edge_conv_max(nbr, xb, w_top, w_delta, shift, N, K):
    """nbr: [B, K*N, C] bf16 (neighbor-major rows), xb: [B, N, C] bf16,
    w_top/w_delta: [C, Cout] bf16, shift: [Cout] f32.
    Returns max_k(LeakyReLU(nbr_k @ w_top + xb @ w_delta + shift)): [B, N, Cout] f32."""
    B, KN, C = nbr.shape
    Cout = w_top.shape[1]
    TN = _pick_tile(N, 1024)
    nt = N // TN
    return pl.pallas_call(
        _edge_conv_kernel,
        out_shape=jax.ShapeDtypeStruct((B, N, Cout), jnp.float32),
        grid=(B, nt, K),
        in_specs=[
            # neighbor-major: row block for neighbor kk, point-tile n
            pl.BlockSpec((1, TN, C), lambda b, n, kk: (b, kk * nt + n, 0)),
            pl.BlockSpec((1, TN, C), lambda b, n, kk: (b, n, 0)),   # constant over kk
            pl.BlockSpec((C, Cout), lambda b, n, kk: (0, 0)),       # resident
            pl.BlockSpec((C, Cout), lambda b, n, kk: (0, 0)),       # resident
            pl.BlockSpec((1, Cout), lambda b, n, kk: (0, 0)),       # resident
        ],
        out_specs=pl.BlockSpec((1, TN, Cout), lambda b, n, kk: (b, n, 0)),
        compiler_params=pltpu.CompilerParams(
            dimension_semantics=("parallel", "parallel", "arbitrary"),
            vmem_limit_bytes=VMEM_LIMIT),
    )(nbr, xb, w_top, w_delta, shift.reshape(1, -1).astype(jnp.float32))


def _conv5_kernel(x1_ref, x2_ref, x3_ref, x4_ref,
                  w1_ref, w2_ref, w3_ref, w4_ref, b_ref, o_ref):
    # Four partial matmuls against row-slices of w5 -> no xcat concat in HBM.
    y = jnp.dot(x1_ref[0].astype(jnp.bfloat16), w1_ref[...],
                preferred_element_type=jnp.float32)
    y = y + jnp.dot(x2_ref[0].astype(jnp.bfloat16), w2_ref[...],
                    preferred_element_type=jnp.float32)
    y = y + jnp.dot(x3_ref[0].astype(jnp.bfloat16), w3_ref[...],
                    preferred_element_type=jnp.float32)
    y = y + jnp.dot(x4_ref[0].astype(jnp.bfloat16), w4_ref[...],
                    preferred_element_type=jnp.float32)
    y = y + b_ref[...]
    o_ref[0] = jnp.where(y >= 0, y, LEAKY_SLOPE * y)


def pointwise_mlp_split(xs, ws, shift):
    """xs: list of [B, N, Ci] f32; ws: list of [Ci, Cout] bf16 (BN scale folded);
    shift: [Cout] f32.  Returns LeakyReLU(sum_i xs[i] @ ws[i] + shift): [B, N, Cout]."""
    B, N, _ = xs[0].shape
    Cout = ws[0].shape[1]
    TN = _pick_tile(N, 1024)
    in_specs = (
        [pl.BlockSpec((1, TN, x.shape[2]), lambda b, n: (b, n, 0)) for x in xs]
        + [pl.BlockSpec(w.shape, lambda b, n: (0, 0)) for w in ws]
        + [pl.BlockSpec((1, Cout), lambda b, n: (0, 0))]
    )
    return pl.pallas_call(
        _conv5_kernel,
        out_shape=jax.ShapeDtypeStruct((B, N, Cout), jnp.float32),
        grid=(B, N // TN),
        in_specs=in_specs,
        out_specs=pl.BlockSpec((1, TN, Cout), lambda b, n: (b, n, 0)),
        compiler_params=pltpu.CompilerParams(
            dimension_semantics=("parallel", "parallel"),
            vmem_limit_bytes=VMEM_LIMIT),
    )(*xs, *ws, shift.reshape(1, -1).astype(jnp.float32))


# ---------------------------------------------------------------------------
# Graph feature construction (glue) + layers
# ---------------------------------------------------------------------------

def edge_conv_layer(xT, w_top, w_delta, shift, k):
    """One DGCNN edge-conv block on channels-last features xT: [B, N, C] f32."""
    B, N, C = xT.shape
    d = pairwise_neg_sqdist(xT)                     # Pallas (MXU, f32)
    # TODO(synk): fuse a streaming top-k into the pairwise kernel to avoid the
    #             [B, N, N] HBM round trip for large N.
    idx = lax.top_k(d, k)[1]                        # [B, N, k] (== torch.topk indices)
    idx = jnp.transpose(idx, (0, 2, 1))             # [B, k, N] -> neighbor-major gather
    xb = xT.astype(jnp.bfloat16)                    # bf16 neighbor stream halves HBM traffic
    # TODO(synk): fuse this gather into the edge-conv kernel (scalar-prefetch idx +
    #             in-kernel row gather / manual DMA) to avoid materializing nbr in HBM.
    nbr = jax.vmap(lambda xrow, irow: xrow[irow])(xb, idx)      # [B, k, N, C]
    nbr = nbr.reshape(B, k * N, C)                  # neighbor-major rows, no relayout
    return edge_conv_max(nbr, xb, w_top, w_delta, shift, N, k)


# ---------------------------------------------------------------------------
# Parameters & forward
# ---------------------------------------------------------------------------

def init_params(key, emb_dims):
    # Conv weight stored as [Cin, Cout] (== torch Conv2d/Conv1d weight[:, :, 0(, 0)].T)
    specs = {'conv1': (6, 64), 'conv2': (128, 64), 'conv3': (128, 128),
             'conv4': (256, 256), 'conv5': (512, emb_dims)}
    params = {}
    for name, (cin, cout) in specs.items():
        key, k1, k2, k3 = jax.random.split(key, 4)
        w = jax.random.normal(k1, (cin, cout), jnp.float32) / np.sqrt(cin)
        gamma = 1.0 + 0.1 * jax.random.normal(k2, (cout,), jnp.float32)
        beta = 0.1 * jax.random.normal(k3, (cout,), jnp.float32)
        params[name] = (w, gamma, beta)
    return params


def fold_bn_and_split(params):
    """Fold inference-mode BatchNorm into the conv weights (scale) + shift, and
    split the edge-conv weights:
        (nbr - x) @ W[:C] + x @ W[C:] == nbr @ W[:C] + x @ (W[C:] - W[:C])
    so only the raw neighbor rows need to be streamed.
    # TODO(synk): assumes running_mean=0, running_var=1 (eps=1e-5); real trained
    #             running statistics are not reproduced."""
    folded = {}
    for name, (w, gamma, beta) in params.items():
        scale = gamma / jnp.sqrt(jnp.float32(1.0 + BN_EPS))
        wf = w * scale[None, :]                     # fold BN scale (per out channel)
        beta = beta.astype(jnp.float32)
        if name == 'conv5':
            folded[name] = (wf.astype(jnp.bfloat16), beta)
        else:
            C = wf.shape[0] // 2
            w_top = wf[:C].astype(jnp.bfloat16)                 # multiplies nbr
            w_delta = (wf[C:] - wf[:C]).astype(jnp.bfloat16)    # multiplies x
            folded[name] = (w_top, w_delta, beta)
    return folded


def dgcnn_backbone(pointcloud, params, k=8):
    """pointcloud: [B, N, 3(+F)] -> (features [B, emb, N], xyz [B, N, 3], end_points)."""
    end_points = {}
    xyz = pointcloud[..., 0:3]                      # [B, N, 3]
    end_points['input_xyz'] = xyz
    if pointcloud.shape[-1] > 3:
        end_points['input_features'] = jnp.transpose(pointcloud[..., 3:], (0, 2, 1))
    else:
        end_points['input_features'] = None

    B, N, _ = pointcloud.shape
    assert N % 8 == 0, "number of points must be a multiple of 8"

    p = fold_bn_and_split(params)
    x = pointcloud                                  # channels-last [B, N, Cin]
    x1 = edge_conv_layer(x,  *p['conv1'], k)        # [B, N, 64]
    x2 = edge_conv_layer(x1, *p['conv2'], k)        # [B, N, 64]
    x3 = edge_conv_layer(x2, *p['conv3'], k)        # [B, N, 128]
    x4 = edge_conv_layer(x3, *p['conv4'], k)        # [B, N, 256]

    w5, b5 = p['conv5']                             # [512, emb] bf16, [emb] f32
    w5_splits = [w5[0:64], w5[64:128], w5[128:256], w5[256:512]]
    feat = pointwise_mlp_split([x1, x2, x3, x4], w5_splits, b5)  # [B, N, emb]
    # TODO(synk): emit the conv5 output pre-transposed in-kernel to skip this HBM pass.
    feat = jnp.transpose(feat, (0, 2, 1))           # [B, emb, N]  (torch layout)

    end_points['fp2_features'] = feat
    end_points['fp2_xyz'] = xyz
    return feat, xyz, end_points


if __name__ == "__main__":
    B, N, K, EMB = 2, 32, 8, 64   # small shapes; k must be <= N
    key = jax.random.PRNGKey(0)
    kp, kx = jax.random.split(key)
    params = init_params(kp, EMB)
    pointcloud = jax.random.normal(kx, (B, N, 3), jnp.float32)

    fwd = jax.jit(functools.partial(dgcnn_backbone, k=K))
    feat, xyz, end_points = fwd(pointcloud, params)
    jax.block_until_ready(feat)

    assert feat.shape == (B, EMB, N)
    assert xyz.shape == (B, N, 3)
    assert end_points['fp2_features'].shape == (B, EMB, N)
    assert bool(jnp.all(jnp.isfinite(feat)))
    print("KERNEL_OK")
</pallas_src>

<mosaic_0001>
module attributes {stable_mosaic.version = 11 : i64} {
  func.func @_pairwise_kernel(%arg0: i32, %arg1: i32, %arg2: memref<1x32x3xf32, #tpu.memory_space<vmem>>, %arg3: memref<1x32x3xf32, #tpu.memory_space<vmem>>, %arg4: memref<1x32x1xf32, #tpu.memory_space<vmem>>, %arg5: memref<1x1x32xf32, #tpu.memory_space<vmem>>, %arg6: memref<1x32x32xf32, #tpu.memory_space<vmem>>) attributes {dimension_semantics = [#tpu.dimension_semantics<parallel>, #tpu.dimension_semantics<parallel>], iteration_bounds = array<i64: 2, 1>, scalar_prefetch = 0 : i64, scratch_operands = 0 : i64, tpu.core_type = #tpu.core_type<tc>, window_params = [{transform_indices = @transform_0, window_bounds = array<i64: 1, 32, 3>}, {transform_indices = @transform_1, window_bounds = array<i64: 1, 32, 3>}, {transform_indices = @transform_2, window_bounds = array<i64: 1, 32, 1>}, {transform_indices = @transform_3, window_bounds = array<i64: 1, 1, 32>}, {transform_indices = @transform_4, window_bounds = array<i64: 1, 32, 32>}]} {
    %c0 = arith.constant 0 : index
    %c0_0 = arith.constant 0 : index
    %c0_1 = arith.constant 0 : index
    %0 = vector.load %arg2[%c0, %c0_0, %c0_1] : memref<1x32x3xf32, #tpu.memory_space<vmem>>, vector<1x32x3xf32>
    %1 = vector.shape_cast %0 : vector<1x32x3xf32> to vector<32x3xf32>
    %c0_2 = arith.constant 0 : index
    %c0_3 = arith.constant 0 : index
    %c0_4 = arith.constant 0 : index
    %2 = vector.load %arg3[%c0_2, %c0_3, %c0_4] : memref<1x32x3xf32, #tpu.memory_space<vmem>>, vector<1x32x3xf32>
    %3 = vector.shape_cast %2 : vector<1x32x3xf32> to vector<32x3xf32>
    %cst = arith.constant dense<0.000000e+00> : vector<32x32xf32>
    %4 = tpu.matmul %1, %3, %cst {dimension_numbers = #tpu.dot_dimension_numbers<[1], [1], [0], [0], [0, 0, 1, 0], [], []>} : vector<32x3xf32>, vector<32x3xf32>, vector<32x32xf32> -> vector<32x32xf32>
    %cst_5 = arith.constant 2.000000e+00 : f32
    %5 = vector.broadcast %cst_5 : f32 to vector<32x32xf32>
    %6 = arith.mulf %5, %4 : vector<32x32xf32>
    %c0_6 = arith.constant 0 : index
    %c0_7 = arith.constant 0 : index
    %c0_8 = arith.constant 0 : index
    %7 = vector.load %arg4[%c0_6, %c0_7, %c0_8] : memref<1x32x1xf32, #tpu.memory_space<vmem>>, vector<1x32x1xf32>
    %8 = vector.shape_cast %7 : vector<1x32x1xf32> to vector<32x1xf32>
    %9 = vector.broadcast %8 : vector<32x1xf32> to vector<32x32xf32>
    %10 = arith.subf %6, %9 : vector<32x32xf32>
    %c0_9 = arith.constant 0 : index
    %c0_10 = arith.constant 0 : index
    %c0_11 = arith.constant 0 : index
    %11 = vector.load %arg5[%c0_9, %c0_10, %c0_11] : memref<1x1x32xf32, #tpu.memory_space<vmem>>, vector<1x1x32xf32>
    %12 = vector.shape_cast %11 : vector<1x1x32xf32> to vector<1x32xf32>
    %13 = vector.broadcast %12 : vector<1x32xf32> to vector<32x32xf32>
    %14 = arith.subf %10, %13 : vector<32x32xf32>
    %c0_12 = arith.constant 0 : index
    %c0_13 = arith.constant 0 : index
    %c0_14 = arith.constant 0 : index
    %15 = vector.load %arg6[%c0_12, %c0_13, %c0_14] : memref<1x32x32xf32, #tpu.memory_space<vmem>>, vector<1x32x32xf32>
    %16 = vector.shape_cast %15 : vector<1x32x32xf32> to vector<32x32xf32>
    %17 = vector.shape_cast %14 : vector<32x32xf32> to vector<1x32x32xf32>
    tpu.vector_store %arg6[%c0_12, %c0_13, %c0_14], %17 {strides = array<i32>} : memref<1x32x32xf32, #tpu.memory_space<vmem>>, vector<1x32x32xf32>,
    return
  }
  func.func @transform_0(%arg0: i32, %arg1: i32) -> (i32, i32, i32) {
    %c0_i32 = arith.constant 0 : i32
    %c0_i32_0 = arith.constant 0 : i32
    return %arg0, %arg1, %c0_i32 : i32, i32, i32
  }
  func.func @transform_1(%arg0: i32, %arg1: i32) -> (i32, i32, i32) {
    %c0_i32 = arith.constant 0 : i32
    %c0_i32_0 = arith.constant 0 : i32
    %c0_i32_1 = arith.constant 0 : i32
    return %arg0, %c0_i32, %c0_i32_0 : i32, i32, i32
  }
  func.func @transform_2(%arg0: i32, %arg1: i32) -> (i32, i32, i32) {
    %c0_i32 = arith.constant 0 : i32
    %c0_i32_0 = arith.constant 0 : i32
    return %arg0, %arg1, %c0_i32 : i32, i32, i32
  }
  func.func @transform_3(%arg0: i32, %arg1: i32) -> (i32, i32, i32) {
    %c0_i32 = arith.constant 0 : i32
    %c0_i32_0 = arith.constant 0 : i32
    %c0_i32_1 = arith.constant 0 : i32
    return %arg0, %c0_i32, %c0_i32_0 : i32, i32, i32
  }
  func.func @transform_4(%arg0: i32, %arg1: i32) -> (i32, i32, i32) {
    %c0_i32 = arith.constant 0 : i32
    %c0_i32_0 = arith.constant 0 : i32
    return %arg0, %arg1, %c0_i32 : i32, i32, i32
  }
}

module attributes {stable_mosaic.version = 11 : i64} {
  func.func @_edge_conv_kernel(%arg0: i32, %arg1: i32, %arg2: i32, %arg3: memref<1x32x3xbf16, #tpu.memory_space<vmem>>, %arg4: memref<1x32x3xbf16, #tpu.memory_space<vmem>>, %arg5: memref<3x64xbf16, #tpu.memory_space<vmem>>, %arg6: memref<3x64xbf16, #tpu.memory_space<vmem>>, %arg7: memref<1x64xf32, #tpu.memory_space<vmem>>, %arg8: memref<1x32x64xf32, #tpu.memory_space<vmem>>) attributes {dimension_semantics = [#tpu.dimension_semantics<parallel>, #tpu.dimension_semantics<parallel>, #tpu.dimension_semantics<arbitrary>], iteration_bounds = array<i64: 2, 1, 8>, scalar_prefetch = 0 : i64, scratch_operands = 0 : i64, tpu.core_type = #tpu.core_type<tc>, window_params = [{transform_indices = @transform_0, window_bounds = array<i64: 1, 32, 3>}, {transform_indices = @transform_1, window_bounds = array<i64: 1, 32, 3>}, {pipeline_mode = #tpu.pipeline_mode<synchronous>, transform_indices = @transform_2, window_bounds = array<i64: 3, 64>}, {pipeline_mode = #tpu.pipeline_mode<synchronous>, transform_indices = @transform_3, window_bounds = array<i64: 3, 64>}, {pipeline_mode = #tpu.pipeline_mode<synchronous>, transform_indices = @transform_4, window_bounds = array<i64: 1, 64>}, {transform_indices = @transform_5, window_bounds = array<i64: 1, 32, 64>}]} {
    %c0 = arith.constant 0 : index
    %c0_0 = arith.constant 0 : index
    %c0_1 = arith.constant 0 : index
    %0 = vector.load %arg3[%c0, %c0_0, %c0_1] : memref<1x32x3xbf16, #tpu.memory_space<vmem>>, vector<1x32x3xbf16>
    %1 = vector.shape_cast %0 : vector<1x32x3xbf16> to vector<32x3xbf16>
    %c0_2 = arith.constant 0 : index
    %c0_3 = arith.constant 0 : index
    %2 = vector.load %arg5[%c0_2, %c0_3] : memref<3x64xbf16, #tpu.memory_space<vmem>>, vector<3x64xbf16>
    %cst = arith.constant dense<0.000000e+00> : vector<32x64xf32>
    %3 = tpu.matmul %1, %2, %cst {dimension_numbers = #tpu.dot_dimension_numbers<[1], [0], [0], [1], [0, 0, 1, 1], [], []>} : vector<32x3xbf16>, vector<3x64xbf16>, vector<32x64xf32> -> vector<32x64xf32>
    %c0_i32 = arith.constant 0 : i32
    %4 = arith.cmpi eq, %arg2, %c0_i32 : i32
    %5 = arith.extui %4 : i1 to i32
    %c0_i32_4 = arith.constant 0 : i32
    %6 = arith.cmpi ne, %5, %c0_i32_4 : i32
    scf.if %6 {
      %c0_8 = arith.constant 0 : index
      %c0_9 = arith.constant 0 : index
      %c0_10 = arith.constant 0 : index
      %13 = vector.load %arg8[%c0_8, %c0_9, %c0_10] : memref<1x32x64xf32, #tpu.memory_space<vmem>>, vector<1x32x64xf32>
      %14 = vector.shape_cast %13 : vector<1x32x64xf32> to vector<32x64xf32>
      %15 = vector.shape_cast %3 : vector<32x64xf32> to vector<1x32x64xf32>
      tpu.vector_store %arg8[%c0_8, %c0_9, %c0_10], %15 {strides = array<i32>} : memref<1x32x64xf32, #tpu.memory_space<vmem>>, vector<1x32x64xf32>,
    } else {
    }
    %c0_i32_5 = arith.constant 0 : i32
    %7 = arith.cmpi sgt, %arg2, %c0_i32_5 : i32
    %8 = arith.extui %7 : i1 to i32
    %c0_i32_6 = arith.constant 0 : i32
    %9 = arith.cmpi ne, %8, %c0_i32_6 : i32
    scf.if %9 {
      %c0_8 = arith.constant 0 : index
      %c0_9 = arith.constant 0 : index
      %c0_10 = arith.constant 0 : index
      %13 = vector.load %arg8[%c0_8, %c0_9, %c0_10] : memref<1x32x64xf32, #tpu.memory_space<vmem>>, vector<1x32x64xf32>
      %14 = vector.shape_cast %13 : vector<1x32x64xf32> to vector<32x64xf32>
      %15 = arith.maximumf %14, %3 : vector<32x64xf32>
      %c0_11 = arith.constant 0 : index
      %c0_12 = arith.constant 0 : index
      %c0_13 = arith.constant 0 : index
      %16 = vector.load %arg8[%c0_11, %c0_12, %c0_13] : memref<1x32x64xf32, #tpu.memory_space<vmem>>, vector<1x32x64xf32>
      %17 = vector.shape_cast %16 : vector<1x32x64xf32> to vector<32x64xf32>
      %18 = vector.shape_cast %15 : vector<32x64xf32> to vector<1x32x64xf32>
      tpu.vector_store %arg8[%c0_11, %c0_12, %c0_13], %18 {strides = array<i32>} : memref<1x32x64xf32, #tpu.memory_space<vmem>>, vector<1x32x64xf32>,
    } else {
    }
    %c7_i32 = arith.constant 7 : i32
    %10 = arith.cmpi eq, %arg2, %c7_i32 : i32
    %11 = arith.extui %10 : i1 to i32
    %c0_i32_7 = arith.constant 0 : i32
    %12 = arith.cmpi ne, %11, %c0_i32_7 : i32
    scf.if %12 {
      %c0_8 = arith.constant 0 : index
      %c0_9 = arith.constant 0 : index
      %c0_10 = arith.constant 0 : index
      %13 = vector.load %arg8[%c0_8, %c0_9, %c0_10] : memref<1x32x64xf32, #tpu.memory_space<vmem>>, vector<1x32x64xf32>
      %14 = vector.shape_cast %13 : vector<1x32x64xf32> to vector<32x64xf32>
      %c0_11 = arith.constant 0 : index
      %c0_12 = arith.constant 0 : index
      %c0_13 = arith.constant 0 : index
      %15 = vector.load %arg4[%c0_11, %c0_12, %c0_13] : memref<1x32x3xbf16, #tpu.memory_space<vmem>>, vector<1x32x3xbf16>
      %16 = vector.shape_cast %15 : vector<1x32x3xbf16> to vector<32x3xbf16>
      %c0_14 = arith.constant 0 : index
      %c0_15 = arith.constant 0 : index
      %17 = vector.load %arg6[%c0_14, %c0_15] : memref<3x64xbf16, #tpu.memory_space<vmem>>, vector<3x64xbf16>
      %cst_16 = arith.constant dense<0.000000e+00> : vector<32x64xf32>
      %18 = tpu.matmul %16, %17, %cst_16 {dimension_numbers = #tpu.dot_dimension_numbers<[1], [0], [0], [1], [0, 0, 1, 1], [], []>} : vector<32x3xbf16>, vector<3x64xbf16>, vector<32x64xf32> -> vector<32x64xf32>
      %19 = arith.addf %14, %18 : vector<32x64xf32>
      %c0_17 = arith.constant 0 : index
      %c0_18 = arith.constant 0 : index
      %20 = vector.load %arg7[%c0_17, %c0_18] : memref<1x64xf32, #tpu.memory_space<vmem>>, vector<1x64xf32>
      %21 = vector.broadcast %20 : vector<1x64xf32> to vector<32x64xf32>
      %22 = arith.addf %19, %21 : vector<32x64xf32>
      %cst_19 = arith.constant 0.000000e+00 : f32
      %23 = vector.broadcast %cst_19 : f32 to vector<32x64xf32>
      %24 = arith.cmpf oge, %22, %23 : vector<32x64xf32>
      %cst_20 = arith.constant 2.000000e-01 : f32
      %25 = vector.broadcast %cst_20 : f32 to vector<32x64xf32>
      %26 = arith.mulf %25, %22 : vector<32x64xf32>
      %27 = arith.select %24, %22, %26 : vector<32x64xi1>, vector<32x64xf32>
      %c0_21 = arith.constant 0 : index
      %c0_22 = arith.constant 0 : index
      %c0_23 = arith.constant 0 : index
      %28 = vector.load %arg8[%c0_21, %c0_22, %c0_23] : memref<1x32x64xf32, #tpu.memory_space<vmem>>, vector<1x32x64xf32>
      %29 = vector.shape_cast %28 : vector<1x32x64xf32> to vector<32x64xf32>
      %30 = vector.shape_cast %27 : vector<32x64xf32> to vector<1x32x64xf32>
      tpu.vector_store %arg8[%c0_21, %c0_22, %c0_23], %30 {strides = array<i32>} : memref<1x32x64xf32, #tpu.memory_space<vmem>>, vector<1x32x64xf32>,
    } else {
    }
    return
  }
  func.func @transform_0(%arg0: i32, %arg1: i32, %arg2: i32) -> (i32, i32, i32) {
    %c1_i32 = arith.constant 1 : i32
    %0 = arith.muli %arg2, %c1_i32 : i32
    %1 = arith.addi %0, %arg1 : i32
    %c0_i32 = arith.constant 0 : i32
    %c0_i32_0 = arith.constant 0 : i32
    return %arg0, %1, %c0_i32 : i32, i32, i32
  }
  func.func @transform_1(%arg0: i32, %arg1: i32, %arg2: i32) -> (i32, i32, i32) {
    %c0_i32 = arith.constant 0 : i32
    %c0_i32_0 = arith.constant 0 : i32
    return %arg0, %arg1, %c0_i32 : i32, i32, i32
  }
  func.func @transform_2(%arg0: i32, %arg1: i32, %arg2: i32) -> (i32, i32) {
    %c0_i32 = arith.constant 0 : i32
    %c0_i32_0 = arith.constant 0 : i32
    %c0_i32_1 = arith.constant 0 : i32
    return %c0_i32, %c0_i32_0 : i32, i32
  }
  func.func @transform_3(%arg0: i32, %arg1: i32, %arg2: i32) -> (i32, i32) {
    %c0_i32 = arith.constant 0 : i32
    %c0_i32_0 = arith.constant 0 : i32
    %c0_i32_1 = arith.constant 0 : i32
    return %c0_i32, %c0_i32_0 : i32, i32
  }
  func.func @transform_4(%arg0: i32, %arg1: i32, %arg2: i32) -> (i32, i32) {
    %c0_i32 = arith.constant 0 : i32
    %c0_i32_0 = arith.constant 0 : i32
    %c0_i32_1 = arith.constant 0 : i32
    return %c0_i32, %c0_i32_0 : i32, i32
  }
  func.func @transform_5(%arg0: i32, %arg1: i32, %arg2: i32) -> (i32, i32, i32) {
    %c0_i32 = arith.constant 0 : i32
    %c0_i32_0 = arith.constant 0 : i32
    return %arg0, %arg1, %c0_i32 : i32, i32, i32
  }
}

module attributes {stable_mosaic.version = 11 : i64} {
  func.func @_pairwise_kernel(%arg0: i32, %arg1: i32, %arg2: memref<1x32x64xf32, #tpu.memory_space<vmem>>, %arg3: memref<1x32x64xf32, #tpu.memory_space<vmem>>, %arg4: memref<1x32x1xf32, #tpu.memory_space<vmem>>, %arg5: memref<1x1x32xf32, #tpu.memory_space<vmem>>, %arg6: memref<1x32x32xf32, #tpu.memory_space<vmem>>) attributes {dimension_semantics = [#tpu.dimension_semantics<parallel>, #tpu.dimension_semantics<parallel>], iteration_bounds = array<i64: 2, 1>, scalar_prefetch = 0 : i64, scratch_operands = 0 : i64, tpu.core_type = #tpu.core_type<tc>, window_params = [{transform_indices = @transform_0, window_bounds = array<i64: 1, 32, 64>}, {transform_indices = @transform_1, window_bounds = array<i64: 1, 32, 64>}, {transform_indices = @transform_2, window_bounds = array<i64: 1, 32, 1>}, {transform_indices = @transform_3, window_bounds = array<i64: 1, 1, 32>}, {transform_indices = @transform_4, window_bounds = array<i64: 1, 32, 32>}]} {
    %c0 = arith.constant 0 : index
    %c0_0 = arith.constant 0 : index
    %c0_1 = arith.constant 0 : index
    %0 = vector.load %arg2[%c0, %c0_0, %c0_1] : memref<1x32x64xf32, #tpu.memory_space<vmem>>, vector<1x32x64xf32>
    %1 = vector.shape_cast %0 : vector<1x32x64xf32> to vector<32x64xf32>
    %c0_2 = arith.constant 0 : index
    %c0_3 = arith.constant 0 : index
    %c0_4 = arith.constant 0 : index
    %2 = vector.load %arg3[%c0_2, %c0_3, %c0_4] : memref<1x32x64xf32, #tpu.memory_space<vmem>>, vector<1x32x64xf32>
    %3 = vector.shape_cast %2 : vector<1x32x64xf32> to vector<32x64xf32>
    %cst = arith.constant dense<0.000000e+00> : vector<32x32xf32>
    %4 = tpu.matmul %1, %3, %cst {dimension_numbers = #tpu.dot_dimension_numbers<[1], [1], [0], [0], [0, 0, 1, 0], [], []>} : vector<32x64xf32>, vector<32x64xf32>, vector<32x32xf32> -> vector<32x32xf32>
    %cst_5 = arith.constant 2.000000e+00 : f32
    %5 = vector.broadcast %cst_5 : f32 to vector<32x32xf32>
    %6 = arith.mulf %5, %4 : vector<32x32xf32>
    %c0_6 = arith.constant 0 : index
    %c0_7 = arith.constant 0 : index
    %c0_8 = arith.constant 0 : index
    %7 = vector.load %arg4[%c0_6, %c0_7, %c0_8] : memref<1x32x1xf32, #tpu.memory_space<vmem>>, vector<1x32x1xf32>
    %8 = vector.shape_cast %7 : vector<1x32x1xf32> to vector<32x1xf32>
    %9 = vector.broadcast %8 : vector<32x1xf32> to vector<32x32xf32>
    %10 = arith.subf %6, %9 : vector<32x32xf32>
    %c0_9 = arith.constant 0 : index
    %c0_10 = arith.constant 0 : index
    %c0_11 = arith.constant 0 : index
    %11 = vector.load %arg5[%c0_9, %c0_10, %c0_11] : memref<1x1x32xf32, #tpu.memory_space<vmem>>, vector<1x1x32xf32>
    %12 = vector.shape_cast %11 : vector<1x1x32xf32> to vector<1x32xf32>
    %13 = vector.broadcast %12 : vector<1x32xf32> to vector<32x32xf32>
    %14 = arith.subf %10, %13 : vector<32x32xf32>
    %c0_12 = arith.constant 0 : index
    %c0_13 = arith.constant 0 : index
    %c0_14 = arith.constant 0 : index
    %15 = vector.load %arg6[%c0_12, %c0_13, %c0_14] : memref<1x32x32xf32, #tpu.memory_space<vmem>>, vector<1x32x32xf32>
    %16 = vector.shape_cast %15 : vector<1x32x32xf32> to vector<32x32xf32>
    %17 = vector.shape_cast %14 : vector<32x32xf32> to vector<1x32x32xf32>
    tpu.vector_store %arg6[%c0_12, %c0_13, %c0_14], %17 {strides = array<i32>} : memref<1x32x32xf32, #tpu.memory_space<vmem>>, vector<1x32x32xf32>,
    return
  }
  func.func @transform_0(%arg0: i32, %arg1: i32) -> (i32, i32, i32) {
    %c0_i32 = arith.constant 0 : i32
    %c0_i32_0 = arith.constant 0 : i32
    return %arg0, %arg1, %c0_i32 : i32, i32, i32
  }
  func.func @transform_1(%arg0: i32, %arg1: i32) -> (i32, i32, i32) {
    %c0_i32 = arith.constant 0 : i32
    %c0_i32_0 = arith.constant 0 : i32
    %c0_i32_1 = arith.constant 0 : i32
    return %arg0, %c0_i32, %c0_i32_0 : i32, i32, i32
  }
  func.func @transform_2(%arg0: i32, %arg1: i32) -> (i32, i32, i32) {
    %c0_i32 = arith.constant 0 : i32
    %c0_i32_0 = arith.constant 0 : i32
    return %arg0, %arg1, %c0_i32 : i32, i32, i32
  }
  func.func @transform_3(%arg0: i32, %arg1: i32) -> (i32, i32, i32) {
    %c0_i32 = arith.constant 0 : i32
    %c0_i32_0 = arith.constant 0 : i32
    %c0_i32_1 = arith.constant 0 : i32
    return %arg0, %c0_i32, %c0_i32_0 : i32, i32, i32
  }
  func.func @transform_4(%arg0: i32, %arg1: i32) -> (i32, i32, i32) {
    %c0_i32 = arith.constant 0 : i32
    %c0_i32_0 = arith.constant 0 : i32
    return %arg0, %arg1, %c0_i32 : i32, i32, i32
  }
}

module attributes {stable_mosaic.version = 11 : i64} {
  func.func @_edge_conv_kernel(%arg0: i32, %arg1: i32, %arg2: i32, %arg3: memref<1x32x64xbf16, #tpu.memory_space<vmem>>, %arg4: memref<1x32x64xbf16, #tpu.memory_space<vmem>>, %arg5: memref<64x64xbf16, #tpu.memory_space<vmem>>, %arg6: memref<64x64xbf16, #tpu.memory_space<vmem>>, %arg7: memref<1x64xf32, #tpu.memory_space<vmem>>, %arg8: memref<1x32x64xf32, #tpu.memory_space<vmem>>) attributes {dimension_semantics = [#tpu.dimension_semantics<parallel>, #tpu.dimension_semantics<parallel>, #tpu.dimension_semantics<arbitrary>], iteration_bounds = array<i64: 2, 1, 8>, scalar_prefetch = 0 : i64, scratch_operands = 0 : i64, tpu.core_type = #tpu.core_type<tc>, window_params = [{transform_indices = @transform_0, window_bounds = array<i64: 1, 32, 64>}, {transform_indices = @transform_1, window_bounds = array<i64: 1, 32, 64>}, {pipeline_mode = #tpu.pipeline_mode<synchronous>, transform_indices = @transform_2, window_bounds = array<i64: 64, 64>}, {pipeline_mode = #tpu.pipeline_mode<synchronous>, transform_indices = @transform_3, window_bounds = array<i64: 64, 64>}, {pipeline_mode = #tpu.pipeline_mode<synchronous>, transform_indices = @transform_4, window_bounds = array<i64: 1, 64>}, {transform_indices = @transform_5, window_bounds = array<i64: 1, 32, 64>}]} {
    %c0 = arith.constant 0 : index
    %c0_0 = arith.constant 0 : index
    %c0_1 = arith.constant 0 : index
    %0 = vector.load %arg3[%c0, %c0_0, %c0_1] : memref<1x32x64xbf16, #tpu.memory_space<vmem>>, vector<1x32x64xbf16>
    %1 = vector.shape_cast %0 : vector<1x32x64xbf16> to vector<32x64xbf16>
    %c0_2 = arith.constant 0 : index
    %c0_3 = arith.constant 0 : index
    %2 = vector.load %arg5[%c0_2, %c0_3] : memref<64x64xbf16, #tpu.memory_space<vmem>>, vector<64x64xbf16>
    %cst = arith.constant dense<0.000000e+00> : vector<32x64xf32>
    %3 = tpu.matmul %1, %2, %cst {dimension_numbers = #tpu.dot_dimension_numbers<[1], [0], [0], [1], [0, 0, 1, 1], [], []>} : vector<32x64xbf16>, vector<64x64xbf16>, vector<32x64xf32> -> vector<32x64xf32>
    %c0_i32 = arith.constant 0 : i32
    %4 = arith.cmpi eq, %arg2, %c0_i32 : i32
    %5 = arith.extui %4 : i1 to i32
    %c0_i32_4 = arith.constant 0 : i32
    %6 = arith.cmpi ne, %5, %c0_i32_4 : i32
    scf.if %6 {
      %c0_8 = arith.constant 0 : index
      %c0_9 = arith.constant 0 : index
      %c0_10 = arith.constant 0 : index
      %13 = vector.load %arg8[%c0_8, %c0_9, %c0_10] : memref<1x32x64xf32, #tpu.memory_space<vmem>>, vector<1x32x64xf32>
      %14 = vector.shape_cast %13 : vector<1x32x64xf32> to vector<32x64xf32>
      %15 = vector.shape_cast %3 : vector<32x64xf32> to vector<1x32x64xf32>
      tpu.vector_store %arg8[%c0_8, %c0_9, %c0_10], %15 {strides = array<i32>} : memref<1x32x64xf32, #tpu.memory_space<vmem>>, vector<1x32x64xf32>,
    } else {
    }
    %c0_i32_5 = arith.constant 0 : i32
    %7 = arith.cmpi sgt, %arg2, %c0_i32_5 : i32
    %8 = arith.extui %7 : i1 to i32
    %c0_i32_6 = arith.constant 0 : i32
    %9 = arith.cmpi ne, %8, %c0_i32_6 : i32
    scf.if %9 {
      %c0_8 = arith.constant 0 : index
      %c0_9 = arith.constant 0 : index
      %c0_10 = arith.constant 0 : index
      %13 = vector.load %arg8[%c0_8, %c0_9, %c0_10] : memref<1x32x64xf32, #tpu.memory_space<vmem>>, vector<1x32x64xf32>
      %14 = vector.shape_cast %13 : vector<1x32x64xf32> to vector<32x64xf32>
      %15 = arith.maximumf %14, %3 : vector<32x64xf32>
      %c0_11 = arith.constant 0 : index
      %c0_12 = arith.constant 0 : index
      %c0_13 = arith.constant 0 : index
      %16 = vector.load %arg8[%c0_11, %c0_12, %c0_13] : memref<1x32x64xf32, #tpu.memory_space<vmem>>, vector<1x32x64xf32>
      %17 = vector.shape_cast %16 : vector<1x32x64xf32> to vector<32x64xf32>
      %18 = vector.shape_cast %15 : vector<32x64xf32> to vector<1x32x64xf32>
      tpu.vector_store %arg8[%c0_11, %c0_12, %c0_13], %18 {strides = array<i32>} : memref<1x32x64xf32, #tpu.memory_space<vmem>>, vector<1x32x64xf32>,
    } else {
    }
    %c7_i32 = arith.constant 7 : i32
    %10 = arith.cmpi eq, %arg2, %c7_i32 : i32
    %11 = arith.extui %10 : i1 to i32
    %c0_i32_7 = arith.constant 0 : i32
    %12 = arith.cmpi ne, %11, %c0_i32_7 : i32
    scf.if %12 {
      %c0_8 = arith.constant 0 : index
      %c0_9 = arith.constant 0 : index
      %c0_10 = arith.constant 0 : index
      %13 = vector.load %arg8[%c0_8, %c0_9, %c0_10] : memref<1x32x64xf32, #tpu.memory_space<vmem>>, vector<1x32x64xf32>
      %14 = vector.shape_cast %13 : vector<1x32x64xf32> to vector<32x64xf32>
      %c0_11 = arith.constant 0 : index
      %c0_12 = arith.constant 0 : index
      %c0_13 = arith.constant 0 : index
      %15 = vector.load %arg4[%c0_11, %c0_12, %c0_13] : memref<1x32x64xbf16, #tpu.memory_space<vmem>>, vector<1x32x64xbf16>
      %16 = vector.shape_cast %15 : vector<1x32x64xbf16> to vector<32x64xbf16>
      %c0_14 = arith.constant 0 : index
      %c0_15 = arith.constant 0 : index
      %17 = vector.load %arg6[%c0_14, %c0_15] : memref<64x64xbf16, #tpu.memory_space<vmem>>, vector<64x64xbf16>
      %cst_16 = arith.constant dense<0.000000e+00> : vector<32x64xf32>
      %18 = tpu.matmul %16, %17, %cst_16 {dimension_numbers = #tpu.dot_dimension_numbers<[1], [0], [0], [1], [0, 0, 1, 1], [], []>} : vector<32x64xbf16>, vector<64x64xbf16>, vector<32x64xf32> -> vector<32x64xf32>
      %19 = arith.addf %14, %18 : vector<32x64xf32>
      %c0_17 = arith.constant 0 : index
      %c0_18 = arith.constant 0 : index
      %20 = vector.load %arg7[%c0_17, %c0_18] : memref<1x64xf32, #tpu.memory_space<vmem>>, vector<1x64xf32>
      %21 = vector.broadcast %20 : vector<1x64xf32> to vector<32x64xf32>
      %22 = arith.addf %19, %21 : vector<32x64xf32>
      %cst_19 = arith.constant 0.000000e+00 : f32
      %23 = vector.broadcast %cst_19 : f32 to vector<32x64xf32>
      %24 = arith.cmpf oge, %22, %23 : vector<32x64xf32>
      %cst_20 = arith.constant 2.000000e-01 : f32
      %25 = vector.broadcast %cst_20 : f32 to vector<32x64xf32>
      %26 = arith.mulf %25, %22 : vector<32x64xf32>
      %27 = arith.select %24, %22, %26 : vector<32x64xi1>, vector<32x64xf32>
      %c0_21 = arith.constant 0 : index
      %c0_22 = arith.constant 0 : index
      %c0_23 = arith.constant 0 : index
      %28 = vector.load %arg8[%c0_21, %c0_22, %c0_23] : memref<1x32x64xf32, #tpu.memory_space<vmem>>, vector<1x32x64xf32>
      %29 = vector.shape_cast %28 : vector<1x32x64xf32> to vector<32x64xf32>
      %30 = vector.shape_cast %27 : vector<32x64xf32> to vector<1x32x64xf32>
      tpu.vector_store %arg8[%c0_21, %c0_22, %c0_23], %30 {strides = array<i32>} : memref<1x32x64xf32, #tpu.memory_space<vmem>>, vector<1x32x64xf32>,
    } else {
    }
    return
  }
  func.func @transform_0(%arg0: i32, %arg1: i32, %arg2: i32) -> (i32, i32, i32) {
    %c1_i32 = arith.constant 1 : i32
    %0 = arith.muli %arg2, %c1_i32 : i32
    %1 = arith.addi %0, %arg1 : i32
    %c0_i32 = arith.constant 0 : i32
    %c0_i32_0 = arith.constant 0 : i32
    return %arg0, %1, %c0_i32 : i32, i32, i32
  }
  func.func @transform_1(%arg0: i32, %arg1: i32, %arg2: i32) -> (i32, i32, i32) {
    %c0_i32 = arith.constant 0 : i32
    %c0_i32_0 = arith.constant 0 : i32
    return %arg0, %arg1, %c0_i32 : i32, i32, i32
  }
  func.func @transform_2(%arg0: i32, %arg1: i32, %arg2: i32) -> (i32, i32) {
    %c0_i32 = arith.constant 0 : i32
    %c0_i32_0 = arith.constant 0 : i32
    %c0_i32_1 = arith.constant 0 : i32
    return %c0_i32, %c0_i32_0 : i32, i32
  }
  func.func @transform_3(%arg0: i32, %arg1: i32, %arg2: i32) -> (i32, i32) {
    %c0_i32 = arith.constant 0 : i32
    %c0_i32_0 = arith.constant 0 : i32
    %c0_i32_1 = arith.constant 0 : i32
    return %c0_i32, %c0_i32_0 : i32, i32
  }
  func.func @transform_4(%arg0: i32, %arg1: i32, %arg2: i32) -> (i32, i32) {
    %c0_i32 = arith.constant 0 : i32
    %c0_i32_0 = arith.constant 0 : i32
    %c0_i32_1 = arith.constant 0 : i32
    return %c0_i32, %c0_i32_0 : i32, i32
  }
  func.func @transform_5(%arg0: i32, %arg1: i32, %arg2: i32) -> (i32, i32, i32) {
    %c0_i32 = arith.constant 0 : i32
    %c0_i32_0 = arith.constant 0 : i32
    return %arg0, %arg1, %c0_i32 : i32, i32, i32
  }
}

module attributes {stable_mosaic.version = 11 : i64} {
  func.func @_edge_conv_kernel(%arg0: i32, %arg1: i32, %arg2: i32, %arg3: memref<1x32x64xbf16, #tpu.memory_space<vmem>>, %arg4: memref<1x32x64xbf16, #tpu.memory_space<vmem>>, %arg5: memref<64x128xbf16, #tpu.memory_space<vmem>>, %arg6: memref<64x128xbf16, #tpu.memory_space<vmem>>, %arg7: memref<1x128xf32, #tpu.memory_space<vmem>>, %arg8: memref<1x32x128xf32, #tpu.memory_space<vmem>>) attributes {dimension_semantics = [#tpu.dimension_semantics<parallel>, #tpu.dimension_semantics<parallel>, #tpu.dimension_semantics<arbitrary>], iteration_bounds = array<i64: 2, 1, 8>, scalar_prefetch = 0 : i64, scratch_operands = 0 : i64, tpu.core_type = #tpu.core_type<tc>, window_params = [{transform_indices = @transform_0, window_bounds = array<i64: 1, 32, 64>}, {transform_indices = @transform_1, window_bounds = array<i64: 1, 32, 64>}, {pipeline_mode = #tpu.pipeline_mode<synchronous>, transform_indices = @transform_2, window_bounds = array<i64: 64, 128>}, {pipeline_mode = #tpu.pipeline_mode<synchronous>, transform_indices = @transform_3, window_bounds = array<i64: 64, 128>}, {pipeline_mode = #tpu.pipeline_mode<synchronous>, transform_indices = @transform_4, window_bounds = array<i64: 1, 128>}, {transform_indices = @transform_5, window_bounds = array<i64: 1, 32, 128>}]} {
    %c0 = arith.constant 0 : index
    %c0_0 = arith.constant 0 : index
    %c0_1 = arith.constant 0 : index
    %0 = vector.load %arg3[%c0, %c0_0, %c0_1] : memref<1x32x64xbf16, #tpu.memory_space<vmem>>, vector<1x32x64xbf16>
    %1 = vector.shape_cast %0 : vector<1x32x64xbf16> to vector<32x64xbf16>
    %c0_2 = arith.constant 0 : index
    %c0_3 = arith.constant 0 : index
    %2 = vector.load %arg5[%c0_2, %c0_3] : memref<64x128xbf16, #tpu.memory_space<vmem>>, vector<64x128xbf16>
    %cst = arith.constant dense<0.000000e+00> : vector<32x128xf32>
    %3 = tpu.matmul %1, %2, %cst {dimension_numbers = #tpu.dot_dimension_numbers<[1], [0], [0], [1], [0, 0, 1, 1], [], []>} : vector<32x64xbf16>, vector<64x128xbf16>, vector<32x128xf32> -> vector<32x128xf32>
    %c0_i32 = arith.constant 0 : i32
    %4 = arith.cmpi eq, %arg2, %c0_i32 : i32
    %5 = arith.extui %4 : i1 to i32
    %c0_i32_4 = arith.constant 0 : i32
    %6 = arith.cmpi ne, %5, %c0_i32_4 : i32
    scf.if %6 {
      %c0_8 = arith.constant 0 : index
      %c0_9 = arith.constant 0 : index
      %c0_10 = arith.constant 0 : index
      %13 = vector.load %arg8[%c0_8, %c0_9, %c0_10] : memref<1x32x128xf32, #tpu.memory_space<vmem>>, vector<1x32x128xf32>
      %14 = vector.shape_cast %13 : vector<1x32x128xf32> to vector<32x128xf32>
      %15 = vector.shape_cast %3 : vector<32x128xf32> to vector<1x32x128xf32>
      tpu.vector_store %arg8[%c0_8, %c0_9, %c0_10], %15 {strides = array<i32>} : memref<1x32x128xf32, #tpu.memory_space<vmem>>, vector<1x32x128xf32>,
    } else {
    }
    %c0_i32_5 = arith.constant 0 : i32
    %7 = arith.cmpi sgt, %arg2, %c0_i32_5 : i32
    %8 = arith.extui %7 : i1 to i32
    %c0_i32_6 = arith.constant 0 : i32
    %9 = arith.cmpi ne, %8, %c0_i32_6 : i32
    scf.if %9 {
      %c0_8 = arith.constant 0 : index
      %c0_9 = arith.constant 0 : index
      %c0_10 = arith.constant 0 : index
      %13 = vector.load %arg8[%c0_8, %c0_9, %c0_10] : memref<1x32x128xf32, #tpu.memory_space<vmem>>, vector<1x32x128xf32>
      %14 = vector.shape_cast %13 : vector<1x32x128xf32> to vector<32x128xf32>
      %15 = arith.maximumf %14, %3 : vector<32x128xf32>
      %c0_11 = arith.constant 0 : index
      %c0_12 = arith.constant 0 : index
      %c0_13 = arith.constant 0 : index
      %16 = vector.load %arg8[%c0_11, %c0_12, %c0_13] : memref<1x32x128xf32, #tpu.memory_space<vmem>>, vector<1x32x128xf32>
      %17 = vector.shape_cast %16 : vector<1x32x128xf32> to vector<32x128xf32>
      %18 = vector.shape_cast %15 : vector<32x128xf32> to vector<1x32x128xf32>
      tpu.vector_store %arg8[%c0_11, %c0_12, %c0_13], %18 {strides = array<i32>} : memref<1x32x128xf32, #tpu.memory_space<vmem>>, vector<1x32x128xf32>,
    } else {
    }
    %c7_i32 = arith.constant 7 : i32
    %10 = arith.cmpi eq, %arg2, %c7_i32 : i32
    %11 = arith.extui %10 : i1 to i32
    %c0_i32_7 = arith.constant 0 : i32
    %12 = arith.cmpi ne, %11, %c0_i32_7 : i32
    scf.if %12 {
      %c0_8 = arith.constant 0 : index
      %c0_9 = arith.constant 0 : index
      %c0_10 = arith.constant 0 : index
      %13 = vector.load %arg8[%c0_8, %c0_9, %c0_10] : memref<1x32x128xf32, #tpu.memory_space<vmem>>, vector<1x32x128xf32>
      %14 = vector.shape_cast %13 : vector<1x32x128xf32> to vector<32x128xf32>
      %c0_11 = arith.constant 0 : index
      %c0_12 = arith.constant 0 : index
      %c0_13 = arith.constant 0 : index
      %15 = vector.load %arg4[%c0_11, %c0_12, %c0_13] : memref<1x32x64xbf16, #tpu.memory_space<vmem>>, vector<1x32x64xbf16>
      %16 = vector.shape_cast %15 : vector<1x32x64xbf16> to vector<32x64xbf16>
      %c0_14 = arith.constant 0 : index
      %c0_15 = arith.constant 0 : index
      %17 = vector.load %arg6[%c0_14, %c0_15] : memref<64x128xbf16, #tpu.memory_space<vmem>>, vector<64x128xbf16>
      %cst_16 = arith.constant dense<0.000000e+00> : vector<32x128xf32>
      %18 = tpu.matmul %16, %17, %cst_16 {dimension_numbers = #tpu.dot_dimension_numbers<[1], [0], [0], [1], [0, 0, 1, 1], [], []>} : vector<32x64xbf16>, vector<64x128xbf16>, vector<32x128xf32> -> vector<32x128xf32>
      %19 = arith.addf %14, %18 : vector<32x128xf32>
      %c0_17 = arith.constant 0 : index
      %c0_18 = arith.constant 0 : index
      %20 = vector.load %arg7[%c0_17, %c0_18] : memref<1x128xf32, #tpu.memory_space<vmem>>, vector<1x128xf32>
      %21 = vector.broadcast %20 : vector<1x128xf32> to vector<32x128xf32>
      %22 = arith.addf %19, %21 : vector<32x128xf32>
      %cst_19 = arith.constant 0.000000e+00 : f32
      %23 = vector.broadcast %cst_19 : f32 to vector<32x128xf32>
      %24 = arith.cmpf oge, %22, %23 : vector<32x128xf32>
      %cst_20 = arith.constant 2.000000e-01 : f32
      %25 = vector.broadcast %cst_20 : f32 to vector<32x128xf32>
      %26 = arith.mulf %25, %22 : vector<32x128xf32>
      %27 = arith.select %24, %22, %26 : vector<32x128xi1>, vector<32x128xf32>
      %c0_21 = arith.constant 0 : index
      %c0_22 = arith.constant 0 : index
      %c0_23 = arith.constant 0 : index
      %28 = vector.load %arg8[%c0_21, %c0_22, %c0_23] : memref<1x32x128xf32, #tpu.memory_space<vmem>>, vector<1x32x128xf32>
      %29 = vector.shape_cast %28 : vector<1x32x128xf32> to vector<32x128xf32>
      %30 = vector.shape_cast %27 : vector<32x128xf32> to vector<1x32x128xf32>
      tpu.vector_store %arg8[%c0_21, %c0_22, %c0_23], %30 {strides = array<i32>} : memref<1x32x128xf32, #tpu.memory_space<vmem>>, vector<1x32x128xf32>,
    } else {
    }
    return
  }
  func.func @transform_0(%arg0: i32, %arg1: i32, %arg2: i32) -> (i32, i32, i32) {
    %c1_i32 = arith.constant 1 : i32
    %0 = arith.muli %arg2, %c1_i32 : i32
    %1 = arith.addi %0, %arg1 : i32
    %c0_i32 = arith.constant 0 : i32
    %c0_i32_0 = arith.constant 0 : i32
    return %arg0, %1, %c0_i32 : i32, i32, i32
  }
  func.func @transform_1(%arg0: i32, %arg1: i32, %arg2: i32) -> (i32, i32, i32) {
    %c0_i32 = arith.constant 0 : i32
    %c0_i32_0 = arith.constant 0 : i32
    return %arg0, %arg1, %c0_i32 : i32, i32, i32
  }
  func.func @transform_2(%arg0: i32, %arg1: i32, %arg2: i32) -> (i32, i32) {
    %c0_i32 = arith.constant 0 : i32
    %c0_i32_0 = arith.constant 0 : i32
    %c0_i32_1 = arith.constant 0 : i32
    return %c0_i32, %c0_i32_0 : i32, i32
  }
  func.func @transform_3(%arg0: i32, %arg1: i32, %arg2: i32) -> (i32, i32) {
    %c0_i32 = arith.constant 0 : i32
    %c0_i32_0 = arith.constant 0 : i32
    %c0_i32_1 = arith.constant 0 : i32
    return %c0_i32, %c0_i32_0 : i32, i32
  }
  func.func @transform_4(%arg0: i32, %arg1: i32, %arg2: i32) -> (i32, i32) {
    %c0_i32 = arith.constant 0 : i32
    %c0_i32_0 = arith.constant 0 : i32
    %c0_i32_1 = arith.constant 0 : i32
    return %c0_i32, %c0_i32_0 : i32, i32
  }
  func.func @transform_5(%arg0: i32, %arg1: i32, %arg2: i32) -> (i32, i32, i32) {
    %c0_i32 = arith.constant 0 : i32
    %c0_i32_0 = arith.constant 0 : i32
    return %arg0, %arg1, %c0_i32 : i32, i32, i32
  }
}

module attributes {stable_mosaic.version = 11 : i64} {
  func.func @_pairwise_kernel(%arg0: i32, %arg1: i32, %arg2: memref<1x32x128xf32, #tpu.memory_space<vmem>>, %arg3: memref<1x32x128xf32, #tpu.memory_space<vmem>>, %arg4: memref<1x32x1xf32, #tpu.memory_space<vmem>>, %arg5: memref<1x1x32xf32, #tpu.memory_space<vmem>>, %arg6: memref<1x32x32xf32, #tpu.memory_space<vmem>>) attributes {dimension_semantics = [#tpu.dimension_semantics<parallel>, #tpu.dimension_semantics<parallel>], iteration_bounds = array<i64: 2, 1>, scalar_prefetch = 0 : i64, scratch_operands = 0 : i64, tpu.core_type = #tpu.core_type<tc>, window_params = [{transform_indices = @transform_0, window_bounds = array<i64: 1, 32, 128>}, {transform_indices = @transform_1, window_bounds = array<i64: 1, 32, 128>}, {transform_indices = @transform_2, window_bounds = array<i64: 1, 32, 1>}, {transform_indices = @transform_3, window_bounds = array<i64: 1, 1, 32>}, {transform_indices = @transform_4, window_bounds = array<i64: 1, 32, 32>}]} {
    %c0 = arith.constant 0 : index
    %c0_0 = arith.constant 0 : index
    %c0_1 = arith.constant 0 : index
    %0 = vector.load %arg2[%c0, %c0_0, %c0_1] : memref<1x32x128xf32, #tpu.memory_space<vmem>>, vector<1x32x128xf32>
    %1 = vector.shape_cast %0 : vector<1x32x128xf32> to vector<32x128xf32>
    %c0_2 = arith.constant 0 : index
    %c0_3 = arith.constant 0 : index
    %c0_4 = arith.constant 0 : index
    %2 = vector.load %arg3[%c0_2, %c0_3, %c0_4] : memref<1x32x128xf32, #tpu.memory_space<vmem>>, vector<1x32x128xf32>
    %3 = vector.shape_cast %2 : vector<1x32x128xf32> to vector<32x128xf32>
    %cst = arith.constant dense<0.000000e+00> : vector<32x32xf32>
    %4 = tpu.matmul %1, %3, %cst {dimension_numbers = #tpu.dot_dimension_numbers<[1], [1], [0], [0], [0, 0, 1, 0], [], []>} : vector<32x128xf32>, vector<32x128xf32>, vector<32x32xf32> -> vector<32x32xf32>
    %cst_5 = arith.constant 2.000000e+00 : f32
    %5 = vector.broadcast %cst_5 : f32 to vector<32x32xf32>
    %6 = arith.mulf %5, %4 : vector<32x32xf32>
    %c0_6 = arith.constant 0 : index
    %c0_7 = arith.constant 0 : index
    %c0_8 = arith.constant 0 : index
    %7 = vector.load %arg4[%c0_6, %c0_7, %c0_8] : memref<1x32x1xf32, #tpu.memory_space<vmem>>, vector<1x32x1xf32>
    %8 = vector.shape_cast %7 : vector<1x32x1xf32> to vector<32x1xf32>
    %9 = vector.broadcast %8 : vector<32x1xf32> to vector<32x32xf32>
    %10 = arith.subf %6, %9 : vector<32x32xf32>
    %c0_9 = arith.constant 0 : index
    %c0_10 = arith.constant 0 : index
    %c0_11 = arith.constant 0 : index
    %11 = vector.load %arg5[%c0_9, %c0_10, %c0_11] : memref<1x1x32xf32, #tpu.memory_space<vmem>>, vector<1x1x32xf32>
    %12 = vector.shape_cast %11 : vector<1x1x32xf32> to vector<1x32xf32>
    %13 = vector.broadcast %12 : vector<1x32xf32> to vector<32x32xf32>
    %14 = arith.subf %10, %13 : vector<32x32xf32>
    %c0_12 = arith.constant 0 : index
    %c0_13 = arith.constant 0 : index
    %c0_14 = arith.constant 0 : index
    %15 = vector.load %arg6[%c0_12, %c0_13, %c0_14] : memref<1x32x32xf32, #tpu.memory_space<vmem>>, vector<1x32x32xf32>
    %16 = vector.shape_cast %15 : vector<1x32x32xf32> to vector<32x32xf32>
    %17 = vector.shape_cast %14 : vector<32x32xf32> to vector<1x32x32xf32>
    tpu.vector_store %arg6[%c0_12, %c0_13, %c0_14], %17 {strides = array<i32>} : memref<1x32x32xf32, #tpu.memory_space<vmem>>, vector<1x32x32xf32>,
    return
  }
  func.func @transform_0(%arg0: i32, %arg1: i32) -> (i32, i32, i32) {
    %c0_i32 = arith.constant 0 : i32
    %c0_i32_0 = arith.constant 0 : i32
    return %arg0, %arg1, %c0_i32 : i32, i32, i32
  }
  func.func @transform_1(%arg0: i32, %arg1: i32) -> (i32, i32, i32) {
    %c0_i32 = arith.constant 0 : i32
    %c0_i32_0 = arith.constant 0 : i32
    %c0_i32_1 = arith.constant 0 : i32
    return %arg0, %c0_i32, %c0_i32_0 : i32, i32, i32
  }
  func.func @transform_2(%arg0: i32, %arg1: i32) -> (i32, i32, i32) {
    %c0_i32 = arith.constant 0 : i32
    %c0_i32_0 = arith.constant 0 : i32
    return %arg0, %arg1, %c0_i32 : i32, i32, i32
  }
  func.func @transform_3(%arg0: i32, %arg1: i32) -> (i32, i32, i32) {
    %c0_i32 = arith.constant 0 : i32
    %c0_i32_0 = arith.constant 0 : i32
    %c0_i32_1 = arith.constant 0 : i32
    return %arg0, %c0_i32, %c0_i32_0 : i32, i32, i32
  }
  func.func @transform_4(%arg0: i32, %arg1: i32) -> (i32, i32, i32) {
    %c0_i32 = arith.constant 0 : i32
    %c0_i32_0 = arith.constant 0 : i32
    return %arg0, %arg1, %c0_i32 : i32, i32, i32
  }
}

module attributes {stable_mosaic.version = 11 : i64} {
  func.func @_edge_conv_kernel(%arg0: i32, %arg1: i32, %arg2: i32, %arg3: memref<1x32x128xbf16, #tpu.memory_space<vmem>>, %arg4: memref<1x32x128xbf16, #tpu.memory_space<vmem>>, %arg5: memref<128x256xbf16, #tpu.memory_space<vmem>>, %arg6: memref<128x256xbf16, #tpu.memory_space<vmem>>, %arg7: memref<1x256xf32, #tpu.memory_space<vmem>>, %arg8: memref<1x32x256xf32, #tpu.memory_space<vmem>>) attributes {dimension_semantics = [#tpu.dimension_semantics<parallel>, #tpu.dimension_semantics<parallel>, #tpu.dimension_semantics<arbitrary>], iteration_bounds = array<i64: 2, 1, 8>, scalar_prefetch = 0 : i64, scratch_operands = 0 : i64, tpu.core_type = #tpu.core_type<tc>, window_params = [{transform_indices = @transform_0, window_bounds = array<i64: 1, 32, 128>}, {transform_indices = @transform_1, window_bounds = array<i64: 1, 32, 128>}, {pipeline_mode = #tpu.pipeline_mode<synchronous>, transform_indices = @transform_2, window_bounds = array<i64: 128, 256>}, {pipeline_mode = #tpu.pipeline_mode<synchronous>, transform_indices = @transform_3, window_bounds = array<i64: 128, 256>}, {pipeline_mode = #tpu.pipeline_mode<synchronous>, transform_indices = @transform_4, window_bounds = array<i64: 1, 256>}, {transform_indices = @transform_5, window_bounds = array<i64: 1, 32, 256>}]} {
    %c0 = arith.constant 0 : index
    %c0_0 = arith.constant 0 : index
    %c0_1 = arith.constant 0 : index
    %0 = vector.load %arg3[%c0, %c0_0, %c0_1] : memref<1x32x128xbf16, #tpu.memory_space<vmem>>, vector<1x32x128xbf16>
    %1 = vector.shape_cast %0 : vector<1x32x128xbf16> to vector<32x128xbf16>
    %c0_2 = arith.constant 0 : index
    %c0_3 = arith.constant 0 : index
    %2 = vector.load %arg5[%c0_2, %c0_3] : memref<128x256xbf16, #tpu.memory_space<vmem>>, vector<128x256xbf16>
    %cst = arith.constant dense<0.000000e+00> : vector<32x256xf32>
    %3 = tpu.matmul %1, %2, %cst {dimension_numbers = #tpu.dot_dimension_numbers<[1], [0], [0], [1], [0, 0, 1, 1], [], []>} : vector<32x128xbf16>, vector<128x256xbf16>, vector<32x256xf32> -> vector<32x256xf32>
    %c0_i32 = arith.constant 0 : i32
    %4 = arith.cmpi eq, %arg2, %c0_i32 : i32
    %5 = arith.extui %4 : i1 to i32
    %c0_i32_4 = arith.constant 0 : i32
    %6 = arith.cmpi ne, %5, %c0_i32_4 : i32
    scf.if %6 {
      %c0_8 = arith.constant 0 : index
      %c0_9 = arith.constant 0 : index
      %c0_10 = arith.constant 0 : index
      %13 = vector.load %arg8[%c0_8, %c0_9, %c0_10] : memref<1x32x256xf32, #tpu.memory_space<vmem>>, vector<1x32x256xf32>
      %14 = vector.shape_cast %13 : vector<1x32x256xf32> to vector<32x256xf32>
      %15 = vector.shape_cast %3 : vector<32x256xf32> to vector<1x32x256xf32>
      tpu.vector_store %arg8[%c0_8, %c0_9, %c0_10], %15 {strides = array<i32>} : memref<1x32x256xf32, #tpu.memory_space<vmem>>, vector<1x32x256xf32>,
    } else {
    }
    %c0_i32_5 = arith.constant 0 : i32
    %7 = arith.cmpi sgt, %arg2, %c0_i32_5 : i32
    %8 = arith.extui %7 : i1 to i32
    %c0_i32_6 = arith.constant 0 : i32
    %9 = arith.cmpi ne, %8, %c0_i32_6 : i32
    scf.if %9 {
      %c0_8 = arith.constant 0 : index
      %c0_9 = arith.constant 0 : index
      %c0_10 = arith.constant 0 : index
      %13 = vector.load %arg8[%c0_8, %c0_9, %c0_10] : memref<1x32x256xf32, #tpu.memory_space<vmem>>, vector<1x32x256xf32>
      %14 = vector.shape_cast %13 : vector<1x32x256xf32> to vector<32x256xf32>
      %15 = arith.maximumf %14, %3 : vector<32x256xf32>
      %c0_11 = arith.constant 0 : index
      %c0_12 = arith.constant 0 : index
      %c0_13 = arith.constant 0 : index
      %16 = vector.load %arg8[%c0_11, %c0_12, %c0_13] : memref<1x32x256xf32, #tpu.memory_space<vmem>>, vector<1x32x256xf32>
      %17 = vector.shape_cast %16 : vector<1x32x256xf32> to vector<32x256xf32>
      %18 = vector.shape_cast %15 : vector<32x256xf32> to vector<1x32x256xf32>
      tpu.vector_store %arg8[%c0_11, %c0_12, %c0_13], %18 {strides = array<i32>} : memref<1x32x256xf32, #tpu.memory_space<vmem>>, vector<1x32x256xf32>,
    } else {
    }
    %c7_i32 = arith.constant 7 : i32
    %10 = arith.cmpi eq, %arg2, %c7_i32 : i32
    %11 = arith.extui %10 : i1 to i32
    %c0_i32_7 = arith.constant 0 : i32
    %12 = arith.cmpi ne, %11, %c0_i32_7 : i32
    scf.if %12 {
      %c0_8 = arith.constant 0 : index
      %c0_9 = arith.constant 0 : index
      %c0_10 = arith.constant 0 : index
      %13 = vector.load %arg8[%c0_8, %c0_9, %c0_10] : memref<1x32x256xf32, #tpu.memory_space<vmem>>, vector<1x32x256xf32>
      %14 = vector.shape_cast %13 : vector<1x32x256xf32> to vector<32x256xf32>
      %c0_11 = arith.constant 0 : index
      %c0_12 = arith.constant 0 : index
      %c0_13 = arith.constant 0 : index
      %15 = vector.load %arg4[%c0_11, %c0_12, %c0_13] : memref<1x32x128xbf16, #tpu.memory_space<vmem>>, vector<1x32x128xbf16>
      %16 = vector.shape_cast %15 : vector<1x32x128xbf16> to vector<32x128xbf16>
      %c0_14 = arith.constant 0 : index
      %c0_15 = arith.constant 0 : index
      %17 = vector.load %arg6[%c0_14, %c0_15] : memref<128x256xbf16, #tpu.memory_space<vmem>>, vector<128x256xbf16>
      %cst_16 = arith.constant dense<0.000000e+00> : vector<32x256xf32>
      %18 = tpu.matmul %16, %17, %cst_16 {dimension_numbers = #tpu.dot_dimension_numbers<[1], [0], [0], [1], [0, 0, 1, 1], [], []>} : vector<32x128xbf16>, vector<128x256xbf16>, vector<32x256xf32> -> vector<32x256xf32>
      %19 = arith.addf %14, %18 : vector<32x256xf32>
      %c0_17 = arith.constant 0 : index
      %c0_18 = arith.constant 0 : index
      %20 = vector.load %arg7[%c0_17, %c0_18] : memref<1x256xf32, #tpu.memory_space<vmem>>, vector<1x256xf32>
      %21 = vector.broadcast %20 : vector<1x256xf32> to vector<32x256xf32>
      %22 = arith.addf %19, %21 : vector<32x256xf32>
      %cst_19 = arith.constant 0.000000e+00 : f32
      %23 = vector.broadcast %cst_19 : f32 to vector<32x256xf32>
      %24 = arith.cmpf oge, %22, %23 : vector<32x256xf32>
      %cst_20 = arith.constant 2.000000e-01 : f32
      %25 = vector.broadcast %cst_20 : f32 to vector<32x256xf32>
      %26 = arith.mulf %25, %22 : vector<32x256xf32>
      %27 = arith.select %24, %22, %26 : vector<32x256xi1>, vector<32x256xf32>
      %c0_21 = arith.constant 0 : index
      %c0_22 = arith.constant 0 : index
      %c0_23 = arith.constant 0 : index
      %28 = vector.load %arg8[%c0_21, %c0_22, %c0_23] : memref<1x32x256xf32, #tpu.memory_space<vmem>>, vector<1x32x256xf32>
      %29 = vector.shape_cast %28 : vector<1x32x256xf32> to vector<32x256xf32>
      %30 = vector.shape_cast %27 : vector<32x256xf32> to vector<1x32x256xf32>
      tpu.vector_store %arg8[%c0_21, %c0_22, %c0_23], %30 {strides = array<i32>} : memref<1x32x256xf32, #tpu.memory_space<vmem>>, vector<1x32x256xf32>,
    } else {
    }
    return
  }
  func.func @transform_0(%arg0: i32, %arg1: i32, %arg2: i32) -> (i32, i32, i32) {
    %c1_i32 = arith.constant 1 : i32
    %0 = arith.muli %arg2, %c1_i32 : i32
    %1 = arith.addi %0, %arg1 : i32
    %c0_i32 = arith.constant 0 : i32
    %c0_i32_0 = arith.constant 0 : i32
    return %arg0, %1, %c0_i32 : i32, i32, i32
  }
  func.func @transform_1(%arg0: i32, %arg1: i32, %arg2: i32) -> (i32, i32, i32) {
    %c0_i32 = arith.constant 0 : i32
    %c0_i32_0 = arith.constant 0 : i32
    return %arg0, %arg1, %c0_i32 : i32, i32, i32
  }
  func.func @transform_2(%arg0: i32, %arg1: i32, %arg2: i32) -> (i32, i32) {
    %c0_i32 = arith.constant 0 : i32
    %c0_i32_0 = arith.constant 0 : i32
    %c0_i32_1 = arith.constant 0 : i32
    return %c0_i32, %c0_i32_0 : i32, i32
  }
  func.func @transform_3(%arg0: i32, %arg1: i32, %arg2: i32) -> (i32, i32) {
    %c0_i32 = arith.constant 0 : i32
    %c0_i32_0 = arith.constant 0 : i32
    %c0_i32_1 = arith.constant 0 : i32
    return %c0_i32, %c0_i32_0 : i32, i32
  }
  func.func @transform_4(%arg0: i32, %arg1: i32, %arg2: i32) -> (i32, i32) {
    %c0_i32 = arith.constant 0 : i32
    %c0_i32_0 = arith.constant 0 : i32
    %c0_i32_1 = arith.constant 0 : i32
    return %c0_i32, %c0_i32_0 : i32, i32
  }
  func.func @transform_5(%arg0: i32, %arg1: i32, %arg2: i32) -> (i32, i32, i32) {
    %c0_i32 = arith.constant 0 : i32
    %c0_i32_0 = arith.constant 0 : i32
    return %arg0, %arg1, %c0_i32 : i32, i32, i32
  }
}

module attributes {stable_mosaic.version = 11 : i64} {
  func.func @_conv5_kernel(%arg0: i32, %arg1: i32, %arg2: memref<1x32x64xf32, #tpu.memory_space<vmem>>, %arg3: memref<1x32x64xf32, #tpu.memory_space<vmem>>, %arg4: memref<1x32x128xf32, #tpu.memory_space<vmem>>, %arg5: memref<1x32x256xf32, #tpu.memory_space<vmem>>, %arg6: memref<64x64xbf16, #tpu.memory_space<vmem>>, %arg7: memref<64x64xbf16, #tpu.memory_space<vmem>>, %arg8: memref<128x64xbf16, #tpu.memory_space<vmem>>, %arg9: memref<256x64xbf16, #tpu.memory_space<vmem>>, %arg10: memref<1x64xf32, #tpu.memory_space<vmem>>, %arg11: memref<1x32x64xf32, #tpu.memory_space<vmem>>) attributes {dimension_semantics = [#tpu.dimension_semantics<parallel>, #tpu.dimension_semantics<parallel>], iteration_bounds = array<i64: 2, 1>, scalar_prefetch = 0 : i64, scratch_operands = 0 : i64, tpu.core_type = #tpu.core_type<tc>, window_params = [{transform_indices = @transform_0, window_bounds = array<i64: 1, 32, 64>}, {transform_indices = @transform_1, window_bounds = array<i64: 1, 32, 64>}, {transform_indices = @transform_2, window_bounds = array<i64: 1, 32, 128>}, {transform_indices = @transform_3, window_bounds = array<i64: 1, 32, 256>}, {pipeline_mode = #tpu.pipeline_mode<synchronous>, transform_indices = @transform_4, window_bounds = array<i64: 64, 64>}, {pipeline_mode = #tpu.pipeline_mode<synchronous>, transform_indices = @transform_5, window_bounds = array<i64: 64, 64>}, {pipeline_mode = #tpu.pipeline_mode<synchronous>, transform_indices = @transform_6, window_bounds = array<i64: 128, 64>}, {pipeline_mode = #tpu.pipeline_mode<synchronous>, transform_indices = @transform_7, window_bounds = array<i64: 256, 64>}, {pipeline_mode = #tpu.pipeline_mode<synchronous>, transform_indices = @transform_8, window_bounds = array<i64: 1, 64>}, {transform_indices = @transform_9, window_bounds = array<i64: 1, 32, 64>}]} {
    %c0 = arith.constant 0 : index
    %c0_0 = arith.constant 0 : index
    %c0_1 = arith.constant 0 : index
    %0 = vector.load %arg2[%c0, %c0_0, %c0_1] : memref<1x32x64xf32, #tpu.memory_space<vmem>>, vector<1x32x64xf32>
    %1 = vector.shape_cast %0 : vector<1x32x64xf32> to vector<32x64xf32>
    %2 = arith.truncf %1 : vector<32x64xf32> to vector<32x64xbf16>
    %c0_2 = arith.constant 0 : index
    %c0_3 = arith.constant 0 : index
    %3 = vector.load %arg6[%c0_2, %c0_3] : memref<64x64xbf16, #tpu.memory_space<vmem>>, vector<64x64xbf16>
    %cst = arith.constant dense<0.000000e+00> : vector<32x64xf32>
    %4 = tpu.matmul %2, %3, %cst {dimension_numbers = #tpu.dot_dimension_numbers<[1], [0], [0], [1], [0, 0, 1, 1], [], []>} : vector<32x64xbf16>, vector<64x64xbf16>, vector<32x64xf32> -> vector<32x64xf32>
    %c0_4 = arith.constant 0 : index
    %c0_5 = arith.constant 0 : index
    %c0_6 = arith.constant 0 : index
    %5 = vector.load %arg3[%c0_4, %c0_5, %c0_6] : memref<1x32x64xf32, #tpu.memory_space<vmem>>, vector<1x32x64xf32>
    %6 = vector.shape_cast %5 : vector<1x32x64xf32> to vector<32x64xf32>
    %7 = arith.truncf %6 : vector<32x64xf32> to vector<32x64xbf16>
    %c0_7 = arith.constant 0 : index
    %c0_8 = arith.constant 0 : index
    %8 = vector.load %arg7[%c0_7, %c0_8] : memref<64x64xbf16, #tpu.memory_space<vmem>>, vector<64x64xbf16>
    %cst_9 = arith.constant dense<0.000000e+00> : vector<32x64xf32>
    %9 = tpu.matmul %7, %8, %cst_9 {dimension_numbers = #tpu.dot_dimension_numbers<[1], [0], [0], [1], [0, 0, 1, 1], [], []>} : vector<32x64xbf16>, vector<64x64xbf16>, vector<32x64xf32> -> vector<32x64xf32>
    %10 = arith.addf %4, %9 : vector<32x64xf32>
    %c0_10 = arith.constant 0 : index
    %c0_11 = arith.constant 0 : index
    %c0_12 = arith.constant 0 : index
    %11 = vector.load %arg4[%c0_10, %c0_11, %c0_12] : memref<1x32x128xf32, #tpu.memory_space<vmem>>, vector<1x32x128xf32>
    %12 = vector.shape_cast %11 : vector<1x32x128xf32> to vector<32x128xf32>
    %13 = arith.truncf %12 : vector<32x128xf32> to vector<32x128xbf16>
    %c0_13 = arith.constant 0 : index
    %c0_14 = arith.constant 0 : index
    %14 = vector.load %arg8[%c0_13, %c0_14] : memref<128x64xbf16, #tpu.memory_space<vmem>>, vector<128x64xbf16>
    %cst_15 = arith.constant dense<0.000000e+00> : vector<32x64xf32>
    %15 = tpu.matmul %13, %14, %cst_15 {dimension_numbers = #tpu.dot_dimension_numbers<[1], [0], [0], [1], [0, 0, 1, 1], [], []>} : vector<32x128xbf16>, vector<128x64xbf16>, vector<32x64xf32> -> vector<32x64xf32>
    %16 = arith.addf %10, %15 : vector<32x64xf32>
    %c0_16 = arith.constant 0 : index
    %c0_17 = arith.constant 0 : index
    %c0_18 = arith.constant 0 : index
    %17 = vector.load %arg5[%c0_16, %c0_17, %c0_18] : memref<1x32x256xf32, #tpu.memory_space<vmem>>, vector<1x32x256xf32>
    %18 = vector.shape_cast %17 : vector<1x32x256xf32> to vector<32x256xf32>
    %19 = arith.truncf %18 : vector<32x256xf32> to vector<32x256xbf16>
    %c0_19 = arith.constant 0 : index
    %c0_20 = arith.constant 0 : index
    %20 = vector.load %arg9[%c0_19, %c0_20] : memref<256x64xbf16, #tpu.memory_space<vmem>>, vector<256x64xbf16>
    %cst_21 = arith.constant dense<0.000000e+00> : vector<32x64xf32>
    %21 = tpu.matmul %19, %20, %cst_21 {dimension_numbers = #tpu.dot_dimension_numbers<[1], [0], [0], [1], [0, 0, 1, 1], [], []>} : vector<32x256xbf16>, vector<256x64xbf16>, vector<32x64xf32> -> vector<32x64xf32>
    %22 = arith.addf %16, %21 : vector<32x64xf32>
    %c0_22 = arith.constant 0 : index
    %c0_23 = arith.constant 0 : index
    %23 = vector.load %arg10[%c0_22, %c0_23] : memref<1x64xf32, #tpu.memory_space<vmem>>, vector<1x64xf32>
    %24 = vector.broadcast %23 : vector<1x64xf32> to vector<32x64xf32>
    %25 = arith.addf %22, %24 : vector<32x64xf32>
    %cst_24 = arith.constant 0.000000e+00 : f32
    %26 = vector.broadcast %cst_24 : f32 to vector<32x64xf32>
    %27 = arith.cmpf oge, %25, %26 : vector<32x64xf32>
    %cst_25 = arith.constant 2.000000e-01 : f32
    %28 = vector.broadcast %cst_25 : f32 to vector<32x64xf32>
    %29 = arith.mulf %28, %25 : vector<32x64xf32>
    %30 = arith.select %27, %25, %29 : vector<32x64xi1>, vector<32x64xf32>
    %c0_26 = arith.constant 0 : index
    %c0_27 = arith.constant 0 : index
    %c0_28 = arith.constant 0 : index
    %31 = vector.load %arg11[%c0_26, %c0_27, %c0_28] : memref<1x32x64xf32, #tpu.memory_space<vmem>>, vector<1x32x64xf32>
    %32 = vector.shape_cast %31 : vector<1x32x64xf32> to vector<32x64xf32>
    %33 = vector.shape_cast %30 : vector<32x64xf32> to vector<1x32x64xf32>
    tpu.vector_store %arg11[%c0_26, %c0_27, %c0_28], %33 {strides = array<i32>} : memref<1x32x64xf32, #tpu.memory_space<vmem>>, vector<1x32x64xf32>,
    return
  }
  func.func @transform_0(%arg0: i32, %arg1: i32) -> (i32, i32, i32) {
    %c0_i32 = arith.constant 0 : i32
    %c0_i32_0 = arith.constant 0 : i32
    return %arg0, %arg1, %c0_i32 : i32, i32, i32
  }
  func.func @transform_1(%arg0: i32, %arg1: i32) -> (i32, i32, i32) {
    %c0_i32 = arith.constant 0 : i32
    %c0_i32_0 = arith.constant 0 : i32
    return %arg0, %arg1, %c0_i32 : i32, i32, i32
  }
  func.func @transform_2(%arg0: i32, %arg1: i32) -> (i32, i32, i32) {
    %c0_i32 = arith.constant 0 : i32
    %c0_i32_0 = arith.constant 0 : i32
    return %arg0, %arg1, %c0_i32 : i32, i32, i32
  }
  func.func @transform_3(%arg0: i32, %arg1: i32) -> (i32, i32, i32) {
    %c0_i32 = arith.constant 0 : i32
    %c0_i32_0 = arith.constant 0 : i32
    return %arg0, %arg1, %c0_i32 : i32, i32, i32
  }
  func.func @transform_4(%arg0: i32, %arg1: i32) -> (i32, i32) {
    %c0_i32 = arith.constant 0 : i32
    %c0_i32_0 = arith.constant 0 : i32
    %c0_i32_1 = arith.constant 0 : i32
    return %c0_i32, %c0_i32_0 : i32, i32
  }
  func.func @transform_5(%arg0: i32, %arg1: i32) -> (i32, i32) {
    %c0_i32 = arith.constant 0 : i32
    %c0_i32_0 = arith.constant 0 : i32
    %c0_i32_1 = arith.constant 0 : i32
    return %c0_i32, %c0_i32_0 : i32, i32
  }
  func.func @transform_6(%arg0: i32, %arg1: i32) -> (i32, i32) {
    %c0_i32 = arith.constant 0 : i32
    %c0_i32_0 = arith.constant 0 : i32
    %c0_i32_1 = arith.constant 0 : i32
    return %c0_i32, %c0_i32_0 : i32, i32
  }
  func.func @transform_7(%arg0: i32, %arg1: i32) -> (i32, i32) {
    %c0_i32 = arith.constant 0 : i32
    %c0_i32_0 = arith.constant 0 : i32
    %c0_i32_1 = arith.constant 0 : i32
    return %c0_i32, %c0_i32_0 : i32, i32
  }
  func.func @transform_8(%arg0: i32, %arg1: i32) -> (i32, i32) {
    %c0_i32 = arith.constant 0 : i32
    %c0_i32_0 = arith.constant 0 : i32
    %c0_i32_1 = arith.constant 0 : i32
    return %c0_i32, %c0_i32_0 : i32, i32
  }
  func.func @transform_9(%arg0: i32, %arg1: i32) -> (i32, i32, i32) {
    %c0_i32 = arith.constant 0 : i32
    %c0_i32_0 = arith.constant 0 : i32
    return %arg0, %arg1, %c0_i32 : i32, i32, i32
  }
}

</mosaic_0001>

<bundles_post_ra>
// kernel: dgcnn_backbone.9
= control target key start
LH: loop header
LB: loop body
LE: loop exit
PB: predicated region body
PF: predicated region fallthrough
CT: control target
= control target key end

     0   :  { %s742_s15 = smov 0   ;;  %s744_s16 = smov 0   ;;  %s820_s0 = inlined_call_operand.vmem [shape: f32[2,32,3], index: 0, kind: input, shape index: {}, may-alias: {0,1}]   ;;  %s821_s1 = inlined_call_operand.vmem [shape: f32[2,32,3], index: 1, kind: input, shape index: {}, may-alias: {0,1}]   ;;  %s822_s2 = inlined_call_operand.vmem [shape: f32[2,32,1], index: 2, kind: input, shape index: {}]   ;;  %s823_s3 = inlined_call_operand.vmem [shape: f32[2,1,32], index: 3, kind: input, shape index: {}]   ;;  %s824_s4 = inlined_call_operand.vmem [shape: f32[2,32,32], index: 4, kind: output, shape index: {}]  }
   0x1   :  { %s746_s17 = smov 0  }
   0x2 LB: > { %s26_s18 = sadd.s32 1, %s710_s16  ;;  %p603_p0 = scmp.ge.s32.totalorder %s714_s17, 1  ;;  %s714_s17 = sphi %s746_s17, %s14_s17   ;;  %s710_s16 = sphi %s744_s16, %s828_s16   ;;  %s706_s15 = sphi %s742_s15, %s827_s15  }
   0x3   : > { %p28_p1 = scmp.ge.s32.totalorder %s26_s18, 2  ;;  %p218_p2 = scmp.lt.s32.totalorder %s714_s17, 3 }
   0x5   : > { %s830_s18 = smov (%p28_p1, %s26_s18), 0  ;;  %p219_p3 = pnand %p603_p0, %p218_p2 }
   0x6   : > { %p270_p4 = scmp.lt.s32.totalorder (!%p219_p3), %s706_s15, 1  ;;  %v716_v0 = vmov (!%p219_p3), 0   ;;  %vm315_vm0 = vcmask (!%p219_p3), 23552   ;;  %vm468_vm2 = vcmask (!%p219_p3), 261120  }
   0x7   : > { %222 = sbr.rel (%p219_p3) target bundleno = 256 (0x100), region = 36  ;;  %691 = vset.pattern.permute.xlu1 (!%p219_p3), %v716_v0  ;;  %690 = vset.pattern.permute.xlu0 (!%p219_p3), %v716_v0  ;;  %vm771_vm1 = vmpackc.low (!%p219_p3), %vm315_vm0, %vm315_vm0 }
   0xe   : > { %s832_s15 = smov (!%p270_p4, %s706_s15), 1 }
   0xf   : > { %s763_s19 = sshll.u32 %s832_s15, 5  ;;  %s296_s5 = scalar_lea.vmem %s823_s3, %s832_s15 }
  0x10   : > { %s283_s22 = scalar_lea.vmem %s821_s1, %s763_s19  ;;  %s277_s25 = scalar_lea.vmem %s820_s0, %s763_s19  ;;  %v620_v26 = vld [vmem:[%s296_s5] ss:$0 sm:$0xff] }
  0x11   : > { %v311_v2 = vld [vmem:[%s283_s22] sm:$0xff]  ;;  %v312_v3 = vld [vmem:[%s283_s22 + $0x8] sm:$0xff]  ;;  %v313_v4 = vld [vmem:[%s283_s22 + $0x10] sm:$0xff]  ;;  %s292_s28 = scalar_lea.vmem %s822_s2, %s763_s19  ;;  %s305_s8 = scalar_lea.vmem %s824_s4, %s763_s19 }
  0x12   : > { %v649_v5 = vpack.c.bf16 %v312_v3, %v311_v2  ;;  %v314_v6 = vld [vmem:[%s283_s22 + $0x18] sm:$0xff]  ;;  %v307_v7 = vld [vmem:[%s277_s25] sm:$0xff]  ;;  %v309_v8 = vld [vmem:[%s277_s25 + $0x10] sm:$0xff] }
  0x13   : > { %v655_v9 = vpack.c.bf16 %v314_v6, %v313_v4  ;;  %643 = vmatprep.mubr.msk.f32.mxu0 %vm315_vm0, %v307_v7  ;;  %646 = vmatprep.mubr.msk.f32.mxu1 %vm315_vm0, %v309_v8  ;;  %v431_v10 = vld [vmem:[%s292_s28 + $0x10] sm:$0xff]  ;;  %v429_v11 = vld [vmem:[%s292_s28] sm:$0xff]  ;;  %v432_v12 = vld [vmem:[%s292_s28 + $0x18] sm:$0xff] }
  0x14   : > { %651 = vmatprep.subr.msk.bf16.mxu0 %vm771_vm1, %v649_v5  ;;  %661 = vmatprep.subr.msk.bf16.mxu1 %vm771_vm1, %v649_v5  ;;  %v430_v13 = vld [vmem:[%s292_s28 + $0x8] sm:$0xff]  ;;  %v310_v15 = vld [vmem:[%s277_s25 + $0x18] sm:$0xff] }
  0x15   : > { %654 = vmatpush3.bf16.xpose.msk.msra.mxu0 %vm771_vm1, %v649_v5  ;;  %663 = vmatpush3.bf16.xpose.msk.msra.mxu1 %vm771_vm1, %v649_v5  ;;  %v308_v14 = vld [vmem:[%s277_s25 + $0x8] sm:$0xff] }
  0x16   : > { %657 = vmatprep.subr.msk.bf16.mxu0 %vm771_vm1, %v655_v9  ;;  %662 = vmatprep.subr.msk.bf16.mxu1 %vm771_vm1, %v655_v9 }
  0x17   : > { %445 = vperm.xlu1 %691, %v431_v10   ;;  %435 = vperm.xlu0 %690, %v429_v11  }
  0x1b   : > { %450 = vperm.xlu1 %691, %v432_v12   ;;  %440 = vperm.xlu0 %690, %v430_v13  }
  0x1d   : > { %660 = vmatpush3.bf16.xpose.msk.msra.mxu0 %vm771_vm1, %v655_v9  ;;  %664 = vmatpush3.bf16.xpose.msk.msra.mxu1 %vm771_vm1, %v655_v9 }
  0x24   : > { %644 = vmatmul.mubr.msk.f32.vlgmr.msra.gmra.mrb[0].mxu0 %vm315_vm0, %v308_v14  ;;  %647 = vmatmul.mubr.msk.f32.vlgmr.msra.gmra.mrb[0].mxu1 %vm315_vm0, %v310_v15 }
  0x96   : > { %v446_v16 = vpop.permute.xlu1 %445  ;;  %v436_v17 = vpop.permute.xlu0 %435 }
  0x9a   : > { %v451_v24 = vpop.permute.xlu1 %450  ;;  %v441_v25 = vpop.permute.xlu0 %440 }
  0xf7   : > { %v645_v18 = vpop.f32.mrb[0].mxu0  ;;  %v648_v19 = vpop.f32.mrb[0].mxu1 }
  0xf8   : > { %v426_v20 = vmul.f32 2.0, %v645_v18  ;;  %v428_v21 = vmul.f32 2.0, %v648_v19  ;;  %v406_v22 = vpop.f32.mrb[1].mxu0  ;;  %v416_v23 = vpop.f32.mrb[1].mxu1 }
  0xf9   : > { %v425_v27 = vmul.f32 2.0, %v406_v22  ;;  %v427_v28 = vmul.f32 2.0, %v416_v23 }
  0xfa   : > { %v454_v29 = vsub.f32 %v426_v20, %v441_v25  ;;  %v456_v30 = vsub.f32 %v428_v21, %v451_v24 }
  0xfb   : > { %v453_v31 = vsub.f32 %v425_v27, %v436_v17  ;;  %v455_v32 = vsub.f32 %v427_v28, %v446_v16 }
  0xfc   : > { %v465_v33 = vsub.f32 %v454_v29, %v620_v26  ;;  %v467_v34 = vsub.f32 %v456_v30, %v620_v26 }
  0xfd   : > { %v464_v35 = vsub.f32 %v453_v31, %v620_v26  ;;  %v466_v36 = vsub.f32 %v455_v32, %v620_v26 }
  0xfe   : > { %470 = vst.msk [vmem:[%s305_s8 + $0x8] sm:$0xff] %vm468_vm2, %v465_v33  ;;  %472 = vst.msk [vmem:[%s305_s8 + $0x18] sm:$0xff] %vm468_vm2, %v467_v34 }
  0xff   : > { %469 = vst.msk [vmem:[%s305_s8] sm:$0xff] %vm468_vm2, %v464_v35  ;;  %471 = vst.msk [vmem:[%s305_s8 + $0x10] sm:$0xff] %vm468_vm2, %v466_v36 }
 0x100 PF: > { %s14_s17 = sadd.s32 1, %s714_s17   ;;  %s827_s15 = smov %s710_s16 }
 0x101   : > { %p11_p5 = scmp.ge.s32.totalorder %s14_s17, 4   ;;  %s828_s16 = smov %s830_s18 }
 0x103   :  { %13 = sbr.rel (!%p11_p5) target bundleno = 2 (0x2), region = 75 }

// kernel: dgcnn_backbone.10
= control target key start
LH: loop header
LB: loop body
LE: loop exit
PB: predicated region body
PF: predicated region fallthrough
CT: control target
= control target key end

     0   :  { %s805_s18 = smov 0   ;;  %s807_s19 = smov 0   ;;  %s908_s0 = inlined_call_operand.vmem [shape: bf16[2,256,3], index: 0, kind: input, shape index: {}]   ;;  %s909_s1 = inlined_call_operand.vmem [shape: bf16[2,32,3], index: 1, kind: input, shape index: {}]   ;;  %s910_s2 = inlined_call_operand.vmem [shape: bf16[3,64], index: 2, kind: input, shape index: {}]   ;;  %s911_s3 = inlined_call_operand.vmem [shape: bf16[3,64], index: 3, kind: input, shape index: {}]   ;;  %s912_s4 = inlined_call_operand.vmem [shape: f32[1,64], index: 4, kind: input, shape index: {}]   ;;  %s913_s5 = inlined_call_operand.vmem [shape: f32[2,32,64], index: 5, kind: output, shape index: {}]  }
   0x1   :  { %s809_s20 = smov 0   ;;  %s811_s21 = smov 0  }
   0x2   :  { %s813_s22 = smov 0  }
   0x3 LB: > { %s27_s23 = sadd.s32 1, %s764_s20  ;;  %s34_s24 = sadd.s32 1, %s768_s21  ;;  %s772_s22 = sphi %s813_s22, %s15_s22   ;;  %s768_s21 = sphi %s811_s21, %s917_s21   ;;  %s764_s20 = sphi %s809_s20, %s916_s20   ;;  %s760_s19 = sphi %s807_s19, %s915_s19   ;;  %s756_s18 = sphi %s805_s18, %s914_s18  }
   0x4   : > { %p28_p0 = scmp.ge.s32.totalorder %s27_s23, 8  ;;  %p647_p1 = scmp.ge.s32.totalorder %s772_s22, 1 }
   0x5   : > { %p236_p2 = scmp.lt.s32.totalorder %s772_s22, 17 }
   0x6   : > { %s919_s23 = smov (%p28_p0, %s27_s23), 0  ;;  %s921_s24 = smov (!%p28_p0, %s34_s24), %s768_s21 }
   0x7   : > { %p237_p3 = pnand %p647_p1, %p236_p2  ;;  %p36_p4 = scmp.ge.s32.totalorder %s921_s24, 2 }
   0x8   : > { %v319_v0 = vld [vmem:[%s910_s2] sm:$0x3] (!%p237_p3)  ;;  %vm337_vm0 = vcmask (!%p237_p3), 1040384   ;;  %vm338_vm1 = vcmask (!%p237_p3), 1041408   ;;  %s648_s27 = sshll.u32 (!%p237_p3), %s756_s18, 2  ;;  %v774_v1 = vmov (!%p237_p3), 65535  }
   0x9   : > { %s923_s24 = smov (%p36_p4, %s921_s24), 0  ;;  %240 = sbr.rel (%p237_p3) target bundleno = 480 (0x1e0), region = 40 }
   0xa   : > { %v339_v2 = vsel (!%p237_p3), %vm337_vm0, 4294967295, %v774_v1  ;;  %p284_p5 = scmp.lt.s32.totalorder (!%p237_p3), %s760_s19, 1  ;;  %p286_p6 = scmp.lt.s32.totalorder (!%p237_p3), %s648_s27, 31  ;;  %vm330_vm2 = vcmask (!%p237_p3), 23552  }
   0xb   : > { %v340_v3 = vsel (!%p237_p3), %vm338_vm1, %v339_v2, 0  ;;  %p659_p7 = scmp.ne.s32.totalorder (!%p237_p3), %s756_s18, 0 }
   0xc   : > { %v342_v4 = vand.u32 (!%p237_p3), %v340_v3, %v319_v0 }
   0xe   : > { %677 = vmatprep.subr.bf16.mxu0 (!%p237_p3), %v342_v4 }
   0xf   : > { %678 = vmatpush3.bf16.msra.mxu0 (!%p237_p3), %v342_v4 }
  0x10   : > { %s925_s19 = smov (!%p284_p5, %s760_s19), 1  ;;  %s927_s27 = smov (!%p286_p6, %s648_s27), 31 }
  0x11   : > { %s649_s28 = sshll.u32 %s925_s19, 5  ;;  %s669_s29 = sshll.u32 %s925_s19, 4  ;;  %vm397_vm3 = vcmask (!%p659_p7), 523264  }
  0x12   : > { %s289_s30 = sadd.s32 %s649_s28, %s927_s27  ;;  %s844_s8 = scalar_lea.vmem %s909_s1, %s669_s29 }
  0x13   : > { %s650_s9 = sshll.u32 %s289_s30, 2  ;;  %s849_s12 = scalar_lea.vmem %s913_s5, %s649_s28 }
  0x14   : > { %s291_s15 = scalar_lea.vmem %s908_s0, %s650_s9 }
  0x15   : > { %v730_v5 = vld [vmem:[%s291_s15] sm:$0xff]   ;;  %v731_v6 = vld [vmem:[%s291_s15 + $0x8] sm:$0xff]  }
  0x16   : > { %679 = vmatprep.mubr.msk.bf16.mxu0 %vm330_vm2, %v730_v5 }
  0x17   : > { %680 = vmatmul.mubr.msk.bf16.vlgmr.msra.gmra.mrb[0].mxu0 %vm330_vm2, %v731_v6 }
  0xe7   : > { %396 = sbr.rel (%p659_p7) target bundleno = 239 (0xef), region = 44 }
  0xea   : > { %v681_v7 = vpop.f32.mrb[0].mxu0 }
  0xeb   : > { %v378_v8 = vpop.f32.mrb[1].mxu0  ;;  %400 = vst.msk [vmem:[%s849_s12 + $0x10] sm:$0xff] (!%p659_p7), %vm397_vm3, %v681_v7 }
  0xec   : > { %v682_v9 = vpop.f32.mrb[2].mxu0  ;;  %398 = vst.msk [vmem:[%s849_s12] sm:$0xff] (!%p659_p7), %vm397_vm3, %v378_v8 }
  0xed   : > { %v381_v10 = vpop.f32.mrb[3].mxu0  ;;  %401 = vst.msk [vmem:[%s849_s12 + $0x18] sm:$0xff] (!%p659_p7), %vm397_vm3, %v682_v9 }
  0xee   : > { %399 = vst.msk [vmem:[%s849_s12 + $0x8] sm:$0xff] %vm397_vm3, %v381_v10 }
  0xef PF: > { %p660_p8 = scmp.le.s32.totalorder %s756_s18, 0 }
  0xf0   : > { %vm414_vm4 = vcmask (!%p660_p8), 523264  }
  0xf1   : > { %405 = sbr.rel (%p660_p8) target bundleno = 249 (0xf9), region = 48 }
  0xf3   : > { %v408_v13 = vld [vmem:[%s849_s12 + $0x10] sm:$0xff] (!%p660_p8) }
  0xf4   : > { %v406_v11 = vld [vmem:[%s849_s12] sm:$0xff] (!%p660_p8)  ;;  %v412_v16 = vmax.f32 (!%p660_p8), %v408_v13, %v681_v7 }
  0xf5   : > { %v407_v12 = vld [vmem:[%s849_s12 + $0x8] sm:$0xff] (!%p660_p8)  ;;  %v410_v14 = vmax.f32 (!%p660_p8), %v406_v11, %v378_v8  ;;  %v409_v17 = vld [vmem:[%s849_s12 + $0x18] sm:$0xff] (!%p660_p8) }
  0xf6   : > { %v411_v15 = vmax.f32 (!%p660_p8), %v407_v12, %v381_v10  ;;  %v413_v18 = vmax.f32 (!%p660_p8), %v409_v17, %v682_v9  ;;  %417 = vst.msk [vmem:[%s849_s12 + $0x10] sm:$0xff] (!%p660_p8), %vm414_vm4, %v412_v16 }
  0xf7   : > { %415 = vst.msk [vmem:[%s849_s12] sm:$0xff] (!%p660_p8), %vm414_vm4, %v410_v14 }
  0xf8   : > { %416 = vst.msk [vmem:[%s849_s12 + $0x8] sm:$0xff] %vm414_vm4, %v411_v15  ;;  %418 = vst.msk [vmem:[%s849_s12 + $0x18] sm:$0xff] %vm414_vm4, %v413_v18 }
  0xf9 PF: > { %p661_p9 = scmp.ne.s32.totalorder %s756_s18, 7 }
  0xfa   : > { %v431_v19 = vld [vmem:[%s911_s3] sm:$0x3] (!%p661_p9)  ;;  %v733_v22 = vld [vmem:[%s844_s8 + $0x8] sm:$0xff] (!%p661_p9)   ;;  %vm527_vm6 = vcmask (!%p661_p9), 523264  }
  0xfb   : > { %422 = sbr.rel (%p661_p9) target bundleno = 480 (0x1e0), region = 52  ;;  %v449_v20 = vand.u32 (!%p661_p9), %v431_v19, %v340_v3  ;;  %v732_v21 = vld [vmem:[%s844_s8] sm:$0xff] (!%p661_p9)  }
  0xfc   : > { %685 = vmatprep.mubr.msk.bf16.mxu0 (!%p661_p9), %vm330_vm2, %v732_v21  ;;  %v666_v26 = vld [vmem:[%s912_s4] ss:$0 sm:$0xff] (!%p661_p9) }
  0xfd   : > { %683 = vmatprep.subr.bf16.mxu0 (!%p661_p9), %v449_v20 }
  0xfe   : > { %684 = vmatpush3.bf16.msra.mxu0 (!%p661_p9), %v449_v20  ;;  %v425_v23 = vld [vmem:[%s849_s12 + $0x10] sm:$0xff] (!%p661_p9) }
  0xff   : > { %v423_v24 = vld [vmem:[%s849_s12] sm:$0xff] (!%p661_p9)  ;;  %v426_v27 = vld [vmem:[%s849_s12 + $0x18] sm:$0xff] (!%p661_p9)  ;;  %v424_v30 = vld [vmem:[%s849_s12 + $0x8] sm:$0xff] (!%p661_p9) }
 0x101   : > { %686 = vmatmul.mubr.msk.bf16.vlgmr.msra.gmra.mrb[0].mxu0 (!%p661_p9), %vm330_vm2, %v733_v22 }
 0x1d4   : > { %v687_v25 = vpop.f32.mrb[0].mxu0 }
 0x1d5   : > { %v502_v28 = vadd.f32 %v687_v25, %v425_v23  ;;  %v485_v29 = vpop.f32.mrb[1].mxu0 }
 0x1d6   : > { %v500_v31 = vadd.f32 %v485_v29, %v423_v24  ;;  %v688_v32 = vpop.f32.mrb[2].mxu0 }
 0x1d7   : > { %v513_v33 = vadd.f32 %v666_v26, %v502_v28  ;;  %v503_v34 = vadd.f32 %v688_v32, %v426_v27  ;;  %v488_v35 = vpop.f32.mrb[3].mxu0 }
 0x1d8   : > { %v511_v36 = vadd.f32 %v666_v26, %v500_v31  ;;  %v501_v37 = vadd.f32 %v488_v35, %v424_v30 }
 0x1d9   : > { %vm517_vm5 = vcmp.ge.f32.partialorder %v513_v33, 0.0  ;;  %v521_v38 = vmul.f32 0.2, %v513_v33  ;;  %v514_v39 = vadd.f32 %v666_v26, %v503_v34 }
 0x1da   : > { %vm515_vm7 = vcmp.ge.f32.partialorder %v511_v36, 0.0  ;;  %v519_v40 = vmul.f32 0.2, %v511_v36  ;;  %v512_v41 = vadd.f32 %v666_v26, %v501_v37 }
 0x1db   : > { %v525_v42 = vsel %vm517_vm5, %v513_v33, %v521_v38  ;;  %vm518_vm8 = vcmp.ge.f32.partialorder %v514_v39, 0.0  ;;  %v522_v43 = vmul.f32 0.2, %v514_v39 }
 0x1dc   : > { %530 = vst.msk [vmem:[%s849_s12 + $0x10] sm:$0xff] %vm527_vm6, %v525_v42  ;;  %v523_v44 = vsel %vm515_vm7, %v511_v36, %v519_v40  ;;  %vm516_vm9 = vcmp.ge.f32.partialorder %v512_v41, 0.0  ;;  %v520_v45 = vmul.f32 0.2, %v512_v41 }
 0x1dd   : > { %528 = vst.msk [vmem:[%s849_s12] sm:$0xff] %vm527_vm6, %v523_v44  ;;  %v526_v46 = vsel %vm518_vm8, %v514_v39, %v522_v43 }
 0x1de   : > { %531 = vst.msk [vmem:[%s849_s12 + $0x18] sm:$0xff] %vm527_vm6, %v526_v46  ;;  %v524_v47 = vsel %vm516_vm9, %v512_v41, %v520_v45 }
 0x1df   : > { %529 = vst.msk [vmem:[%s849_s12 + $0x8] sm:$0xff] %vm527_vm6, %v524_v47 }
 0x1e0 PF: > { %s15_s22 = sadd.s32 1, %s772_s22   ;;  %s914_s18 = smov %s764_s20 }
 0x1e1   : > { %p12_p10 = scmp.ge.s32.totalorder %s15_s22, 18   ;;  %s915_s19 = smov %s768_s21 }
 0x1e2   : > { %s916_s20 = smov %s919_s23  ;;  %s917_s21 = smov %s923_s24 }
 0x1e3   :  { %14 = sbr.rel (!%p12_p10) target bundleno = 3 (0x3), region = 85 }

// kernel: dgcnn_backbone.11
= control target key start
LH: loop header
LB: loop body
LE: loop exit
PB: predicated region body
PF: predicated region fallthrough
CT: control target
= control target key end

     0   :  { %s742_s15 = smov 0   ;;  %s744_s16 = smov 0   ;;  %s820_s0 = inlined_call_operand.vmem [shape: f32[2,32,64], index: 0, kind: input, shape index: {}, may-alias: {0,1}]   ;;  %s821_s1 = inlined_call_operand.vmem [shape: f32[2,32,64], index: 1, kind: input, shape index: {}, may-alias: {0,1}]   ;;  %s822_s2 = inlined_call_operand.vmem [shape: f32[2,32,1], index: 2, kind: input, shape index: {}]   ;;  %s823_s3 = inlined_call_operand.vmem [shape: f32[2,1,32], index: 3, kind: input, shape index: {}]   ;;  %s824_s4 = inlined_call_operand.vmem [shape: f32[2,32,32], index: 4, kind: output, shape index: {}]  }
   0x1   :  { %s746_s17 = smov 0  }
   0x2 LB: > { %s26_s18 = sadd.s32 1, %s710_s16  ;;  %p603_p0 = scmp.ge.s32.totalorder %s714_s17, 1  ;;  %s714_s17 = sphi %s746_s17, %s14_s17   ;;  %s710_s16 = sphi %s744_s16, %s828_s16   ;;  %s706_s15 = sphi %s742_s15, %s827_s15  }
   0x3   : > { %p28_p1 = scmp.ge.s32.totalorder %s26_s18, 2  ;;  %p218_p2 = scmp.lt.s32.totalorder %s714_s17, 3 }
   0x5   : > { %s830_s18 = smov (%p28_p1, %s26_s18), 0  ;;  %p219_p3 = pnand %p603_p0, %p218_p2 }
   0x6   : > { %p270_p4 = scmp.lt.s32.totalorder (!%p219_p3), %s706_s15, 1  ;;  %v716_v0 = vmov (!%p219_p3), 0   ;;  %vm315_vm0 = vcmask (!%p219_p3), 523264   ;;  %vm468_vm2 = vcmask (!%p219_p3), 261120  }
   0x7   : > { %222 = sbr.rel (%p219_p3) target bundleno = 256 (0x100), region = 36  ;;  %691 = vset.pattern.permute.xlu1 (!%p219_p3), %v716_v0  ;;  %690 = vset.pattern.permute.xlu0 (!%p219_p3), %v716_v0  ;;  %vm771_vm1 = vmpackc.low (!%p219_p3), %vm315_vm0, %vm315_vm0 }
   0xe   : > { %s832_s15 = smov (!%p270_p4, %s706_s15), 1 }
   0xf   : > { %s763_s19 = sshll.u32 %s832_s15, 5  ;;  %s296_s5 = scalar_lea.vmem %s823_s3, %s832_s15 }
  0x10   : > { %s283_s22 = scalar_lea.vmem %s821_s1, %s763_s19  ;;  %s277_s25 = scalar_lea.vmem %s820_s0, %s763_s19  ;;  %v620_v26 = vld [vmem:[%s296_s5] ss:$0 sm:$0xff] }
  0x11   : > { %v311_v2 = vld [vmem:[%s283_s22] sm:$0xff]  ;;  %v312_v3 = vld [vmem:[%s283_s22 + $0x8] sm:$0xff]  ;;  %v313_v4 = vld [vmem:[%s283_s22 + $0x10] sm:$0xff]  ;;  %s292_s28 = scalar_lea.vmem %s822_s2, %s763_s19  ;;  %s305_s8 = scalar_lea.vmem %s824_s4, %s763_s19 }
  0x12   : > { %v649_v5 = vpack.c.bf16 %v312_v3, %v311_v2  ;;  %v314_v6 = vld [vmem:[%s283_s22 + $0x18] sm:$0xff]  ;;  %v307_v7 = vld [vmem:[%s277_s25] sm:$0xff]  ;;  %v309_v8 = vld [vmem:[%s277_s25 + $0x10] sm:$0xff] }
  0x13   : > { %v655_v9 = vpack.c.bf16 %v314_v6, %v313_v4  ;;  %643 = vmatprep.mubr.msk.f32.mxu0 %vm315_vm0, %v307_v7  ;;  %646 = vmatprep.mubr.msk.f32.mxu1 %vm315_vm0, %v309_v8  ;;  %v431_v10 = vld [vmem:[%s292_s28 + $0x10] sm:$0xff]  ;;  %v429_v11 = vld [vmem:[%s292_s28] sm:$0xff]  ;;  %v432_v12 = vld [vmem:[%s292_s28 + $0x18] sm:$0xff] }
  0x14   : > { %651 = vmatprep.subr.msk.bf16.mxu0 %vm771_vm1, %v649_v5  ;;  %661 = vmatprep.subr.msk.bf16.mxu1 %vm771_vm1, %v649_v5  ;;  %v430_v13 = vld [vmem:[%s292_s28 + $0x8] sm:$0xff]  ;;  %v310_v15 = vld [vmem:[%s277_s25 + $0x18] sm:$0xff] }
  0x15   : > { %654 = vmatpush3.bf16.xpose.msk.msra.mxu0 %vm771_vm1, %v649_v5  ;;  %663 = vmatpush3.bf16.xpose.msk.msra.mxu1 %vm771_vm1, %v649_v5  ;;  %v308_v14 = vld [vmem:[%s277_s25 + $0x8] sm:$0xff] }
  0x16   : > { %657 = vmatprep.subr.msk.bf16.mxu0 %vm771_vm1, %v655_v9  ;;  %662 = vmatprep.subr.msk.bf16.mxu1 %vm771_vm1, %v655_v9 }
  0x17   : > { %445 = vperm.xlu1 %691, %v431_v10   ;;  %435 = vperm.xlu0 %690, %v429_v11  }
  0x1b   : > { %450 = vperm.xlu1 %691, %v432_v12   ;;  %440 = vperm.xlu0 %690, %v430_v13  }
  0x1d   : > { %660 = vmatpush3.bf16.xpose.msk.msra.mxu0 %vm771_vm1, %v655_v9  ;;  %664 = vmatpush3.bf16.xpose.msk.msra.mxu1 %vm771_vm1, %v655_v9 }
  0x24   : > { %644 = vmatmul.mubr.msk.f32.vlgmr.msra.gmra.mrb[0].mxu0 %vm315_vm0, %v308_v14  ;;  %647 = vmatmul.mubr.msk.f32.vlgmr.msra.gmra.mrb[0].mxu1 %vm315_vm0, %v310_v15 }
  0x96   : > { %v446_v16 = vpop.permute.xlu1 %445  ;;  %v436_v17 = vpop.permute.xlu0 %435 }
  0x9a   : > { %v451_v24 = vpop.permute.xlu1 %450  ;;  %v441_v25 = vpop.permute.xlu0 %440 }
  0xf7   : > { %v645_v18 = vpop.f32.mrb[0].mxu0  ;;  %v648_v19 = vpop.f32.mrb[0].mxu1 }
  0xf8   : > { %v426_v20 = vmul.f32 2.0, %v645_v18  ;;  %v428_v21 = vmul.f32 2.0, %v648_v19  ;;  %v406_v22 = vpop.f32.mrb[1].mxu0  ;;  %v416_v23 = vpop.f32.mrb[1].mxu1 }
  0xf9   : > { %v425_v27 = vmul.f32 2.0, %v406_v22  ;;  %v427_v28 = vmul.f32 2.0, %v416_v23 }
  0xfa   : > { %v454_v29 = vsub.f32 %v426_v20, %v441_v25  ;;  %v456_v30 = vsub.f32 %v428_v21, %v451_v24 }
  0xfb   : > { %v453_v31 = vsub.f32 %v425_v27, %v436_v17  ;;  %v455_v32 = vsub.f32 %v427_v28, %v446_v16 }
  0xfc   : > { %v465_v33 = vsub.f32 %v454_v29, %v620_v26  ;;  %v467_v34 = vsub.f32 %v456_v30, %v620_v26 }
  0xfd   : > { %v464_v35 = vsub.f32 %v453_v31, %v620_v26  ;;  %v466_v36 = vsub.f32 %v455_v32, %v620_v26 }
  0xfe   : > { %470 = vst.msk [vmem:[%s305_s8 + $0x8] sm:$0xff] %vm468_vm2, %v465_v33  ;;  %472 = vst.msk [vmem:[%s305_s8 + $0x18] sm:$0xff] %vm468_vm2, %v467_v34 }
  0xff   : > { %469 = vst.msk [vmem:[%s305_s8] sm:$0xff] %vm468_vm2, %v464_v35  ;;  %471 = vst.msk [vmem:[%s305_s8 + $0x10] sm:$0xff] %vm468_vm2, %v466_v36 }
 0x100 PF: > { %s14_s17 = sadd.s32 1, %s714_s17   ;;  %s827_s15 = smov %s710_s16 }
 0x101   : > { %p11_p5 = scmp.ge.s32.totalorder %s14_s17, 4   ;;  %s828_s16 = smov %s830_s18 }
 0x103   :  { %13 = sbr.rel (!%p11_p5) target bundleno = 2 (0x2), region = 75 }

// kernel: dgcnn_backbone.12
= control target key start
LH: loop header
LB: loop body
LE: loop exit
PB: predicated region body
PF: predicated region fallthrough
CT: control target
= control target key end

     0   :  { %s886_s18 = smov 0   ;;  %s888_s19 = smov 0   ;;  %s1015_s0 = inlined_call_operand.vmem [shape: bf16[2,256,64], index: 0, kind: input, shape index: {}]   ;;  %s1016_s1 = inlined_call_operand.vmem [shape: bf16[2,32,64], index: 1, kind: input, shape index: {}]   ;;  %s1017_s2 = inlined_call_operand.vmem [shape: bf16[64,64], index: 2, kind: input, shape index: {}]   ;;  %s1018_s3 = inlined_call_operand.vmem [shape: bf16[64,64], index: 3, kind: input, shape index: {}]   ;;  %s1019_s4 = inlined_call_operand.vmem [shape: f32[1,64], index: 4, kind: input, shape index: {}]   ;;  %s1020_s5 = inlined_call_operand.vmem [shape: f32[2,32,64], index: 5, kind: output, shape index: {}]  }
   0x1   :  { %s890_s20 = smov 0   ;;  %s892_s21 = smov 0  }
   0x2   :  { %s894_s22 = smov 0  }
   0x3 LB: > { %s27_s23 = sadd.s32 1, %s846_s20  ;;  %s34_s24 = sadd.s32 1, %s850_s21  ;;  %s854_s22 = sphi %s894_s22, %s15_s22   ;;  %s850_s21 = sphi %s892_s21, %s1024_s21   ;;  %s846_s20 = sphi %s890_s20, %s1023_s20   ;;  %s842_s19 = sphi %s888_s19, %s1022_s19   ;;  %s838_s18 = sphi %s886_s18, %s1021_s18  }
   0x4   : > { %p28_p0 = scmp.ge.s32.totalorder %s27_s23, 8  ;;  %p696_p1 = scmp.ge.s32.totalorder %s854_s22, 1 }
   0x5   : > { %p236_p2 = scmp.lt.s32.totalorder %s854_s22, 17 }
   0x6   : > { %s1026_s23 = smov (%p28_p0, %s27_s23), 0  ;;  %s1028_s24 = smov (!%p28_p0, %s34_s24), %s850_s21 }
   0x7   : > { %p237_p3 = pnand %p696_p1, %p236_p2  ;;  %p36_p4 = scmp.ge.s32.totalorder %s1028_s24, 2 }
   0x8   : > { %v804_v0 = vld [vmem:[%s1017_s2] sm:$0xff] (!%p237_p3)   ;;  %s697_s27 = sshll.u32 (!%p237_p3), %s838_s18, 2  ;;  %v805_v1 = vld [vmem:[%s1017_s2 + $0x8] sm:$0xff] (!%p237_p3)   ;;  %p284_p5 = scmp.lt.s32.totalorder (!%p237_p3), %s842_s19, 1  ;;  %v806_v2 = vld [vmem:[%s1017_s2 + $0x10] sm:$0xff] (!%p237_p3)   ;;  %vm361_vm0 = vcmask (!%p237_p3), 523264  }
   0x9   : > { %s1030_s24 = smov (%p36_p4, %s1028_s24), 0  ;;  %240 = sbr.rel (%p237_p3) target bundleno = 493 (0x1ed), region = 40 }
   0xa   : > { %740 = vmatprep.subr.bf16.mxu0 (!%p237_p3), %v804_v0  ;;  %p286_p6 = scmp.lt.s32.totalorder (!%p237_p3), %s697_s27, 31  ;;  %v807_v3 = vld [vmem:[%s1017_s2 + $0x18] sm:$0xff] (!%p237_p3)   ;;  %p712_p7 = scmp.ne.s32.totalorder (!%p237_p3), %s838_s18, 0 }
   0xb   : > { %741 = vmatpush3.bf16.msra.mxu0 (!%p237_p3), %v804_v0 }
   0xc   : > { %742 = vmatprep.subr.bf16.mxu0 (!%p237_p3), %v805_v1 }
   0xf   : > { %743 = vmatpush3.bf16.msra.mxu0 (!%p237_p3), %v805_v1 }
  0x10   : > { %s1032_s19 = smov (!%p284_p5, %s842_s19), 1  ;;  %s1034_s27 = smov (!%p286_p6, %s697_s27), 31  ;;  %744 = vmatprep.subr.bf16.mxu0 %v806_v2 }
  0x11   : > { %s698_s7 = sshll.u32 %s1032_s19, 5  ;;  %s726_s8 = sshll.u32 %s1032_s19, 4 }
  0x12   : > { %s289_s9 = sadd.s32 %s698_s7, %s1034_s27  ;;  %s931_s12 = scalar_lea.vmem %s1016_s1, %s726_s8 }
  0x13   : > { %s699_s13 = sshll.u32 %s289_s9, 2  ;;  %s936_s16 = scalar_lea.vmem %s1020_s5, %s698_s7  ;;  %745 = vmatpush3.bf16.msra.mxu0 %v806_v2 }
  0x14   : > { %s291_s27 = scalar_lea.vmem %s1015_s0, %s699_s13  ;;  %746 = vmatprep.subr.bf16.mxu0 %v807_v3 }
  0x15   : > { %v808_v4 = vld [vmem:[%s291_s27] sm:$0xff]   ;;  %v809_v5 = vld [vmem:[%s291_s27 + $0x8] sm:$0xff]  }
  0x16   : > { %748 = vmatprep.mubr.msk.bf16.mxu0 %vm361_vm0, %v808_v4 }
  0x17   : > { %747 = vmatpush3.bf16.msra.mxu0 %v807_v3 }
  0x1a   : > { %749 = vmatmul.mubr.msk.bf16.vlgmr.msra.gmra.mrb[0].mxu0 %vm361_vm0, %v809_v5 }
  0xea   : > { %420 = sbr.rel (%p712_p7) target bundleno = 242 (0xf2), region = 44 }
  0xed   : > { %v750_v6 = vpop.f32.mrb[0].mxu0 }
  0xee   : > { %v402_v7 = vpop.f32.mrb[1].mxu0  ;;  %423 = vst.msk [vmem:[%s936_s16 + $0x10] sm:$0xff] (!%p712_p7), %vm361_vm0, %v750_v6 }
  0xef   : > { %v751_v8 = vpop.f32.mrb[2].mxu0  ;;  %421 = vst.msk [vmem:[%s936_s16] sm:$0xff] (!%p712_p7), %vm361_vm0, %v402_v7 }
  0xf0   : > { %v405_v9 = vpop.f32.mrb[3].mxu0  ;;  %424 = vst.msk [vmem:[%s936_s16 + $0x18] sm:$0xff] (!%p712_p7), %vm361_vm0, %v751_v8 }
  0xf1   : > { %422 = vst.msk [vmem:[%s936_s16 + $0x8] sm:$0xff] %vm361_vm0, %v405_v9 }
  0xf2 PF: > { %p713_p8 = scmp.le.s32.totalorder %s838_s18, 0 }
  0xf4   : > { %428 = sbr.rel (%p713_p8) target bundleno = 252 (0xfc), region = 48 }
  0xf6   : > { %v431_v12 = vld [vmem:[%s936_s16 + $0x10] sm:$0xff] (!%p713_p8) }
  0xf7   : > { %v429_v10 = vld [vmem:[%s936_s16] sm:$0xff] (!%p713_p8)  ;;  %v435_v15 = vmax.f32 (!%p713_p8), %v431_v12, %v750_v6 }
  0xf8   : > { %v430_v11 = vld [vmem:[%s936_s16 + $0x8] sm:$0xff] (!%p713_p8)  ;;  %v433_v13 = vmax.f32 (!%p713_p8), %v429_v10, %v402_v7  ;;  %v432_v16 = vld [vmem:[%s936_s16 + $0x18] sm:$0xff] (!%p713_p8) }
  0xf9   : > { %v434_v14 = vmax.f32 (!%p713_p8), %v430_v11, %v405_v9  ;;  %v436_v17 = vmax.f32 (!%p713_p8), %v432_v16, %v751_v8  ;;  %439 = vst.msk [vmem:[%s936_s16 + $0x10] sm:$0xff] (!%p713_p8), %vm361_vm0, %v435_v15 }
  0xfa   : > { %437 = vst.msk [vmem:[%s936_s16] sm:$0xff] (!%p713_p8), %vm361_vm0, %v433_v13 }
  0xfb   : > { %438 = vst.msk [vmem:[%s936_s16 + $0x8] sm:$0xff] %vm361_vm0, %v434_v14  ;;  %440 = vst.msk [vmem:[%s936_s16 + $0x18] sm:$0xff] %vm361_vm0, %v436_v17 }
  0xfc PF: > { %p714_p9 = scmp.ne.s32.totalorder %s838_s18, 7 }
  0xfd   : > { %v810_v18 = vld [vmem:[%s1018_s3] sm:$0xff] (!%p714_p9)   ;;  %v811_v19 = vld [vmem:[%s1018_s3 + $0x8] sm:$0xff] (!%p714_p9)   ;;  %v812_v20 = vld [vmem:[%s1018_s3 + $0x10] sm:$0xff] (!%p714_p9)  }
  0xfe   : > { %444 = sbr.rel (%p714_p9) target bundleno = 493 (0x1ed), region = 52  ;;  %752 = vmatprep.subr.bf16.mxu0 (!%p714_p9), %v810_v18  ;;  %v814_v21 = vld [vmem:[%s931_s12] sm:$0xff] (!%p714_p9)   ;;  %v813_v22 = vld [vmem:[%s1018_s3 + $0x18] sm:$0xff] (!%p714_p9)   ;;  %v815_v23 = vld [vmem:[%s931_s12 + $0x8] sm:$0xff] (!%p714_p9)  }
  0xff   : > { %753 = vmatpush3.bf16.msra.mxu0 (!%p714_p9), %v810_v18  ;;  %760 = vmatprep.mubr.msk.bf16.mxu0 (!%p714_p9), %vm361_vm0, %v814_v21  ;;  %v723_v27 = vld [vmem:[%s1019_s4] ss:$0 sm:$0xff] (!%p714_p9) }
 0x100   : > { %754 = vmatprep.subr.bf16.mxu0 (!%p714_p9), %v811_v19 }
 0x101   : > { %v447_v24 = vld [vmem:[%s936_s16 + $0x10] sm:$0xff] (!%p714_p9) }
 0x102   : > { %v445_v25 = vld [vmem:[%s936_s16] sm:$0xff] (!%p714_p9)  ;;  %v448_v28 = vld [vmem:[%s936_s16 + $0x18] sm:$0xff] (!%p714_p9)  ;;  %v446_v31 = vld [vmem:[%s936_s16 + $0x8] sm:$0xff] (!%p714_p9) }
 0x103   : > { %755 = vmatpush3.bf16.msra.mxu0 (!%p714_p9), %v811_v19 }
 0x104   : > { %756 = vmatprep.subr.bf16.mxu0 (!%p714_p9), %v812_v20 }
 0x107   : > { %757 = vmatpush3.bf16.msra.mxu0 %v812_v20 }
 0x108   : > { %758 = vmatprep.subr.bf16.mxu0 %v813_v22 }
 0x10b   : > { %759 = vmatpush3.bf16.msra.mxu0 %v813_v22 }
 0x10e   : > { %761 = vmatmul.mubr.msk.bf16.vlgmr.msra.gmra.mrb[0].mxu0 %vm361_vm0, %v815_v23 }
 0x1e1   : > { %v762_v26 = vpop.f32.mrb[0].mxu0 }
 0x1e2   : > { %v552_v29 = vadd.f32 %v762_v26, %v447_v24  ;;  %v535_v30 = vpop.f32.mrb[1].mxu0 }
 0x1e3   : > { %v550_v32 = vadd.f32 %v535_v30, %v445_v25  ;;  %v763_v33 = vpop.f32.mrb[2].mxu0 }
 0x1e4   : > { %v563_v34 = vadd.f32 %v723_v27, %v552_v29  ;;  %v553_v35 = vadd.f32 %v763_v33, %v448_v28  ;;  %v538_v36 = vpop.f32.mrb[3].mxu0 }
 0x1e5   : > { %v561_v37 = vadd.f32 %v723_v27, %v550_v32  ;;  %v551_v38 = vadd.f32 %v538_v36, %v446_v31 }
 0x1e6   : > { %vm567_vm1 = vcmp.ge.f32.partialorder %v563_v34, 0.0  ;;  %v571_v39 = vmul.f32 0.2, %v563_v34  ;;  %v564_v40 = vadd.f32 %v723_v27, %v553_v35 }
 0x1e7   : > { %vm565_vm2 = vcmp.ge.f32.partialorder %v561_v37, 0.0  ;;  %v569_v41 = vmul.f32 0.2, %v561_v37  ;;  %v562_v42 = vadd.f32 %v723_v27, %v551_v38 }
 0x1e8   : > { %v575_v43 = vsel %vm567_vm1, %v563_v34, %v571_v39  ;;  %vm568_vm3 = vcmp.ge.f32.partialorder %v564_v40, 0.0  ;;  %v572_v44 = vmul.f32 0.2, %v564_v40 }
 0x1e9   : > { %579 = vst.msk [vmem:[%s936_s16 + $0x10] sm:$0xff] %vm361_vm0, %v575_v43  ;;  %v573_v45 = vsel %vm565_vm2, %v561_v37, %v569_v41  ;;  %vm566_vm4 = vcmp.ge.f32.partialorder %v562_v42, 0.0  ;;  %v570_v46 = vmul.f32 0.2, %v562_v42 }
 0x1ea   : > { %577 = vst.msk [vmem:[%s936_s16] sm:$0xff] %vm361_vm0, %v573_v45  ;;  %v576_v47 = vsel %vm568_vm3, %v564_v40, %v572_v44 }
 0x1eb   : > { %580 = vst.msk [vmem:[%s936_s16 + $0x18] sm:$0xff] %vm361_vm0, %v576_v47  ;;  %v574_v48 = vsel %vm566_vm4, %v562_v42, %v570_v46 }
 0x1ec   : > { %578 = vst.msk [vmem:[%s936_s16 + $0x8] sm:$0xff] %vm361_vm0, %v574_v48 }
 0x1ed PF: > { %s15_s22 = sadd.s32 1, %s854_s22   ;;  %s1021_s18 = smov %s846_s20 }
 0x1ee   : > { %p12_p10 = scmp.ge.s32.totalorder %s15_s22, 18   ;;  %s1022_s19 = smov %s850_s21 }
 0x1ef   : > { %s1023_s20 = smov %s1026_s23  ;;  %s1024_s21 = smov %s1030_s24 }
 0x1f0   :  { %14 = sbr.rel (!%p12_p10) target bundleno = 3 (0x3), region = 85 }

// kernel: dgcnn_backbone.14
= control target key start
LH: loop header
LB: loop body
LE: loop exit
PB: predicated region body
PF: predicated region fallthrough
CT: control target
= control target key end

     0   :  { %s886_s18 = smov 0   ;;  %s888_s19 = smov 0   ;;  %s1003_s0 = inlined_call_operand.vmem [shape: bf16[2,256,64], index: 0, kind: input, shape index: {}]   ;;  %s1004_s1 = inlined_call_operand.vmem [shape: bf16[2,32,64], index: 1, kind: input, shape index: {}]   ;;  %s1005_s2 = inlined_call_operand.vmem [shape: bf16[64,128], index: 2, kind: input, shape index: {}]   ;;  %s1006_s3 = inlined_call_operand.vmem [shape: bf16[64,128], index: 3, kind: input, shape index: {}]   ;;  %s1007_s4 = inlined_call_operand.vmem [shape: f32[1,128], index: 4, kind: input, shape index: {}]   ;;  %s1008_s5 = inlined_call_operand.vmem [shape: f32[2,32,128], index: 5, kind: output, shape index: {}]  }
   0x1   :  { %s890_s20 = smov 0   ;;  %s892_s21 = smov 0  }
   0x2   :  { %s894_s22 = smov 0  }
   0x3 LB: > { %s27_s23 = sadd.s32 1, %s846_s20  ;;  %s34_s24 = sadd.s32 1, %s850_s21  ;;  %s854_s22 = sphi %s894_s22, %s15_s22   ;;  %s850_s21 = sphi %s892_s21, %s1012_s21   ;;  %s846_s20 = sphi %s890_s20, %s1011_s20   ;;  %s842_s19 = sphi %s888_s19, %s1010_s19   ;;  %s838_s18 = sphi %s886_s18, %s1009_s18  }
   0x4   : > { %p28_p0 = scmp.ge.s32.totalorder %s27_s23, 8  ;;  %p696_p1 = scmp.ge.s32.totalorder %s854_s22, 1 }
   0x5   : > { %p236_p2 = scmp.lt.s32.totalorder %s854_s22, 17 }
   0x6   : > { %s1014_s23 = smov (%p28_p0, %s27_s23), 0  ;;  %s1016_s24 = smov (!%p28_p0, %s34_s24), %s850_s21 }
   0x7   : > { %p237_p3 = pnand %p696_p1, %p236_p2  ;;  %p36_p4 = scmp.ge.s32.totalorder %s1016_s24, 2 }
   0x8   : > { %v804_v0 = vld [vmem:[%s1005_s2] sm:$0xff] (!%p237_p3)   ;;  %s697_s27 = sshll.u32 (!%p237_p3), %s838_s18, 2  ;;  %v805_v1 = vld [vmem:[%s1005_s2 + $0x8] sm:$0xff] (!%p237_p3)   ;;  %p284_p5 = scmp.lt.s32.totalorder (!%p237_p3), %s842_s19, 1  ;;  %v806_v2 = vld [vmem:[%s1005_s2 + $0x10] sm:$0xff] (!%p237_p3)   ;;  %vm361_vm0 = vcmask (!%p237_p3), 523264  }
   0x9   : > { %s1018_s24 = smov (%p36_p4, %s1016_s24), 0  ;;  %240 = sbr.rel (%p237_p3) target bundleno = 493 (0x1ed), region = 40 }
   0xa   : > { %740 = vmatprep.subr.bf16.mxu0 (!%p237_p3), %v804_v0  ;;  %p286_p6 = scmp.lt.s32.totalorder (!%p237_p3), %s697_s27, 31  ;;  %v807_v3 = vld [vmem:[%s1005_s2 + $0x18] sm:$0xff] (!%p237_p3)   ;;  %p712_p7 = scmp.ne.s32.totalorder (!%p237_p3), %s838_s18, 0 }
   0xb   : > { %741 = vmatpush3.bf16.msra.mxu0 (!%p237_p3), %v804_v0 }
   0xc   : > { %742 = vmatprep.subr.bf16.mxu0 (!%p237_p3), %v805_v1 }
   0xf   : > { %743 = vmatpush3.bf16.msra.mxu0 (!%p237_p3), %v805_v1 }
  0x10   : > { %s1020_s19 = smov (!%p284_p5, %s842_s19), 1  ;;  %s1022_s27 = smov (!%p286_p6, %s697_s27), 31  ;;  %744 = vmatprep.subr.bf16.mxu0 %v806_v2 }
  0x11   : > { %s698_s7 = sshll.u32 %s1020_s19, 5  ;;  %s726_s8 = sshll.u32 %s1020_s19, 4 }
  0x12   : > { %s289_s9 = sadd.s32 %s698_s7, %s1022_s27  ;;  %s931_s12 = scalar_lea.vmem %s1004_s1, %s726_s8 }
  0x13   : > { %s699_s13 = sshll.u32 %s289_s9, 2  ;;  %s936_s16 = scalar_lea.vmem %s1008_s5, %s698_s7  ;;  %745 = vmatpush3.bf16.msra.mxu0 %v806_v2 }
  0x14   : > { %s291_s27 = scalar_lea.vmem %s1003_s0, %s699_s13  ;;  %746 = vmatprep.subr.bf16.mxu0 %v807_v3 }
  0x15   : > { %v808_v4 = vld [vmem:[%s291_s27] sm:$0xff]   ;;  %v809_v5 = vld [vmem:[%s291_s27 + $0x8] sm:$0xff]  }
  0x16   : > { %748 = vmatprep.mubr.msk.bf16.mxu0 %vm361_vm0, %v808_v4 }
  0x17   : > { %747 = vmatpush3.bf16.msra.mxu0 %v807_v3 }
  0x1a   : > { %749 = vmatmul.mubr.msk.bf16.vlgmr.msra.gmra.mrb[0].mxu0 %vm361_vm0, %v809_v5 }
  0xea   : > { %420 = sbr.rel (%p712_p7) target bundleno = 242 (0xf2), region = 44 }
  0xed   : > { %v750_v6 = vpop.f32.mrb[0].mxu0 }
  0xee   : > { %v402_v7 = vpop.f32.mrb[1].mxu0  ;;  %423 = vst [vmem:[%s936_s16 + $0x10] sm:$0xff] (!%p712_p7), %v750_v6 }
  0xef   : > { %v751_v8 = vpop.f32.mrb[2].mxu0  ;;  %421 = vst [vmem:[%s936_s16] sm:$0xff] (!%p712_p7), %v402_v7 }
  0xf0   : > { %v405_v9 = vpop.f32.mrb[3].mxu0  ;;  %424 = vst [vmem:[%s936_s16 + $0x18] sm:$0xff] (!%p712_p7), %v751_v8 }
  0xf1   : > { %422 = vst [vmem:[%s936_s16 + $0x8] sm:$0xff] %v405_v9 }
  0xf2 PF: > { %p713_p8 = scmp.le.s32.totalorder %s838_s18, 0 }
  0xf4   : > { %428 = sbr.rel (%p713_p8) target bundleno = 252 (0xfc), region = 48 }
  0xf6   : > { %v431_v12 = vld [vmem:[%s936_s16 + $0x10] sm:$0xff] (!%p713_p8) }
  0xf7   : > { %v429_v10 = vld [vmem:[%s936_s16] sm:$0xff] (!%p713_p8)  ;;  %v435_v15 = vmax.f32 (!%p713_p8), %v431_v12, %v750_v6 }
  0xf8   : > { %v430_v11 = vld [vmem:[%s936_s16 + $0x8] sm:$0xff] (!%p713_p8)  ;;  %v433_v13 = vmax.f32 (!%p713_p8), %v429_v10, %v402_v7  ;;  %v432_v16 = vld [vmem:[%s936_s16 + $0x18] sm:$0xff] (!%p713_p8) }
  0xf9   : > { %v434_v14 = vmax.f32 (!%p713_p8), %v430_v11, %v405_v9  ;;  %v436_v17 = vmax.f32 (!%p713_p8), %v432_v16, %v751_v8  ;;  %439 = vst [vmem:[%s936_s16 + $0x10] sm:$0xff] (!%p713_p8), %v435_v15 }
  0xfa   : > { %437 = vst [vmem:[%s936_s16] sm:$0xff] (!%p713_p8), %v433_v13 }
  0xfb   : > { %438 = vst [vmem:[%s936_s16 + $0x8] sm:$0xff] %v434_v14  ;;  %440 = vst [vmem:[%s936_s16 + $0x18] sm:$0xff] %v436_v17 }
  0xfc PF: > { %p714_p9 = scmp.ne.s32.totalorder %s838_s18, 7 }
  0xfd   : > { %v810_v18 = vld [vmem:[%s1006_s3] sm:$0xff] (!%p714_p9)   ;;  %v811_v19 = vld [vmem:[%s1006_s3 + $0x8] sm:$0xff] (!%p714_p9)   ;;  %v812_v20 = vld [vmem:[%s1006_s3 + $0x10] sm:$0xff] (!%p714_p9)  }
  0xfe   : > { %444 = sbr.rel (%p714_p9) target bundleno = 493 (0x1ed), region = 52  ;;  %752 = vmatprep.subr.bf16.mxu0 (!%p714_p9), %v810_v18  ;;  %v814_v21 = vld [vmem:[%s931_s12] sm:$0xff] (!%p714_p9)   ;;  %v813_v22 = vld [vmem:[%s1006_s3 + $0x18] sm:$0xff] (!%p714_p9)   ;;  %v815_v23 = vld [vmem:[%s931_s12 + $0x8] sm:$0xff] (!%p714_p9)  }
  0xff   : > { %753 = vmatpush3.bf16.msra.mxu0 (!%p714_p9), %v810_v18  ;;  %760 = vmatprep.mubr.msk.bf16.mxu0 (!%p714_p9), %vm361_vm0, %v814_v21  ;;  %v723_v27 = vld [vmem:[%s1007_s4] ss:$0 sm:$0xff] (!%p714_p9) }
 0x100   : > { %754 = vmatprep.subr.bf16.mxu0 (!%p714_p9), %v811_v19 }
 0x101   : > { %v447_v24 = vld [vmem:[%s936_s16 + $0x10] sm:$0xff] (!%p714_p9) }
 0x102   : > { %v445_v25 = vld [vmem:[%s936_s16] sm:$0xff] (!%p714_p9)  ;;  %v448_v28 = vld [vmem:[%s936_s16 + $0x18] sm:$0xff] (!%p714_p9)  ;;  %v446_v31 = vld [vmem:[%s936_s16 + $0x8] sm:$0xff] (!%p714_p9) }
 0x103   : > { %755 = vmatpush3.bf16.msra.mxu0 (!%p714_p9), %v811_v19 }
 0x104   : > { %756 = vmatprep.subr.bf16.mxu0 (!%p714_p9), %v812_v20 }
 0x107   : > { %757 = vmatpush3.bf16.msra.mxu0 %v812_v20 }
 0x108   : > { %758 = vmatprep.subr.bf16.mxu0 %v813_v22 }
 0x10b   : > { %759 = vmatpush3.bf16.msra.mxu0 %v813_v22 }
 0x10e   : > { %761 = vmatmul.mubr.msk.bf16.vlgmr.msra.gmra.mrb[0].mxu0 %vm361_vm0, %v815_v23 }
 0x1e1   : > { %v762_v26 = vpop.f32.mrb[0].mxu0 }
 0x1e2   : > { %v552_v29 = vadd.f32 %v762_v26, %v447_v24  ;;  %v535_v30 = vpop.f32.mrb[1].mxu0 }
 0x1e3   : > { %v550_v32 = vadd.f32 %v535_v30, %v445_v25  ;;  %v763_v33 = vpop.f32.mrb[2].mxu0 }
 0x1e4   : > { %v563_v34 = vadd.f32 %v723_v27, %v552_v29  ;;  %v553_v35 = vadd.f32 %v763_v33, %v448_v28  ;;  %v538_v36 = vpop.f32.mrb[3].mxu0 }
 0x1e5   : > { %v561_v37 = vadd.f32 %v723_v27, %v550_v32  ;;  %v551_v38 = vadd.f32 %v538_v36, %v446_v31 }
 0x1e6   : > { %vm567_vm1 = vcmp.ge.f32.partialorder %v563_v34, 0.0  ;;  %v571_v39 = vmul.f32 0.2, %v563_v34  ;;  %v564_v40 = vadd.f32 %v723_v27, %v553_v35 }
 0x1e7   : > { %vm565_vm2 = vcmp.ge.f32.partialorder %v561_v37, 0.0  ;;  %v569_v41 = vmul.f32 0.2, %v561_v37  ;;  %v562_v42 = vadd.f32 %v723_v27, %v551_v38 }
 0x1e8   : > { %v575_v43 = vsel %vm567_vm1, %v563_v34, %v571_v39  ;;  %vm568_vm3 = vcmp.ge.f32.partialorder %v564_v40, 0.0  ;;  %v572_v44 = vmul.f32 0.2, %v564_v40 }
 0x1e9   : > { %579 = vst [vmem:[%s936_s16 + $0x10] sm:$0xff] %v575_v43  ;;  %v573_v45 = vsel %vm565_vm2, %v561_v37, %v569_v41  ;;  %vm566_vm4 = vcmp.ge.f32.partialorder %v562_v42, 0.0  ;;  %v570_v46 = vmul.f32 0.2, %v562_v42 }
 0x1ea   : > { %577 = vst [vmem:[%s936_s16] sm:$0xff] %v573_v45  ;;  %v576_v47 = vsel %vm568_vm3, %v564_v40, %v572_v44 }
 0x1eb   : > { %580 = vst [vmem:[%s936_s16 + $0x18] sm:$0xff] %v576_v47  ;;  %v574_v48 = vsel %vm566_vm4, %v562_v42, %v570_v46 }
 0x1ec   : > { %578 = vst [vmem:[%s936_s16 + $0x8] sm:$0xff] %v574_v48 }
 0x1ed PF: > { %s15_s22 = sadd.s32 1, %s854_s22   ;;  %s1009_s18 = smov %s846_s20 }
 0x1ee   : > { %p12_p10 = scmp.ge.s32.totalorder %s15_s22, 18   ;;  %s1010_s19 = smov %s850_s21 }
 0x1ef   : > { %s1011_s20 = smov %s1014_s23  ;;  %s1012_s21 = smov %s1018_s24 }
 0x1f0   :  { %14 = sbr.rel (!%p12_p10) target bundleno = 3 (0x3), region = 85 }

// kernel: dgcnn_backbone.15
= control target key start
LH: loop header
LB: loop body
LE: loop exit
PB: predicated region body
PF: predicated region fallthrough
CT: control target
= control target key end

     0   :  { %s705_s15 = smov 0   ;;  %s707_s16 = smov 0   ;;  %s757_s0 = inlined_call_operand.vmem [shape: f32[2,32,128], index: 0, kind: input, shape index: {}, may-alias: {0,1}]   ;;  %s758_s1 = inlined_call_operand.vmem [shape: f32[2,32,128], index: 1, kind: input, shape index: {}, may-alias: {0,1}]   ;;  %s759_s2 = inlined_call_operand.vmem [shape: f32[2,32,1], index: 2, kind: input, shape index: {}]   ;;  %s760_s3 = inlined_call_operand.vmem [shape: f32[2,1,32], index: 3, kind: input, shape index: {}]   ;;  %s761_s4 = inlined_call_operand.vmem [shape: f32[2,32,32], index: 4, kind: output, shape index: {}]  }
   0x1   :  { %s709_s17 = smov 0  }
   0x2 LB: > { %s26_s18 = sadd.s32 1, %s673_s16  ;;  %p578_p0 = scmp.ge.s32.totalorder %s677_s17, 1  ;;  %s677_s17 = sphi %s709_s17, %s14_s17   ;;  %s673_s16 = sphi %s707_s16, %s763_s16   ;;  %s669_s15 = sphi %s705_s15, %s762_s15  }
   0x3   : > { %p28_p1 = scmp.ge.s32.totalorder %s26_s18, 2  ;;  %p218_p2 = scmp.lt.s32.totalorder %s677_s17, 3 }
   0x5   : > { %s765_s18 = smov (%p28_p1, %s26_s18), 0  ;;  %p219_p3 = pnand %p578_p0, %p218_p2 }
   0x6   : > { %p270_p4 = scmp.lt.s32.totalorder (!%p219_p3), %s669_s15, 1  ;;  %v679_v0 = vmov (!%p219_p3), 0   ;;  %vm443_vm0 = vcmask (!%p219_p3), 261120  }
   0x7   : > { %222 = sbr.rel (%p219_p3) target bundleno = 256 (0x100), region = 36  ;;  %654 = vset.pattern.permute.xlu1 (!%p219_p3), %v679_v0  ;;  %653 = vset.pattern.permute.xlu0 (!%p219_p3), %v679_v0 }
   0xe   : > { %s767_s15 = smov (!%p270_p4, %s669_s15), 1 }
   0xf   : > { %s726_s19 = sshll.u32 %s767_s15, 5  ;;  %s296_s5 = scalar_lea.vmem %s760_s3, %s767_s15 }
  0x10   : > { %s283_s22 = scalar_lea.vmem %s758_s1, %s726_s19  ;;  %s277_s25 = scalar_lea.vmem %s757_s0, %s726_s19  ;;  %v587_v25 = vld [vmem:[%s296_s5] ss:$0 sm:$0xff] }
  0x11   : > { %v311_v1 = vld [vmem:[%s283_s22] sm:$0xff]  ;;  %v312_v2 = vld [vmem:[%s283_s22 + $0x8] sm:$0xff]  ;;  %v313_v3 = vld [vmem:[%s283_s22 + $0x10] sm:$0xff]  ;;  %s292_s28 = scalar_lea.vmem %s759_s2, %s726_s19  ;;  %s305_s8 = scalar_lea.vmem %s761_s4, %s726_s19 }
  0x12   : > { %v616_v4 = vpack.c.bf16 %v312_v2, %v311_v1  ;;  %v314_v5 = vld [vmem:[%s283_s22 + $0x18] sm:$0xff]  ;;  %v307_v6 = vld [vmem:[%s277_s25] sm:$0xff]  ;;  %v309_v7 = vld [vmem:[%s277_s25 + $0x10] sm:$0xff] }
  0x13   : > { %v620_v8 = vpack.c.bf16 %v314_v5, %v313_v3  ;;  %610 = vmatprep.mubr.f32.mxu0 %v307_v6  ;;  %613 = vmatprep.mubr.f32.mxu1 %v309_v7  ;;  %v406_v9 = vld [vmem:[%s292_s28 + $0x10] sm:$0xff]  ;;  %v404_v10 = vld [vmem:[%s292_s28] sm:$0xff]  ;;  %v407_v11 = vld [vmem:[%s292_s28 + $0x18] sm:$0xff] }
  0x14   : > { %617 = vmatprep.subr.bf16.mxu0 %v616_v4  ;;  %624 = vmatprep.subr.bf16.mxu1 %v616_v4  ;;  %v405_v12 = vld [vmem:[%s292_s28 + $0x8] sm:$0xff]  ;;  %v310_v14 = vld [vmem:[%s277_s25 + $0x18] sm:$0xff] }
  0x15   : > { %619 = vmatpush3.bf16.xpose.msra.mxu0 %v616_v4  ;;  %626 = vmatpush3.bf16.xpose.msra.mxu1 %v616_v4  ;;  %v308_v13 = vld [vmem:[%s277_s25 + $0x8] sm:$0xff] }
  0x16   : > { %621 = vmatprep.subr.bf16.mxu0 %v620_v8  ;;  %625 = vmatprep.subr.bf16.mxu1 %v620_v8 }
  0x17   : > { %420 = vperm.xlu1 %654, %v406_v9   ;;  %410 = vperm.xlu0 %653, %v404_v10  }
  0x1b   : > { %425 = vperm.xlu1 %654, %v407_v11   ;;  %415 = vperm.xlu0 %653, %v405_v12  }
  0x1d   : > { %623 = vmatpush3.bf16.xpose.msra.mxu0 %v620_v8  ;;  %627 = vmatpush3.bf16.xpose.msra.mxu1 %v620_v8 }
  0x24   : > { %611 = vmatmul.mubr.f32.vlgmr.msra.gmra.mrb[0].mxu0 %v308_v13  ;;  %614 = vmatmul.mubr.f32.vlgmr.msra.gmra.mrb[0].mxu1 %v310_v14 }
  0x96   : > { %v421_v15 = vpop.permute.xlu1 %420  ;;  %v411_v16 = vpop.permute.xlu0 %410 }
  0x9a   : > { %v426_v23 = vpop.permute.xlu1 %425  ;;  %v416_v24 = vpop.permute.xlu0 %415 }
  0xf7   : > { %v612_v17 = vpop.f32.mrb[0].mxu0  ;;  %v615_v18 = vpop.f32.mrb[0].mxu1 }
  0xf8   : > { %v401_v19 = vmul.f32 2.0, %v612_v17  ;;  %v403_v20 = vmul.f32 2.0, %v615_v18  ;;  %v381_v21 = vpop.f32.mrb[1].mxu0  ;;  %v391_v22 = vpop.f32.mrb[1].mxu1 }
  0xf9   : > { %v400_v26 = vmul.f32 2.0, %v381_v21  ;;  %v402_v27 = vmul.f32 2.0, %v391_v22 }
  0xfa   : > { %v429_v28 = vsub.f32 %v401_v19, %v416_v24  ;;  %v431_v29 = vsub.f32 %v403_v20, %v426_v23 }
  0xfb   : > { %v428_v30 = vsub.f32 %v400_v26, %v411_v16  ;;  %v430_v31 = vsub.f32 %v402_v27, %v421_v15 }
  0xfc   : > { %v440_v32 = vsub.f32 %v429_v28, %v587_v25  ;;  %v442_v33 = vsub.f32 %v431_v29, %v587_v25 }
  0xfd   : > { %v439_v34 = vsub.f32 %v428_v30, %v587_v25  ;;  %v441_v35 = vsub.f32 %v430_v31, %v587_v25 }
  0xfe   : > { %445 = vst.msk [vmem:[%s305_s8 + $0x8] sm:$0xff] %vm443_vm0, %v440_v32  ;;  %447 = vst.msk [vmem:[%s305_s8 + $0x18] sm:$0xff] %vm443_vm0, %v442_v33 }
  0xff   : > { %444 = vst.msk [vmem:[%s305_s8] sm:$0xff] %vm443_vm0, %v439_v34  ;;  %446 = vst.msk [vmem:[%s305_s8 + $0x10] sm:$0xff] %vm443_vm0, %v441_v35 }
 0x100 PF: > { %s14_s17 = sadd.s32 1, %s677_s17   ;;  %s762_s15 = smov %s673_s16 }
 0x101   : > { %p11_p5 = scmp.ge.s32.totalorder %s14_s17, 4   ;;  %s763_s16 = smov %s765_s18 }
 0x103   :  { %13 = sbr.rel (!%p11_p5) target bundleno = 2 (0x2), region = 75 }

// kernel: dgcnn_backbone.16
= control target key start
LH: loop header
LB: loop body
LE: loop exit
PB: predicated region body
PF: predicated region fallthrough
CT: control target
= control target key end

     0   :  { %s1129_s18 = smov 0   ;;  %s1131_s19 = smov 0   ;;  %s1338_s0 = inlined_call_operand.vmem [shape: bf16[2,256,128], index: 0, kind: input, shape index: {}]   ;;  %s1339_s1 = inlined_call_operand.vmem [shape: bf16[2,32,128], index: 1, kind: input, shape index: {}]   ;;  %s1340_s2 = inlined_call_operand.vmem [shape: bf16[128,256], index: 2, kind: input, shape index: {}]   ;;  %s1341_s3 = inlined_call_operand.vmem [shape: bf16[128,256], index: 3, kind: input, shape index: {}]   ;;  %s1342_s4 = inlined_call_operand.vmem [shape: f32[1,256], index: 4, kind: input, shape index: {}]   ;;  %s1343_s5 = inlined_call_operand.vmem [shape: f32[2,32,256], index: 5, kind: output, shape index: {}]  }
   0x1   :  { %s1133_s20 = smov 0   ;;  %s1135_s21 = smov 0  }
   0x2   :  { %s1137_s22 = smov 0  }
   0x3 LB: > { %s27_s23 = sadd.s32 1, %s1087_s20  ;;  %s34_s24 = sadd.s32 1, %s1091_s21  ;;  %s1095_s22 = sphi %s1137_s22, %s15_s22   ;;  %s1091_s21 = sphi %s1135_s21, %s1347_s21   ;;  %s1087_s20 = sphi %s1133_s20, %s1346_s20   ;;  %s1083_s19 = sphi %s1131_s19, %s1345_s19   ;;  %s1079_s18 = sphi %s1129_s18, %s1344_s18  }
   0x4   : > { %p28_p0 = scmp.ge.s32.totalorder %s27_s23, 8  ;;  %p880_p1 = scmp.ge.s32.totalorder %s1095_s22, 1 }
   0x5   : > { %p236_p2 = scmp.lt.s32.totalorder %s1095_s22, 17 }
   0x6   : > { %s1349_s23 = smov (%p28_p0, %s27_s23), 0  ;;  %s1351_s24 = smov (!%p28_p0, %s34_s24), %s1091_s21 }
   0x7   : > { %p237_p3 = pnand %p880_p1, %p236_p2  ;;  %p36_p4 = scmp.ge.s32.totalorder %s1351_s24, 2 }
   0x8   : > { %v1005_v0 = vld [vmem:[%s1340_s2 + $0x4] ss:$8 sps:$4 sm:$0xff] (!%p237_p3)   ;;  %s881_s27 = sshll.u32 (!%p237_p3), %s1079_s18, 2  ;;  %v1007_v1 = vld [vmem:[%s1340_s2] ss:$8 sps:$4 sm:$0xff] (!%p237_p3)   ;;  %v1097_v2 = vmov (!%p237_p3), 0  }
   0x9   : > { %s1353_s24 = smov (%p36_p4, %s1351_s24), 0  ;;  %240 = sbr.rel (%p237_p3) target bundleno = 532 (0x214), region = 40 }
   0xa   : > { %461 = vmatprep.mubr.bf16.mxu0 (!%p237_p3), %v1097_v2  ;;  %471 = vmatprep.mubr.bf16.mxu1 (!%p237_p3), %v1097_v2  ;;  %p285_p5 = scmp.lt.s32.totalorder (!%p237_p3), %s1083_s19, 1  ;;  %p287_p6 = scmp.lt.s32.totalorder (!%p237_p3), %s881_s27, 31  ;;  %v1008_v3 = vld [vmem:[%s1340_s2 + $0x14] ss:$8 sps:$4 sm:$0xff] (!%p237_p3)   ;;  %v1010_v4 = vld [vmem:[%s1340_s2 + $0x10] ss:$8 sps:$4 sm:$0xff] (!%p237_p3)  }
   0xb   : > { %429 = vmatprep.subr.bf16.mxu0 (!%p237_p3), %v1005_v0  ;;  %931 = vmatprep.subr.bf16.mxu1 (!%p237_p3), %v1005_v0  ;;  %v1011_v5 = vld [vmem:[%s1340_s2 + $0x24] ss:$8 sps:$4 sm:$0xff] (!%p237_p3)   ;;  %v1013_v6 = vld [vmem:[%s1340_s2 + $0x20] ss:$8 sps:$4 sm:$0xff] (!%p237_p3)   ;;  %v1014_v7 = vld [vmem:[%s1340_s2 + $0x34] ss:$8 sps:$4 sm:$0xff] (!%p237_p3)  }
   0xc   : > { %430 = vmatpush1.bf16.msra.mxu0 (!%p237_p3), %v1007_v1  ;;  %939 = vmatpush1.bf16.msra.mxu1 (!%p237_p3), %v1007_v1  ;;  %v1016_v8 = vld [vmem:[%s1340_s2 + $0x30] ss:$8 sps:$4 sm:$0xff] (!%p237_p3)   ;;  %v1017_v9 = vld [vmem:[%s1340_s2 + $0x44] ss:$8 sps:$4 sm:$0xff] (!%p237_p3)   ;;  %v1019_v10 = vld [vmem:[%s1340_s2 + $0x40] ss:$8 sps:$4 sm:$0xff] (!%p237_p3)  }
   0xd   : > { %431 = vmatprep.subr.bf16.mxu0 (!%p237_p3), %v1008_v3  ;;  %932 = vmatprep.subr.bf16.mxu1 (!%p237_p3), %v1008_v3  ;;  %v1020_v11 = vld [vmem:[%s1340_s2 + $0x54] ss:$8 sps:$4 sm:$0xff] (!%p237_p3)   ;;  %v1022_v12 = vld [vmem:[%s1340_s2 + $0x50] ss:$8 sps:$4 sm:$0xff] (!%p237_p3)   ;;  %v1023_v13 = vld [vmem:[%s1340_s2 + $0x64] ss:$8 sps:$4 sm:$0xff] (!%p237_p3)  }
   0xe   : > { %v1025_v14 = vld [vmem:[%s1340_s2 + $0x60] ss:$8 sps:$4 sm:$0xff] (!%p237_p3)   ;;  %v1026_v15 = vld [vmem:[%s1340_s2 + $0x74] ss:$8 sps:$4 sm:$0xff] (!%p237_p3)   ;;  %v1028_v16 = vld [vmem:[%s1340_s2 + $0x70] ss:$8 sps:$4 sm:$0xff] (!%p237_p3)  }
   0xf   : > { %p906_p7 = scmp.ne.s32.totalorder (!%p237_p3), %s1079_s18, 0 }
  0x10   : > { %s1355_s19 = smov (!%p285_p5, %s1083_s19), 1  ;;  %s1357_s27 = smov (!%p287_p6, %s881_s27), 31  ;;  %432 = vmatpush1.bf16.msra.mxu0 %v1010_v4  ;;  %940 = vmatpush1.bf16.msra.mxu1 %v1010_v4 }
  0x11   : > { %s882_s11 = sshll.u32 %s1355_s19, 5  ;;  %s929_s12 = sshll.u32 %s1355_s19, 4  ;;  %433 = vmatprep.subr.bf16.mxu0 %v1011_v5  ;;  %933 = vmatprep.subr.bf16.mxu1 %v1011_v5 }
  0x12   : > { %s290_s13 = sadd.s32 %s882_s11, %s1357_s27  ;;  %s1180_s16 = scalar_lea.vmem %s1339_s1, %s929_s12 }
  0x13   : > { %s883_s26 = sshll.u32 %s290_s13, 2  ;;  %s930_s30 = sshll.u32 %s1355_s19, 6 }
  0x14   : > { %s1191_s7 = scalar_lea.vmem %s1338_s0, %s883_s26  ;;  %s1196_s10 = scalar_lea.vmem %s1343_s5, %s930_s30  ;;  %434 = vmatpush1.bf16.msra.mxu0 %v1013_v6  ;;  %941 = vmatpush1.bf16.msra.mxu1 %v1013_v6 }
  0x15   : > { %435 = vmatprep.subr.bf16.mxu0 %v1014_v7  ;;  %934 = vmatprep.subr.bf16.mxu1 %v1014_v7  ;;  %v1029_v17 = vld [vmem:[%s1191_s7] sm:$0xff]   ;;  %v1030_v18 = vld [vmem:[%s1191_s7 + $0x8] sm:$0xff]  }
  0x18   : > { %436 = vmatpush1.bf16.msra.mxu0 %v1016_v8  ;;  %942 = vmatpush1.bf16.msra.mxu1 %v1016_v8 }
  0x19   : > { %437 = vmatprep.subr.bf16.mxu0 %v1017_v9  ;;  %935 = vmatprep.subr.bf16.mxu1 %v1017_v9 }
  0x1c   : > { %438 = vmatpush1.bf16.msra.mxu0 %v1019_v10  ;;  %943 = vmatpush1.bf16.msra.mxu1 %v1019_v10 }
  0x1d   : > { %439 = vmatprep.subr.bf16.mxu0 %v1020_v11  ;;  %936 = vmatprep.subr.bf16.mxu1 %v1020_v11 }
  0x20   : > { %440 = vmatpush1.bf16.msra.mxu0 %v1022_v12  ;;  %944 = vmatpush1.bf16.msra.mxu1 %v1022_v12 }
  0x21   : > { %441 = vmatprep.subr.bf16.mxu0 %v1023_v13  ;;  %937 = vmatprep.subr.bf16.mxu1 %v1023_v13 }
  0x24   : > { %442 = vmatpush1.bf16.msra.mxu0 %v1025_v14  ;;  %945 = vmatpush1.bf16.msra.mxu1 %v1025_v14 }
  0x25   : > { %443 = vmatprep.subr.bf16.mxu0 %v1026_v15  ;;  %938 = vmatprep.subr.bf16.mxu1 %v1026_v15 }
  0x28   : > { %444 = vmatpush1.bf16.msra.mxu0 %v1028_v16  ;;  %946 = vmatpush1.bf16.msra.mxu1 %v1028_v16 }
  0x2b   : > { %462 = vmatmul.mubr.bf16.vlgmr.msra.gmra.mrb[0].mxu0 %v1029_v17  ;;  %472 = vmatmul.mubr.bf16.vlgmr.msra.gmra.mrb[0].mxu1 %v1030_v18 }
  0xfb   : > { %485 = sbr.rel (%p906_p7) target bundleno = 259 (0x103), region = 44 }
  0xfe   : > { %v463_v19 = vpop.f32.mrb[0].mxu0  ;;  %v473_v20 = vpop.f32.mrb[0].mxu1 }
  0xff   : > { %v465_v21 = vpop.f32.mrb[1].mxu0  ;;  %v475_v22 = vpop.f32.mrb[1].mxu1  ;;  %486 = vst [vmem:[%s1196_s10] sm:$0xff] (!%p906_p7), %v463_v19  ;;  %490 = vst [vmem:[%s1196_s10 + $0x20] sm:$0xff] (!%p906_p7), %v473_v20 }
 0x100   : > { %v467_v23 = vpop.f32.mrb[2].mxu0  ;;  %v477_v24 = vpop.f32.mrb[2].mxu1  ;;  %487 = vst [vmem:[%s1196_s10 + $0x8] sm:$0xff] (!%p906_p7), %v465_v21  ;;  %491 = vst [vmem:[%s1196_s10 + $0x28] sm:$0xff] (!%p906_p7), %v475_v22 }
 0x101   : > { %v469_v25 = vpop.f32.mrb[3].mxu0  ;;  %v479_v26 = vpop.f32.mrb[3].mxu1  ;;  %488 = vst [vmem:[%s1196_s10 + $0x10] sm:$0xff] (!%p906_p7), %v467_v23  ;;  %492 = vst [vmem:[%s1196_s10 + $0x30] sm:$0xff] (!%p906_p7), %v477_v24 }
 0x102   : > { %489 = vst [vmem:[%s1196_s10 + $0x18] sm:$0xff] %v469_v25  ;;  %493 = vst [vmem:[%s1196_s10 + $0x38] sm:$0xff] %v479_v26 }
 0x103 PF: > { %p907_p8 = scmp.le.s32.totalorder %s1079_s18, 0 }
 0x105   : > { %497 = sbr.rel (%p907_p8) target bundleno = 271 (0x10f), region = 48 }
 0x107   : > { %v498_v27 = vld [vmem:[%s1196_s10] sm:$0xff] (!%p907_p8) }
 0x108   : > { %v499_v28 = vld [vmem:[%s1196_s10 + $0x8] sm:$0xff] (!%p907_p8)  ;;  %v506_v30 = vmax.f32 (!%p907_p8), %v498_v27, %v463_v19  ;;  %v502_v34 = vld [vmem:[%s1196_s10 + $0x20] sm:$0xff] (!%p907_p8) }
 0x109   : > { %v500_v29 = vld [vmem:[%s1196_s10 + $0x10] sm:$0xff] (!%p907_p8)  ;;  %v507_v31 = vmax.f32 (!%p907_p8), %v499_v28, %v465_v21  ;;  %v501_v33 = vld [vmem:[%s1196_s10 + $0x18] sm:$0xff] (!%p907_p8)  ;;  %v503_v35 = vld [vmem:[%s1196_s10 + $0x28] sm:$0xff] (!%p907_p8)  ;;  %v510_v37 = vmax.f32 (!%p907_p8), %v502_v34, %v473_v20 }
 0x10a   : > { %v508_v32 = vmax.f32 (!%p907_p8), %v500_v29, %v467_v23  ;;  %v509_v36 = vmax.f32 (!%p907_p8), %v501_v33, %v469_v25  ;;  %v511_v38 = vmax.f32 (!%p907_p8), %v503_v35, %v475_v22  ;;  %v504_v39 = vld [vmem:[%s1196_s10 + $0x30] sm:$0xff] (!%p907_p8)  ;;  %v505_v40 = vld [vmem:[%s1196_s10 + $0x38] sm:$0xff] (!%p907_p8)  ;;  %514 = vst [vmem:[%s1196_s10] sm:$0xff] (!%p907_p8), %v506_v30 }
 0x10b   : > { %515 = vst [vmem:[%s1196_s10 + $0x8] sm:$0xff] (!%p907_p8), %v507_v31  ;;  %v512_v41 = vmax.f32 (!%p907_p8), %v504_v39, %v477_v24  ;;  %v513_v42 = vmax.f32 (!%p907_p8), %v505_v40, %v479_v26  ;;  %518 = vst [vmem:[%s1196_s10 + $0x20] sm:$0xff] (!%p907_p8), %v510_v37 }
 0x10c   : > { %516 = vst [vmem:[%s1196_s10 + $0x10] sm:$0xff] %v508_v32  ;;  %517 = vst [vmem:[%s1196_s10 + $0x18] sm:$0xff] %v509_v36 }
 0x10d   : > { %519 = vst [vmem:[%s1196_s10 + $0x28] sm:$0xff] %v511_v38  ;;  %520 = vst [vmem:[%s1196_s10 + $0x30] sm:$0xff] %v512_v41 }
 0x10e   : > { %521 = vst [vmem:[%s1196_s10 + $0x38] sm:$0xff] %v513_v42 }
 0x10f PF: > { %p908_p9 = scmp.ne.s32.totalorder %s1079_s18, 7 }
 0x110   : > { %v1031_v43 = vld [vmem:[%s1341_s3 + $0x4] ss:$8 sps:$4 sm:$0xff] (!%p908_p9)   ;;  %v1033_v44 = vld [vmem:[%s1341_s3] ss:$8 sps:$4 sm:$0xff] (!%p908_p9)   ;;  %v1098_v45 = vmov (!%p908_p9), 0   ;;  %v709_v62 = vlaneseq (!%p908_p9) }
 0x111   : > { %525 = sbr.rel (%p908_p9) target bundleno = 532 (0x214), region = 52  ;;  %678 = vmatprep.mubr.bf16.mxu0 (!%p908_p9), %v1098_v45  ;;  %688 = vmatprep.mubr.bf16.mxu1 (!%p908_p9), %v1098_v45  ;;  %v1034_v46 = vld [vmem:[%s1341_s3 + $0x14] ss:$8 sps:$4 sm:$0xff] (!%p908_p9)   ;;  %v1036_v47 = vld [vmem:[%s1341_s3 + $0x10] ss:$8 sps:$4 sm:$0xff] (!%p908_p9)   ;;  %v1055_v60 = vld [vmem:[%s1180_s16] sm:$0xff] (!%p908_p9)  }
 0x112   : > { %646 = vmatprep.subr.bf16.mxu0 (!%p908_p9), %v1031_v43  ;;  %947 = vmatprep.subr.bf16.mxu1 (!%p908_p9), %v1031_v43  ;;  %v1037_v48 = vld [vmem:[%s1341_s3 + $0x24] ss:$8 sps:$4 sm:$0xff] (!%p908_p9)   ;;  %v1039_v49 = vld [vmem:[%s1341_s3 + $0x20] ss:$8 sps:$4 sm:$0xff] (!%p908_p9)   ;;  %v1040_v50 = vld [vmem:[%s1341_s3 + $0x34] ss:$8 sps:$4 sm:$0xff] (!%p908_p9)  }
 0x113   : > { %647 = vmatpush1.bf16.msra.mxu0 (!%p908_p9), %v1033_v44  ;;  %955 = vmatpush1.bf16.msra.mxu1 (!%p908_p9), %v1033_v44  ;;  %v1042_v51 = vld [vmem:[%s1341_s3 + $0x30] ss:$8 sps:$4 sm:$0xff] (!%p908_p9)   ;;  %v1043_v52 = vld [vmem:[%s1341_s3 + $0x44] ss:$8 sps:$4 sm:$0xff] (!%p908_p9)   ;;  %v1045_v53 = vld [vmem:[%s1341_s3 + $0x40] ss:$8 sps:$4 sm:$0xff] (!%p908_p9)  }
 0x114   : > { %648 = vmatprep.subr.bf16.mxu0 (!%p908_p9), %v1034_v46  ;;  %948 = vmatprep.subr.bf16.mxu1 (!%p908_p9), %v1034_v46  ;;  %v1046_v54 = vld [vmem:[%s1341_s3 + $0x54] ss:$8 sps:$4 sm:$0xff] (!%p908_p9)   ;;  %v1048_v55 = vld [vmem:[%s1341_s3 + $0x50] ss:$8 sps:$4 sm:$0xff] (!%p908_p9)   ;;  %v1049_v56 = vld [vmem:[%s1341_s3 + $0x64] ss:$8 sps:$4 sm:$0xff] (!%p908_p9)  }
 0x115   : > { %v1051_v57 = vld [vmem:[%s1341_s3 + $0x60] ss:$8 sps:$4 sm:$0xff] (!%p908_p9)   ;;  %v1052_v58 = vld [vmem:[%s1341_s3 + $0x74] ss:$8 sps:$4 sm:$0xff] (!%p908_p9)   ;;  %v1054_v59 = vld [vmem:[%s1341_s3 + $0x70] ss:$8 sps:$4 sm:$0xff] (!%p908_p9)  }
 0x116   : > { %v1056_v61 = vld [vmem:[%s1180_s16 + $0x8] sm:$0xff] (!%p908_p9)   ;;  %v710_v63 = vshrl.u32 (!%p908_p9), %v709_v62, 7  ;;  %v707_v1 = vld [vmem:[%s1342_s4] sm:$0x3] (!%p908_p9)  ;;  %v528_v11 = vld [vmem:[%s1196_s10 + $0x10] sm:$0xff] (!%p908_p9) }
 0x117   : > { %649 = vmatpush1.bf16.msra.mxu0 (!%p908_p9), %v1036_v47  ;;  %956 = vmatpush1.bf16.msra.mxu1 (!%p908_p9), %v1036_v47  ;;  %v526_v3 = vld [vmem:[%s1196_s10] sm:$0xff] (!%p908_p9)  ;;  %v527_v6 = vld [vmem:[%s1196_s10 + $0x8] sm:$0xff] (!%p908_p9)  ;;  %v532_v12 = vld [vmem:[%s1196_s10 + $0x30] sm:$0xff] (!%p908_p9) }
 0x118   : > { %650 = vmatprep.subr.bf16.mxu0 %v1037_v48  ;;  %949 = vmatprep.subr.bf16.mxu1 %v1037_v48  ;;  %v711_v0 = vsub.s32 0, %v710_v63  ;;  %v715_v2 = vsub.s32 1, %v710_v63  ;;  %v530_v4 = vld [vmem:[%s1196_s10 + $0x20] sm:$0xff]  ;;  %v531_v7 = vld [vmem:[%s1196_s10 + $0x28] sm:$0xff]  ;;  %v529_v17 = vld [vmem:[%s1196_s10 + $0x18] sm:$0xff] }
 0x119   : > { %v533_v18 = vld [vmem:[%s1196_s10 + $0x38] sm:$0xff] }
 0x11a   : > { %v712_v5 = vrot.slane %v707_v1, %v711_v0  ;;  %v716_v10 = vrot.slane %v707_v1, %v715_v2 }
 0x11b   : > { %651 = vmatpush1.bf16.msra.mxu0 %v1039_v49  ;;  %957 = vmatpush1.bf16.msra.mxu1 %v1039_v49 }
 0x11c   : > { %652 = vmatprep.subr.bf16.mxu0 %v1040_v50  ;;  %950 = vmatprep.subr.bf16.mxu1 %v1040_v50 }
 0x11f   : > { %653 = vmatpush1.bf16.msra.mxu0 %v1042_v51  ;;  %958 = vmatpush1.bf16.msra.mxu1 %v1042_v51 }
 0x120   : > { %654 = vmatprep.subr.bf16.mxu0 %v1043_v52  ;;  %951 = vmatprep.subr.bf16.mxu1 %v1043_v52 }
 0x123   : > { %655 = vmatpush1.bf16.msra.mxu0 %v1045_v53  ;;  %959 = vmatpush1.bf16.msra.mxu1 %v1045_v53 }
 0x124   : > { %656 = vmatprep.subr.bf16.mxu0 %v1046_v54  ;;  %952 = vmatprep.subr.bf16.mxu1 %v1046_v54 }
 0x127   : > { %657 = vmatpush1.bf16.msra.mxu0 %v1048_v55  ;;  %960 = vmatpush1.bf16.msra.mxu1 %v1048_v55 }
 0x128   : > { %658 = vmatprep.subr.bf16.mxu0 %v1049_v56  ;;  %953 = vmatprep.subr.bf16.mxu1 %v1049_v56 }
 0x12b   : > { %659 = vmatpush1.bf16.msra.mxu0 %v1051_v57  ;;  %961 = vmatpush1.bf16.msra.mxu1 %v1051_v57 }
 0x12c   : > { %660 = vmatprep.subr.bf16.mxu0 %v1052_v58  ;;  %954 = vmatprep.subr.bf16.mxu1 %v1052_v58 }
 0x12f   : > { %661 = vmatpush1.bf16.msra.mxu0 %v1054_v59  ;;  %962 = vmatpush1.bf16.msra.mxu1 %v1054_v59 }
 0x132   : > { %679 = vmatmul.mubr.bf16.vlgmr.msra.gmra.mrb[0].mxu0 %v1055_v60  ;;  %689 = vmatmul.mubr.bf16.vlgmr.msra.gmra.mrb[0].mxu1 %v1056_v61 }
 0x205   : > { %v680_v8 = vpop.f32.mrb[0].mxu0  ;;  %v690_v9 = vpop.f32.mrb[0].mxu1 }
 0x206   : > { %v699_v13 = vadd.f32 %v680_v8, %v526_v3  ;;  %v703_v14 = vadd.f32 %v690_v9, %v530_v4  ;;  %v682_v15 = vpop.f32.mrb[1].mxu0  ;;  %v692_v16 = vpop.f32.mrb[1].mxu1 }
 0x207   : > { %v700_v19 = vadd.f32 %v682_v15, %v527_v6  ;;  %v704_v20 = vadd.f32 %v692_v16, %v531_v7  ;;  %v684_v21 = vpop.f32.mrb[2].mxu0  ;;  %v694_v22 = vpop.f32.mrb[2].mxu1 }
 0x208   : > { %v719_v23 = vadd.f32 %v712_v5, %v699_v13  ;;  %v723_v24 = vadd.f32 %v712_v5, %v703_v14  ;;  %v701_v25 = vadd.f32 %v684_v21, %v528_v11  ;;  %v705_v26 = vadd.f32 %v694_v22, %v532_v12  ;;  %v686_v27 = vpop.f32.mrb[3].mxu0  ;;  %v696_v28 = vpop.f32.mrb[3].mxu1 }
 0x209   : > { %v720_v29 = vadd.f32 %v716_v10, %v700_v19  ;;  %v724_v30 = vadd.f32 %v716_v10, %v704_v20  ;;  %v702_v31 = vadd.f32 %v686_v27, %v529_v17  ;;  %v706_v32 = vadd.f32 %v696_v28, %v533_v18 }
 0x20a   : > { %vm727_vm0 = vcmp.ge.f32.partialorder %v719_v23, 0.0  ;;  %v735_v33 = vmul.f32 0.2, %v719_v23  ;;  %vm731_vm1 = vcmp.ge.f32.partialorder %v723_v24, 0.0  ;;  %v739_v34 = vmul.f32 0.2, %v723_v24 }
 0x20b   : > { %vm728_vm2 = vcmp.ge.f32.partialorder %v720_v29, 0.0  ;;  %v736_v35 = vmul.f32 0.2, %v720_v29  ;;  %vm732_vm3 = vcmp.ge.f32.partialorder %v724_v30, 0.0  ;;  %v740_v36 = vmul.f32 0.2, %v724_v30 }
 0x20c   : > { %v743_v37 = vsel %vm727_vm0, %v719_v23, %v735_v33  ;;  %v747_v38 = vsel %vm731_vm1, %v723_v24, %v739_v34  ;;  %v721_v39 = vadd.f32 %v712_v5, %v701_v25  ;;  %v725_v40 = vadd.f32 %v712_v5, %v705_v26 }
 0x20d   : > { %751 = vst [vmem:[%s1196_s10] sm:$0xff] %v743_v37  ;;  %755 = vst [vmem:[%s1196_s10 + $0x20] sm:$0xff] %v747_v38  ;;  %v744_v41 = vsel %vm728_vm2, %v720_v29, %v736_v35  ;;  %v748_v42 = vsel %vm732_vm3, %v724_v30, %v740_v36  ;;  %v722_v43 = vadd.f32 %v716_v10, %v702_v31 }
 0x20e   : > { %v726_v44 = vadd.f32 %v716_v10, %v706_v32  ;;  %752 = vst [vmem:[%s1196_s10 + $0x8] sm:$0xff] %v744_v41  ;;  %756 = vst [vmem:[%s1196_s10 + $0x28] sm:$0xff] %v748_v42  ;;  %vm729_vm4 = vcmp.ge.f32.partialorder %v721_v39, 0.0  ;;  %v737_v45 = vmul.f32 0.2, %v721_v39  ;;  %vm733_vm5 = vcmp.ge.f32.partialorder %v725_v40, 0.0 }
 0x20f   : > { %v741_v46 = vmul.f32 0.2, %v725_v40  ;;  %vm730_vm6 = vcmp.ge.f32.partialorder %v722_v43, 0.0  ;;  %v738_v47 = vmul.f32 0.2, %v722_v43 }
 0x210   : > { %vm734_vm7 = vcmp.ge.f32.partialorder %v726_v44, 0.0  ;;  %v742_v48 = vmul.f32 0.2, %v726_v44  ;;  %v745_v49 = vsel %vm729_vm4, %v721_v39, %v737_v45 }
 0x211   : > { %v749_v50 = vsel %vm733_vm5, %v725_v40, %v741_v46  ;;  %753 = vst [vmem:[%s1196_s10 + $0x10] sm:$0xff] %v745_v49  ;;  %v746_v51 = vsel %vm730_vm6, %v722_v43, %v738_v47 }
 0x212   : > { %757 = vst [vmem:[%s1196_s10 + $0x30] sm:$0xff] %v749_v50  ;;  %v750_v52 = vsel %vm734_vm7, %v726_v44, %v742_v48  ;;  %754 = vst [vmem:[%s1196_s10 + $0x18] sm:$0xff] %v746_v51 }
 0x213   : > { %758 = vst [vmem:[%s1196_s10 + $0x38] sm:$0xff] %v750_v52 }
 0x214 PF: > { %s15_s22 = sadd.s32 1, %s1095_s22   ;;  %s1344_s18 = smov %s1087_s20 }
 0x215   : > { %p12_p10 = scmp.ge.s32.totalorder %s15_s22, 18   ;;  %s1345_s19 = smov %s1091_s21 }
 0x216   : > { %s1346_s20 = smov %s1349_s23  ;;  %s1347_s21 = smov %s1353_s24 }
 0x217   :  { %14 = sbr.rel (!%p12_p10) target bundleno = 3 (0x3), region = 85 }

// kernel: dgcnn_backbone.17
= control target key start
LH: loop header
LB: loop body
LE: loop exit
PB: predicated region body
PF: predicated region fallthrough
CT: control target
= control target key end

     0   :  { %s1449_s30 = smov 0   ;;  %s1451_s10 = smov 0   ;;  %s1624_s0 = inlined_call_operand.vmem [shape: f32[2,32,64], index: 0, kind: input, shape index: {}]   ;;  %s1625_s1 = inlined_call_operand.vmem [shape: f32[2,32,64], index: 1, kind: input, shape index: {}]   ;;  %s1626_s2 = inlined_call_operand.vmem [shape: f32[2,32,128], index: 2, kind: input, shape index: {}]   ;;  %s1627_s3 = inlined_call_operand.vmem [shape: f32[2,32,256], index: 3, kind: input, shape index: {}]   ;;  %s1628_s4 = inlined_call_operand.vmem [shape: bf16[64,64], index: 4, kind: input, shape index: {}]   ;;  %s1629_s5 = inlined_call_operand.vmem [shape: bf16[64,64], index: 5, kind: input, shape index: {}]   ;;  %s1630_s6 = inlined_call_operand.vmem [shape: bf16[128,64], index: 6, kind: input, shape index: {}]   ;;  %s1631_s7 = inlined_call_operand.vmem [shape: bf16[256,64], index: 7, kind: input, shape index: {}]   ;;  %s1632_s8 = inlined_call_operand.vmem [shape: f32[1,64], index: 8, kind: input, shape index: {}]   ;;  %s1633_s9 = inlined_call_operand.vmem [shape: f32[2,32,64], index: 9, kind: output, shape index: {}]  }
   0x1   :  { %s1453_s11 = smov 0  }
   0x2 LB: > { %s31_s12 = sadd.s32 1, %s1393_s10  ;;  %p1162_p0 = scmp.ge.s32.totalorder %s1397_s11, 1  ;;  %s1397_s11 = sphi %s1453_s11, %s19_s11   ;;  %s1393_s10 = sphi %s1451_s10, %s1635_s10   ;;  %s1389_s30 = sphi %s1449_s30, %s1634_s30  }
   0x3   : > { %p33_p1 = scmp.ge.s32.totalorder %s31_s12, 2  ;;  %p360_p2 = scmp.lt.s32.totalorder %s1397_s11, 3 }
   0x5   : > { %s1637_s12 = smov (%p33_p1, %s31_s12), 0  ;;  %p361_p3 = pnand %p1162_p0, %p360_p2 }
   0x6   : > { %v1343_v0 = vld [vmem:[%s1629_s5] sm:$0xff] (!%p361_p3)   ;;  %p433_p4 = scmp.lt.s32.totalorder (!%p361_p3), %s1389_s30, 1  ;;  %v1345_v2 = vld [vmem:[%s1629_s5 + $0x8] sm:$0xff] (!%p361_p3)   ;;  %v1347_v4 = vld [vmem:[%s1629_s5 + $0x10] sm:$0xff] (!%p361_p3)   ;;  %vm536_vm0 = vcmask (!%p361_p3), 523264  }
   0x7   : > { %364 = sbr.rel (%p361_p3) target bundleno = 288 (0x120), region = 56  ;;  %v1344_v1 = vld [vmem:[%s1628_s4] sm:$0xff] (!%p361_p3)   ;;  %1267 = vmatprep.subr.bf16.mxu1 (!%p361_p3), %v1343_v0  ;;  %v1346_v3 = vld [vmem:[%s1628_s4 + $0x8] sm:$0xff] (!%p361_p3)   ;;  %v1348_v5 = vld [vmem:[%s1628_s4 + $0x10] sm:$0xff] (!%p361_p3)  }
   0x8   : > { %1279 = vmatprep.subr.bf16.mxu0 (!%p361_p3), %v1344_v1  ;;  %1268 = vmatpush3.bf16.msra.mxu1 (!%p361_p3), %v1343_v0  ;;  %v1349_v6 = vld [vmem:[%s1629_s5 + $0x18] sm:$0xff] (!%p361_p3)   ;;  %v1352_v16 = vld [vmem:[%s1631_s7 + $0x40] sm:$0xff] (!%p361_p3)   ;;  %v1355_v23 = vld [vmem:[%s1631_s7 + $0x48] sm:$0xff] (!%p361_p3)  }
   0x9   : > { %1280 = vmatpush3.bf16.msra.mxu0 (!%p361_p3), %v1344_v1  ;;  %1269 = vmatprep.subr.bf16.mxu1 (!%p361_p3), %v1345_v2  ;;  %v1350_v7 = vld [vmem:[%s1628_s4 + $0x18] sm:$0xff] (!%p361_p3)   ;;  %v1351_v19 = vld [vmem:[%s1630_s6] sm:$0xff] (!%p361_p3)   ;;  %v1354_v24 = vld [vmem:[%s1630_s6 + $0x8] sm:$0xff] (!%p361_p3)  }
   0xa   : > { %1281 = vmatprep.subr.bf16.mxu0 (!%p361_p3), %v1346_v3  ;;  %v1353_v22 = vld [vmem:[%s1631_s7] sm:$0xff] (!%p361_p3)   ;;  %v1356_v25 = vld [vmem:[%s1631_s7 + $0x8] sm:$0xff] (!%p361_p3)   ;;  %v1358_v26 = vld [vmem:[%s1631_s7 + $0x50] sm:$0xff] (!%p361_p3)  }
   0xb   : > { %v1357_v27 = vld [vmem:[%s1630_s6 + $0x10] sm:$0xff] (!%p361_p3)   ;;  %v1361_v29 = vld [vmem:[%s1631_s7 + $0x58] sm:$0xff] (!%p361_p3)   ;;  %v1364_v32 = vld [vmem:[%s1631_s7 + $0x60] sm:$0xff] (!%p361_p3)  }
   0xc   : > { %1270 = vmatpush3.bf16.msra.mxu1 (!%p361_p3), %v1345_v2  ;;  %v1359_v28 = vld [vmem:[%s1631_s7 + $0x10] sm:$0xff] (!%p361_p3)   ;;  %v1360_v30 = vld [vmem:[%s1630_s6 + $0x18] sm:$0xff] (!%p361_p3)   ;;  %v1363_v33 = vld [vmem:[%s1630_s6 + $0x20] sm:$0xff] (!%p361_p3)  }
   0xd   : > { %1282 = vmatpush3.bf16.msra.mxu0 (!%p361_p3), %v1346_v3  ;;  %1271 = vmatprep.subr.bf16.mxu1 (!%p361_p3), %v1347_v4  ;;  %v1362_v31 = vld [vmem:[%s1631_s7 + $0x18] sm:$0xff] (!%p361_p3)   ;;  %v1365_v34 = vld [vmem:[%s1631_s7 + $0x20] sm:$0xff] (!%p361_p3)   ;;  %v1367_v35 = vld [vmem:[%s1631_s7 + $0x68] sm:$0xff] (!%p361_p3)  }
   0xe   : > { %s1639_s30 = smov (!%p433_p4, %s1389_s30), 1  ;;  %1283 = vmatprep.subr.bf16.mxu0 %v1348_v5  ;;  %v1366_v36 = vld [vmem:[%s1630_s6 + $0x28] sm:$0xff]   ;;  %v1370_v42 = vld [vmem:[%s1631_s7 + $0x70] sm:$0xff]   ;;  %v1373_v47 = vld [vmem:[%s1631_s7 + $0x78] sm:$0xff]  }
   0xf   : > { %s1485_s23 = sshll.u32 %s1639_s30, 5  ;;  %s1215_s13 = sshll.u32 %s1639_s30, 6  ;;  %v1368_v37 = vld [vmem:[%s1631_s7 + $0x28] sm:$0xff]   ;;  %v1369_v45 = vld [vmem:[%s1630_s6 + $0x30] sm:$0xff]   ;;  %v1372_v48 = vld [vmem:[%s1630_s6 + $0x38] sm:$0xff]  }
  0x10   : > { %s450_s28 = scalar_lea.vmem %s1625_s1, %s1485_s23  ;;  %s440_s16 = scalar_lea.vmem %s1624_s0, %s1485_s23  ;;  %1272 = vmatpush3.bf16.msra.mxu1 %v1347_v4  ;;  %v1371_v46 = vld [vmem:[%s1631_s7 + $0x30] sm:$0xff]   ;;  %v1374_v49 = vld [vmem:[%s1631_s7 + $0x38] sm:$0xff]  }
  0x11   : > { %v498_v8 = vld [vmem:[%s450_s28] sm:$0xff]  ;;  %v499_v9 = vld [vmem:[%s450_s28 + $0x8] sm:$0xff]  ;;  %v500_v11 = vld [vmem:[%s450_s28 + $0x10] sm:$0xff]  ;;  %1284 = vmatpush3.bf16.msra.mxu0 %v1348_v5  ;;  %1273 = vmatprep.subr.bf16.mxu1 %v1349_v6  ;;  %s1558_s20 = scalar_lea.vmem %s1626_s2, %s1485_s23  ;;  %s1563_s30 = scalar_lea.vmem %s1627_s3, %s1215_s13 }
  0x12   : > { %v502_v10 = vpack.c.bf16 %v499_v9, %v498_v8  ;;  %v484_v12 = vld [vmem:[%s440_s16] sm:$0xff]  ;;  %v485_v13 = vld [vmem:[%s440_s16 + $0x8] sm:$0xff]  ;;  %v501_v14 = vld [vmem:[%s450_s28 + $0x18] sm:$0xff]  ;;  %1285 = vmatprep.subr.bf16.mxu0 %v1350_v7  ;;  %s481_s29 = scalar_lea.vmem %s1633_s9, %s1485_s23 }
  0x13   : > { %v488_v15 = vpack.c.bf16 %v485_v13, %v484_v12  ;;  %v486_v17 = vld [vmem:[%s440_s16 + $0x10] sm:$0xff]  ;;  %v487_v18 = vld [vmem:[%s440_s16 + $0x18] sm:$0xff]  ;;  %v503_v20 = vpack.c.bf16 %v501_v14, %v500_v11  ;;  %v671_v38 = vld [vmem:[%s1558_s20] sm:$0xff] }
  0x14   : > { %1275 = vmatprep.mubr.msk.bf16.mxu1 %vm536_vm0, %v502_v10  ;;  %1274 = vmatpush3.bf16.msra.mxu1 %v1349_v6  ;;  %v489_v21 = vpack.c.bf16 %v487_v18, %v486_v17  ;;  %v672_v39 = vld [vmem:[%s1558_s20 + $0x8] sm:$0xff]  ;;  %v797_v41 = vld [vmem:[%s1563_s30 + $0x18] sm:$0xff]  ;;  %v673_v50 = vld [vmem:[%s1558_s20 + $0x10] sm:$0xff] }
  0x15   : > { %1287 = vmatprep.mubr.msk.bf16.mxu0 %vm536_vm0, %v488_v15  ;;  %1286 = vmatpush3.bf16.msra.mxu0 %v1350_v7  ;;  %v795_v40 = vld [vmem:[%s1563_s30 + $0x8] sm:$0xff]  ;;  %v675_v43 = vpack.c.bf16 %v672_v39, %v671_v38  ;;  %v794_v51 = vld [vmem:[%s1563_s30] sm:$0xff]  ;;  %v796_v52 = vld [vmem:[%s1563_s30 + $0x10] sm:$0xff] }
  0x16   : > { %1239 = vmatprep.subr.bf16.mxu1 %v1352_v16  ;;  %1291 = vmatprep.subr.bf16.mxu0 %v1351_v19  ;;  %v803_v44 = vpack.c.bf16 %v797_v41, %v795_v40  ;;  %v674_v53 = vld [vmem:[%s1558_s20 + $0x18] sm:$0xff]  ;;  %v799_v54 = vld [vmem:[%s1563_s30 + $0x28] sm:$0xff]  ;;  %v802_v56 = vpack.c.bf16 %v796_v52, %v794_v51  ;;  %v798_v59 = vld [vmem:[%s1563_s30 + $0x20] sm:$0xff] }
  0x17   : > { %1276 = vmatmul.mubr.msk.bf16.vlgmr.msra.gmra.mrb[0].mxu1 %vm536_vm0, %v503_v20  ;;  %v801_v55 = vld [vmem:[%s1563_s30 + $0x38] sm:$0xff]  ;;  %v676_v57 = vpack.c.bf16 %v674_v53, %v673_v50  ;;  %v800_v60 = vld [vmem:[%s1563_s30 + $0x30] sm:$0xff]  ;;  %v1209_v12 = vld [vmem:[%s1632_s8] ss:$0 sm:$0xff] }
  0x18   : > { %1288 = vmatmul.mubr.msk.bf16.vlgmr.msra.gmra.mrb[0].mxu0 %vm536_vm0, %v489_v21  ;;  %1240 = vmatpush3.bf16.msra.mxu1 %v1353_v22  ;;  %v805_v58 = vpack.c.bf16 %v801_v55, %v799_v54  ;;  %v804_v61 = vpack.c.bf16 %v800_v60, %v798_v59 }
  0x19   : > { %1292 = vmatpush3.bf16.msra.mxu0 %v1351_v19  ;;  %1241 = vmatprep.subr.bf16.mxu1 %v1355_v23 }
  0x1a   : > { %1293 = vmatprep.subr.bf16.mxu0 %v1354_v24  ;;  %1307 = vmatprep.mubr.bf16.mxu0 %v675_v43 }
  0x1b   : > { %966 = vmatprep.mubr.bf16.mxu1 %v803_v44 }
  0x1c   : > { %1242 = vmatpush3.bf16.msra.mxu1 %v1356_v25 }
  0x1d   : > { %1294 = vmatpush3.bf16.msra.mxu0 %v1354_v24  ;;  %1243 = vmatprep.subr.bf16.mxu1 %v1358_v26 }
  0x1e   : > { %1295 = vmatprep.subr.bf16.mxu0 %v1357_v27 }
  0x20   : > { %1244 = vmatpush3.bf16.msra.mxu1 %v1359_v28 }
  0x21   : > { %1296 = vmatpush3.bf16.msra.mxu0 %v1357_v27  ;;  %1245 = vmatprep.subr.bf16.mxu1 %v1361_v29 }
  0x22   : > { %1297 = vmatprep.subr.bf16.mxu0 %v1360_v30 }
  0x24   : > { %1246 = vmatpush3.bf16.msra.mxu1 %v1362_v31 }
  0x25   : > { %1298 = vmatpush3.bf16.msra.mxu0 %v1360_v30  ;;  %1247 = vmatprep.subr.bf16.mxu1 %v1364_v32 }
  0x26   : > { %1299 = vmatprep.subr.bf16.mxu0 %v1363_v33 }
  0x28   : > { %1248 = vmatpush3.bf16.msra.mxu1 %v1365_v34 }
  0x29   : > { %1300 = vmatpush3.bf16.msra.mxu0 %v1363_v33  ;;  %1249 = vmatprep.subr.bf16.mxu1 %v1367_v35 }
  0x2a   : > { %1301 = vmatprep.subr.bf16.mxu0 %v1366_v36 }
  0x2c   : > { %1250 = vmatpush3.bf16.msra.mxu1 %v1368_v37 }
  0x2d   : > { %1302 = vmatpush3.bf16.msra.mxu0 %v1366_v36  ;;  %1251 = vmatprep.subr.bf16.mxu1 %v1370_v42 }
  0x2e   : > { %1303 = vmatprep.subr.bf16.mxu0 %v1369_v45 }
  0x30   : > { %1252 = vmatpush3.bf16.msra.mxu1 %v1371_v46 }
  0x31   : > { %1304 = vmatpush3.bf16.msra.mxu0 %v1369_v45  ;;  %1253 = vmatprep.subr.bf16.mxu1 %v1373_v47 }
  0x32   : > { %1305 = vmatprep.subr.bf16.mxu0 %v1372_v48 }
  0x34   : > { %1254 = vmatpush3.bf16.msra.mxu1 %v1374_v49 }
  0x35   : > { %1306 = vmatpush3.bf16.msra.mxu0 %v1372_v48 }
  0x37   : > { %967 = vmatmul.mubr.bf16.vlgmr.msra.gmra.mrb[4].mxu1 %v802_v56 }
  0x38   : > { %1308 = vmatmul.mubr.bf16.vlgmr.msra.gmra.mrb[0].mxu0 %v676_v57  ;;  %974 = vmatprep.mubr.bf16.mxu1 %v805_v58 }
  0x3f   : > { %975 = vmatmul.mubr.bf16.gmra.mrb[8].mxu1 %v804_v61 }
  0xea   : > { %v1277_v62 = vpop.f32.mrb[0].mxu1 }
  0xeb   : > { %v577_v63 = vpop.f32.mrb[1].mxu1 }
  0xec   : > { %v1278_v0 = vpop.f32.mrb[2].mxu1 }
  0xed   : > { %v580_v1 = vpop.f32.mrb[3].mxu1 }
 0x10a   : > { %v1255_v2 = vpop.f32.mrb[4].mxu1 }
 0x10b   : > { %v1309_v3 = vpop.f32.mrb[0].mxu0  ;;  %v1256_v4 = vpop.f32.mrb[5].mxu1 }
 0x10c   : > { %v1311_v5 = vadd.f32 %v1309_v3, %v1277_v62  ;;  %v775_v6 = vpop.f32.mrb[1].mxu0  ;;  %v1257_v7 = vadd.f32 %v1256_v4, %v1255_v2  ;;  %v1258_v8 = vpop.f32.mrb[6].mxu1 }
 0x10d   : > { %v1312_v9 = vadd.f32 %v775_v6, %v577_v63  ;;  %v1310_v10 = vpop.f32.mrb[2].mxu0  ;;  %v1259_v11 = vpop.f32.mrb[7].mxu1 }
 0x10e   : > { %v1313_v13 = vadd.f32 %v1310_v10, %v1278_v0  ;;  %v778_v14 = vpop.f32.mrb[3].mxu0  ;;  %v1260_v15 = vadd.f32 %v1259_v11, %v1258_v8 }
 0x10f   : > { %v983_v16 = vadd.f32 %v1312_v9, %v1257_v7  ;;  %v1314_v17 = vadd.f32 %v778_v14, %v580_v1 }
 0x111   : > { %v994_v18 = vadd.f32 %v1209_v12, %v983_v16  ;;  %v984_v19 = vadd.f32 %v1314_v17, %v1260_v15 }
 0x112   : > { %v1261_v20 = vpop.f32.mrb[8].mxu1 }
 0x113   : > { %vm998_vm1 = vcmp.ge.f32.partialorder %v994_v18, 0.0  ;;  %v1002_v21 = vmul.f32 0.2, %v994_v18  ;;  %v995_v22 = vadd.f32 %v1209_v12, %v984_v19  ;;  %v1262_v23 = vpop.f32.mrb[9].mxu1 }
 0x114   : > { %v1263_v24 = vadd.f32 %v1262_v23, %v1261_v20  ;;  %v1264_v25 = vpop.f32.mrb[10].mxu1 }
 0x115   : > { %v1006_v26 = vsel %vm998_vm1, %v994_v18, %v1002_v21  ;;  %vm999_vm2 = vcmp.ge.f32.partialorder %v995_v22, 0.0  ;;  %v1003_v27 = vmul.f32 0.2, %v995_v22  ;;  %v1265_v28 = vpop.f32.mrb[11].mxu1 }
 0x116   : > { %1010 = vst.msk [vmem:[%s481_s29] sm:$0xff] %vm536_vm0, %v1006_v26  ;;  %v985_v29 = vadd.f32 %v1311_v5, %v1263_v24  ;;  %v1266_v30 = vadd.f32 %v1265_v28, %v1264_v25 }
 0x117   : > { %v1007_v31 = vsel %vm999_vm2, %v995_v22, %v1003_v27 }
 0x118   : > { %1011 = vst.msk [vmem:[%s481_s29 + $0x8] sm:$0xff] %vm536_vm0, %v1007_v31  ;;  %v996_v32 = vadd.f32 %v1209_v12, %v985_v29  ;;  %v986_v33 = vadd.f32 %v1313_v13, %v1266_v30 }
 0x11a   : > { %vm1000_vm3 = vcmp.ge.f32.partialorder %v996_v32, 0.0  ;;  %v1004_v34 = vmul.f32 0.2, %v996_v32  ;;  %v997_v35 = vadd.f32 %v1209_v12, %v986_v33 }
 0x11c   : > { %v1008_v36 = vsel %vm1000_vm3, %v996_v32, %v1004_v34  ;;  %vm1001_vm4 = vcmp.ge.f32.partialorder %v997_v35, 0.0  ;;  %v1005_v37 = vmul.f32 0.2, %v997_v35 }
 0x11d   : > { %1012 = vst.msk [vmem:[%s481_s29 + $0x10] sm:$0xff] %vm536_vm0, %v1008_v36 }
 0x11e   : > { %v1009_v38 = vsel %vm1001_vm4, %v997_v35, %v1005_v37 }
 0x11f   : > { %1013 = vst.msk [vmem:[%s481_s29 + $0x18] sm:$0xff] %vm536_vm0, %v1009_v38 }
 0x120 PF: > { %s19_s11 = sadd.s32 1, %s1397_s11   ;;  %s1634_s30 = smov %s1393_s10 }
 0x121   : > { %p16_p5 = scmp.ge.s32.totalorder %s19_s11, 4   ;;  %s1635_s10 = smov %s1637_s12 }
 0x123   :  { %18 = sbr.rel (!%p16_p5) target bundleno = 2 (0x2), region = 95 }

</bundles_post_ra>
